<compile_context>
chip_gen: v7x
topology: tpu7x:2x2x1
jax: 0.10.0
libtpu: 0.0.40
codegen_flags: <defaults>
</compile_context>

<pallas_src>
import jax
import jax.numpy as jnp
from jax.experimental import pallas as pl
from jax.experimental.pallas import tpu as pltpu


# ------------------------------ fused kernel ------------------------------- #

def _detector_kernel(x_ref, w1_ref, b1_ref, w2_ref, b2_ref,
                     wa_ref, ba_ref, ws_ref, bs_ref, we_ref, be_ref,
                     seg_ref, ex_ref, xp1, xp2):
    # x_ref : (1, H, W, Cin)   one batch element, NHWC
    # w1_ref: (9*Cin, Cmid)    flattened HWIO 3x3 weights, b1_ref: (1, Cmid)
    # w2_ref: (9*Cmid, Cfea)   flattened HWIO 3x3 weights, b2_ref: (1, Cfea)
    # wa_ref: (Cfea, Cfea)     aggregator weight (transposed), ba_ref: (Cfea, 1)
    # ws_ref: (K, Cfea)        seg head weight (transposed),   bs_ref: (K, 1)
    # we_ref: (L, Cfea)        exist head weight (transposed), be_ref: (L, 1)
    # seg_ref: (1, K, H*W)     seg logits, NCHW-flattened (lane-dense store)
    # ex_ref : (1, L, 1)       lane-exist probabilities
    # xp1: VMEM (H+2, W+2, Cin)   padded input scratch
    # xp2: VMEM (H+2, W+2, Cmid)  padded stage-1 feature scratch
    _, H, W, Cin = x_ref.shape
    Cmid = w1_ref.shape[1]
    Cfea = w2_ref.shape[1]
    HW = H * W

    # ---- backbone stage 1: 3x3 conv + ReLU (im2col, single MXU push) ----
    xp1[...] = jnp.zeros_like(xp1)
    xp1[1:H + 1, 1:W + 1, :] = x_ref[0]
    taps1 = [xp1[kh:kh + H, kw:kw + W, :].reshape(HW, Cin)
             for kh in range(3) for kw in range(3)]
    patches1 = jnp.concatenate(taps1, axis=-1)                 # (HW, 9*Cin)
    f1 = jnp.maximum(
        jnp.dot(patches1, w1_ref[...], preferred_element_type=jnp.float32)
        + b1_ref[...], 0.0)                                    # (HW, Cmid)

    # ---- backbone stage 2: 3x3 conv + ReLU ----
    xp2[...] = jnp.zeros_like(xp2)
    xp2[1:H + 1, 1:W + 1, :] = f1.reshape(H, W, Cmid)
    taps2 = [xp2[kh:kh + H, kw:kw + W, :].reshape(HW, Cmid)
             for kh in range(3) for kw in range(3)]
    patches2 = jnp.concatenate(taps2, axis=-1)                 # (HW, 9*Cmid)
    f2 = jnp.maximum(
        jnp.dot(patches2, w2_ref[...], preferred_element_type=jnp.float32)
        + b2_ref[...], 0.0)                                    # (HW, Cfea)

    # switch to channel-major (C on sublane, H*W on lane): lane-dense downstream
    f2t = jnp.transpose(f2)                                    # (Cfea, HW)

    # ---- aggregator: 1x1 conv + ReLU ----
    fa = jnp.maximum(
        jnp.dot(wa_ref[...], f2t, preferred_element_type=jnp.float32)
        + ba_ref[...], 0.0)                                    # (Cfea, HW)

    # ---- seg head: 1x1 conv -> per-pixel class logits (already NCHW) ----
    seg_ref[0] = (jnp.dot(ws_ref[...], fa, preferred_element_type=jnp.float32)
                  + bs_ref[...])                               # (K, HW)

    # ---- exist head: global average pool -> linear -> sigmoid ----
    pooled = jnp.sum(fa, axis=1, keepdims=True) * (1.0 / HW)   # (Cfea, 1)
    ex_ref[0] = jax.nn.sigmoid(
        jnp.dot(we_ref[...], pooled, preferred_element_type=jnp.float32)
        + be_ref[...])                                         # (L, 1)


# -------------------------------- wrapper ----------------------------------- #

def detector_forward(params, img_nchw):
    """Inference path of Detector.forward (self.training == False)."""
    N, Cin, H, W = img_nchw.shape
    x = jnp.transpose(img_nchw, (0, 2, 3, 1)).astype(jnp.float32)   # tiny input
    Cmid = params["bb_w1"].shape[-1]
    Cfea = params["bb_w2"].shape[-1]
    K = params["seg_w"].shape[-1]
    L = params["ex_w"].shape[-1]
    HW = H * W

    # Flatten / transpose weights once (tiny, done in XLA outside the kernel).
    w1f = params["bb_w1"].reshape(9 * Cin, Cmid)
    b1 = params["bb_b1"].reshape(1, Cmid)
    w2f = params["bb_w2"].reshape(9 * Cmid, Cfea)
    b2 = params["bb_b2"].reshape(1, Cfea)
    wat = params["agg_w"].T
    bat = params["agg_b"].reshape(Cfea, 1)
    wst = params["seg_w"].T
    bst = params["seg_b"].reshape(K, 1)
    wet = params["ex_w"].T
    bet = params["ex_b"].reshape(L, 1)

    seg, ex = pl.pallas_call(
        _detector_kernel,
        out_shape=(
            jax.ShapeDtypeStruct((N, K, HW), jnp.float32),   # NCHW-flattened
            jax.ShapeDtypeStruct((N, L, 1), jnp.float32),
        ),
        grid=(N,),
        in_specs=[
            pl.BlockSpec((1, H, W, Cin), lambda n: (n, 0, 0, 0)),
            pl.BlockSpec((9 * Cin, Cmid), lambda n: (0, 0)),
            pl.BlockSpec((1, Cmid), lambda n: (0, 0)),
            pl.BlockSpec((9 * Cmid, Cfea), lambda n: (0, 0)),
            pl.BlockSpec((1, Cfea), lambda n: (0, 0)),
            pl.BlockSpec((Cfea, Cfea), lambda n: (0, 0)),
            pl.BlockSpec((Cfea, 1), lambda n: (0, 0)),
            pl.BlockSpec((K, Cfea), lambda n: (0, 0)),
            pl.BlockSpec((K, 1), lambda n: (0, 0)),
            pl.BlockSpec((L, Cfea), lambda n: (0, 0)),
            pl.BlockSpec((L, 1), lambda n: (0, 0)),
        ],
        out_specs=(
            pl.BlockSpec((1, K, HW), lambda n: (n, 0, 0)),
            pl.BlockSpec((1, L, 1), lambda n: (n, 0, 0)),
        ),
        scratch_shapes=[
            pltpu.VMEM((H + 2, W + 2, Cin), jnp.float32),
            pltpu.VMEM((H + 2, W + 2, Cmid), jnp.float32),
        ],
        compiler_params=pltpu.CompilerParams(
            dimension_semantics=("parallel",)),   # 2 TCs on v7x; no-op v5e/v6e
    )(x, w1f, b1, w2f, b2, wat, bat, wst, bst, wet, bet)

    seg_nchw = seg.reshape(N, K, H, W)    # free reshape: kernel emits NCHW
    exist = ex.reshape(N, L)
    # TODO(synk): heads.get_lanes (threshold/NMS/curve decoding with a dynamic
    # number of lanes) is data-dependent CPU-style postprocessing; not kernelized.
    return {"seg": seg_nchw, "exist": exist}


# -------------------------------- params ------------------------------------ #

def init_params(key, c_in=3, c_mid=8, c_fea=16, n_cls=5, n_lanes=4):
    ks = jax.random.split(key, 10)
    s = 0.1
    return {
        "bb_w1": s * jax.random.normal(ks[0], (3, 3, c_in, c_mid), jnp.float32),
        "bb_b1": s * jax.random.normal(ks[1], (1, c_mid), jnp.float32),
        "bb_w2": s * jax.random.normal(ks[2], (3, 3, c_mid, c_fea), jnp.float32),
        "bb_b2": s * jax.random.normal(ks[3], (1, c_fea), jnp.float32),
        "agg_w": s * jax.random.normal(ks[4], (c_fea, c_fea), jnp.float32),
        "agg_b": s * jax.random.normal(ks[5], (1, c_fea), jnp.float32),
        "seg_w": s * jax.random.normal(ks[6], (c_fea, n_cls), jnp.float32),
        "seg_b": s * jax.random.normal(ks[7], (1, n_cls), jnp.float32),
        "ex_w": s * jax.random.normal(ks[8], (c_fea, n_lanes), jnp.float32),
        "ex_b": s * jax.random.normal(ks[9], (1, n_lanes), jnp.float32),
    }


# ------------------------------- reference ---------------------------------- #

def _ref_forward(params, img_nchw):
    x = jnp.transpose(img_nchw, (0, 2, 3, 1)).astype(jnp.float32)

    def conv(x, w, b):
        y = jax.lax.conv_general_dilated(
            x, w, (1, 1), "SAME",
            dimension_numbers=("NHWC", "HWIO", "NHWC")) + b[0]
        return jnp.maximum(y, 0.0)

    fea = conv(x, params["bb_w1"], params["bb_b1"])
    fea = conv(fea, params["bb_w2"], params["bb_b2"])
    fea = jnp.maximum(jnp.dot(fea, params["agg_w"]) + params["agg_b"][0], 0.0)
    seg = jnp.dot(fea, params["seg_w"]) + params["seg_b"][0]
    pooled = jnp.mean(fea, axis=(1, 2))
    exist = jax.nn.sigmoid(jnp.dot(pooled, params["ex_w"]) + params["ex_b"][0])
    return {"seg": jnp.transpose(seg, (0, 3, 1, 2)), "exist": exist}


# --------------------------------- main -------------------------------------- #

if __name__ == "__main__":
    key = jax.random.PRNGKey(0)
    k_img, k_par = jax.random.split(key)
    img = jax.random.normal(k_img, (2, 3, 16, 16), jnp.float32)  # NCHW
    params = init_params(k_par)

    out = detector_forward(params, img)
    jax.block_until_ready(out)

    ref = _ref_forward(params, img)
    assert out["seg"].shape == (2, 5, 16, 16)
    assert out["exist"].shape == (2, 4)
    assert jnp.allclose(out["seg"], ref["seg"], atol=1e-4, rtol=1e-4)
    assert jnp.allclose(out["exist"], ref["exist"], atol=1e-4, rtol=1e-4)

    print("KERNEL_OK")
</pallas_src>

<mosaic_0001>
module attributes {stable_mosaic.version = 11 : i64} {
  func.func @_detector_kernel(%arg0: i32, %arg1: memref<1x16x16x3xf32, #tpu.memory_space<vmem>>, %arg2: memref<27x8xf32, #tpu.memory_space<vmem>>, %arg3: memref<1x8xf32, #tpu.memory_space<vmem>>, %arg4: memref<72x16xf32, #tpu.memory_space<vmem>>, %arg5: memref<1x16xf32, #tpu.memory_space<vmem>>, %arg6: memref<16x16xf32, #tpu.memory_space<vmem>>, %arg7: memref<16x1xf32, #tpu.memory_space<vmem>>, %arg8: memref<5x16xf32, #tpu.memory_space<vmem>>, %arg9: memref<5x1xf32, #tpu.memory_space<vmem>>, %arg10: memref<4x16xf32, #tpu.memory_space<vmem>>, %arg11: memref<4x1xf32, #tpu.memory_space<vmem>>, %arg12: memref<1x5x256xf32, #tpu.memory_space<vmem>>, %arg13: memref<1x4x1xf32, #tpu.memory_space<vmem>>, %arg14: memref<18x18x3xf32, #tpu.memory_space<vmem>>, %arg15: memref<18x18x8xf32, #tpu.memory_space<vmem>>) attributes {dimension_semantics = [#tpu.dimension_semantics<parallel>], iteration_bounds = array<i64: 2>, scalar_prefetch = 0 : i64, scratch_operands = 2 : i64, tpu.core_type = #tpu.core_type<tc>, window_params = [{transform_indices = @transform_0, window_bounds = array<i64: 1, 16, 16, 3>}, {pipeline_mode = #tpu.pipeline_mode<synchronous>, transform_indices = @transform_1, window_bounds = array<i64: 27, 8>}, {pipeline_mode = #tpu.pipeline_mode<synchronous>, transform_indices = @transform_2, window_bounds = array<i64: 1, 8>}, {pipeline_mode = #tpu.pipeline_mode<synchronous>, transform_indices = @transform_3, window_bounds = array<i64: 72, 16>}, {pipeline_mode = #tpu.pipeline_mode<synchronous>, transform_indices = @transform_4, window_bounds = array<i64: 1, 16>}, {pipeline_mode = #tpu.pipeline_mode<synchronous>, transform_indices = @transform_5, window_bounds = array<i64: 16, 16>}, {pipeline_mode = #tpu.pipeline_mode<synchronous>, transform_indices = @transform_6, window_bounds = array<i64: 16, 1>}, {pipeline_mode = #tpu.pipeline_mode<synchronous>, transform_indices = @transform_7, window_bounds = array<i64: 5, 16>}, {pipeline_mode = #tpu.pipeline_mode<synchronous>, transform_indices = @transform_8, window_bounds = array<i64: 5, 1>}, {pipeline_mode = #tpu.pipeline_mode<synchronous>, transform_indices = @transform_9, window_bounds = array<i64: 4, 16>}, {pipeline_mode = #tpu.pipeline_mode<synchronous>, transform_indices = @transform_10, window_bounds = array<i64: 4, 1>}, {transform_indices = @transform_11, window_bounds = array<i64: 1, 5, 256>}, {transform_indices = @transform_12, window_bounds = array<i64: 1, 4, 1>}]} {
    %cst = arith.constant 0.000000e+00 : f32
    %0 = vector.broadcast %cst : f32 to vector<18x18x3xf32>
    %c0 = arith.constant 0 : index
    %c0_0 = arith.constant 0 : index
    %c0_1 = arith.constant 0 : index
    %1 = vector.load %arg14[%c0, %c0_0, %c0_1] : memref<18x18x3xf32, #tpu.memory_space<vmem>>, vector<18x18x3xf32>
    tpu.vector_store %arg14[%c0, %c0_0, %c0_1], %0 {strides = array<i32>} : memref<18x18x3xf32, #tpu.memory_space<vmem>>, vector<18x18x3xf32>,
    %c0_2 = arith.constant 0 : index
    %c0_3 = arith.constant 0 : index
    %c0_4 = arith.constant 0 : index
    %c0_5 = arith.constant 0 : index
    %2 = vector.load %arg1[%c0_2, %c0_3, %c0_4, %c0_5] : memref<1x16x16x3xf32, #tpu.memory_space<vmem>>, vector<1x16x16x3xf32>
    %3 = vector.shape_cast %2 : vector<1x16x16x3xf32> to vector<16x16x3xf32>
    %c1 = arith.constant 1 : index
    %c1_6 = arith.constant 1 : index
    %c0_7 = arith.constant 0 : index
    %4 = vector.load %arg14[%c1, %c1_6, %c0_7] : memref<18x18x3xf32, #tpu.memory_space<vmem>>, vector<16x16x3xf32>
    tpu.vector_store %arg14[%c1, %c1_6, %c0_7], %3 {strides = array<i32>} : memref<18x18x3xf32, #tpu.memory_space<vmem>>, vector<16x16x3xf32>,
    %c0_8 = arith.constant 0 : index
    %c0_9 = arith.constant 0 : index
    %c0_10 = arith.constant 0 : index
    %5 = vector.load %arg14[%c0_8, %c0_9, %c0_10] : memref<18x18x3xf32, #tpu.memory_space<vmem>>, vector<16x16x3xf32>
    %6 = vector.shape_cast %5 : vector<16x16x3xf32> to vector<256x3xf32>
    %c0_11 = arith.constant 0 : index
    %c1_12 = arith.constant 1 : index
    %c0_13 = arith.constant 0 : index
    %7 = vector.load %arg14[%c0_11, %c1_12, %c0_13] : memref<18x18x3xf32, #tpu.memory_space<vmem>>, vector<16x16x3xf32>
    %8 = vector.shape_cast %7 : vector<16x16x3xf32> to vector<256x3xf32>
    %c0_14 = arith.constant 0 : index
    %c2 = arith.constant 2 : index
    %c0_15 = arith.constant 0 : index
    %9 = vector.load %arg14[%c0_14, %c2, %c0_15] : memref<18x18x3xf32, #tpu.memory_space<vmem>>, vector<16x16x3xf32>
    %10 = vector.shape_cast %9 : vector<16x16x3xf32> to vector<256x3xf32>
    %c1_16 = arith.constant 1 : index
    %c0_17 = arith.constant 0 : index
    %c0_18 = arith.constant 0 : index
    %11 = vector.load %arg14[%c1_16, %c0_17, %c0_18] : memref<18x18x3xf32, #tpu.memory_space<vmem>>, vector<16x16x3xf32>
    %12 = vector.shape_cast %11 : vector<16x16x3xf32> to vector<256x3xf32>
    %c1_19 = arith.constant 1 : index
    %c1_20 = arith.constant 1 : index
    %c0_21 = arith.constant 0 : index
    %13 = vector.load %arg14[%c1_19, %c1_20, %c0_21] : memref<18x18x3xf32, #tpu.memory_space<vmem>>, vector<16x16x3xf32>
    %14 = vector.shape_cast %13 : vector<16x16x3xf32> to vector<256x3xf32>
    %c1_22 = arith.constant 1 : index
    %c2_23 = arith.constant 2 : index
    %c0_24 = arith.constant 0 : index
    %15 = vector.load %arg14[%c1_22, %c2_23, %c0_24] : memref<18x18x3xf32, #tpu.memory_space<vmem>>, vector<16x16x3xf32>
    %16 = vector.shape_cast %15 : vector<16x16x3xf32> to vector<256x3xf32>
    %c2_25 = arith.constant 2 : index
    %c0_26 = arith.constant 0 : index
    %c0_27 = arith.constant 0 : index
    %17 = vector.load %arg14[%c2_25, %c0_26, %c0_27] : memref<18x18x3xf32, #tpu.memory_space<vmem>>, vector<16x16x3xf32>
    %18 = vector.shape_cast %17 : vector<16x16x3xf32> to vector<256x3xf32>
    %c2_28 = arith.constant 2 : index
    %c1_29 = arith.constant 1 : index
    %c0_30 = arith.constant 0 : index
    %19 = vector.load %arg14[%c2_28, %c1_29, %c0_30] : memref<18x18x3xf32, #tpu.memory_space<vmem>>, vector<16x16x3xf32>
    %20 = vector.shape_cast %19 : vector<16x16x3xf32> to vector<256x3xf32>
    %c2_31 = arith.constant 2 : index
    %c2_32 = arith.constant 2 : index
    %c0_33 = arith.constant 0 : index
    %21 = vector.load %arg14[%c2_31, %c2_32, %c0_33] : memref<18x18x3xf32, #tpu.memory_space<vmem>>, vector<16x16x3xf32>
    %22 = vector.shape_cast %21 : vector<16x16x3xf32> to vector<256x3xf32>
    %23 = tpu.concatenate %6, %8, %10, %12, %14, %16, %18, %20, %22 in 1 : vector<256x3xf32>, vector<256x3xf32>, vector<256x3xf32>, vector<256x3xf32>, vector<256x3xf32>, vector<256x3xf32>, vector<256x3xf32>, vector<256x3xf32>, vector<256x3xf32> -> vector<256x27xf32>
    %c0_34 = arith.constant 0 : index
    %c0_35 = arith.constant 0 : index
    %24 = vector.load %arg2[%c0_34, %c0_35] : memref<27x8xf32, #tpu.memory_space<vmem>>, vector<27x8xf32>
    %cst_36 = arith.constant dense<0.000000e+00> : vector<256x8xf32>
    %25 = tpu.matmul %23, %24, %cst_36 {dimension_numbers = #tpu.dot_dimension_numbers<[1], [0], [0], [1], [0, 0, 1, 1], [], []>} : vector<256x27xf32>, vector<27x8xf32>, vector<256x8xf32> -> vector<256x8xf32>
    %c0_37 = arith.constant 0 : index
    %c0_38 = arith.constant 0 : index
    %26 = vector.load %arg3[%c0_37, %c0_38] : memref<1x8xf32, #tpu.memory_space<vmem>>, vector<1x8xf32>
    %27 = vector.broadcast %26 : vector<1x8xf32> to vector<256x8xf32>
    %28 = arith.addf %25, %27 : vector<256x8xf32>
    %cst_39 = arith.constant 0.000000e+00 : f32
    %29 = vector.broadcast %cst_39 : f32 to vector<256x8xf32>
    %30 = arith.maximumf %28, %29 : vector<256x8xf32>
    %cst_40 = arith.constant 0.000000e+00 : f32
    %31 = vector.broadcast %cst_40 : f32 to vector<18x18x8xf32>
    %c0_41 = arith.constant 0 : index
    %c0_42 = arith.constant 0 : index
    %c0_43 = arith.constant 0 : index
    %32 = vector.load %arg15[%c0_41, %c0_42, %c0_43] : memref<18x18x8xf32, #tpu.memory_space<vmem>>, vector<18x18x8xf32>
    tpu.vector_store %arg15[%c0_41, %c0_42, %c0_43], %31 {strides = array<i32>} : memref<18x18x8xf32, #tpu.memory_space<vmem>>, vector<18x18x8xf32>,
    %33 = vector.shape_cast %30 : vector<256x8xf32> to vector<16x16x8xf32>
    %c1_44 = arith.constant 1 : index
    %c1_45 = arith.constant 1 : index
    %c0_46 = arith.constant 0 : index
    %34 = vector.load %arg15[%c1_44, %c1_45, %c0_46] : memref<18x18x8xf32, #tpu.memory_space<vmem>>, vector<16x16x8xf32>
    tpu.vector_store %arg15[%c1_44, %c1_45, %c0_46], %33 {strides = array<i32>} : memref<18x18x8xf32, #tpu.memory_space<vmem>>, vector<16x16x8xf32>,
    %c0_47 = arith.constant 0 : index
    %c0_48 = arith.constant 0 : index
    %c0_49 = arith.constant 0 : index
    %35 = vector.load %arg15[%c0_47, %c0_48, %c0_49] : memref<18x18x8xf32, #tpu.memory_space<vmem>>, vector<16x16x8xf32>
    %36 = vector.shape_cast %35 : vector<16x16x8xf32> to vector<256x8xf32>
    %c0_50 = arith.constant 0 : index
    %c1_51 = arith.constant 1 : index
    %c0_52 = arith.constant 0 : index
    %37 = vector.load %arg15[%c0_50, %c1_51, %c0_52] : memref<18x18x8xf32, #tpu.memory_space<vmem>>, vector<16x16x8xf32>
    %38 = vector.shape_cast %37 : vector<16x16x8xf32> to vector<256x8xf32>
    %c0_53 = arith.constant 0 : index
    %c2_54 = arith.constant 2 : index
    %c0_55 = arith.constant 0 : index
    %39 = vector.load %arg15[%c0_53, %c2_54, %c0_55] : memref<18x18x8xf32, #tpu.memory_space<vmem>>, vector<16x16x8xf32>
    %40 = vector.shape_cast %39 : vector<16x16x8xf32> to vector<256x8xf32>
    %c1_56 = arith.constant 1 : index
    %c0_57 = arith.constant 0 : index
    %c0_58 = arith.constant 0 : index
    %41 = vector.load %arg15[%c1_56, %c0_57, %c0_58] : memref<18x18x8xf32, #tpu.memory_space<vmem>>, vector<16x16x8xf32>
    %42 = vector.shape_cast %41 : vector<16x16x8xf32> to vector<256x8xf32>
    %c1_59 = arith.constant 1 : index
    %c1_60 = arith.constant 1 : index
    %c0_61 = arith.constant 0 : index
    %43 = vector.load %arg15[%c1_59, %c1_60, %c0_61] : memref<18x18x8xf32, #tpu.memory_space<vmem>>, vector<16x16x8xf32>
    %44 = vector.shape_cast %43 : vector<16x16x8xf32> to vector<256x8xf32>
    %c1_62 = arith.constant 1 : index
    %c2_63 = arith.constant 2 : index
    %c0_64 = arith.constant 0 : index
    %45 = vector.load %arg15[%c1_62, %c2_63, %c0_64] : memref<18x18x8xf32, #tpu.memory_space<vmem>>, vector<16x16x8xf32>
    %46 = vector.shape_cast %45 : vector<16x16x8xf32> to vector<256x8xf32>
    %c2_65 = arith.constant 2 : index
    %c0_66 = arith.constant 0 : index
    %c0_67 = arith.constant 0 : index
    %47 = vector.load %arg15[%c2_65, %c0_66, %c0_67] : memref<18x18x8xf32, #tpu.memory_space<vmem>>, vector<16x16x8xf32>
    %48 = vector.shape_cast %47 : vector<16x16x8xf32> to vector<256x8xf32>
    %c2_68 = arith.constant 2 : index
    %c1_69 = arith.constant 1 : index
    %c0_70 = arith.constant 0 : index
    %49 = vector.load %arg15[%c2_68, %c1_69, %c0_70] : memref<18x18x8xf32, #tpu.memory_space<vmem>>, vector<16x16x8xf32>
    %50 = vector.shape_cast %49 : vector<16x16x8xf32> to vector<256x8xf32>
    %c2_71 = arith.constant 2 : index
    %c2_72 = arith.constant 2 : index
    %c0_73 = arith.constant 0 : index
    %51 = vector.load %arg15[%c2_71, %c2_72, %c0_73] : memref<18x18x8xf32, #tpu.memory_space<vmem>>, vector<16x16x8xf32>
    %52 = vector.shape_cast %51 : vector<16x16x8xf32> to vector<256x8xf32>
    %53 = tpu.concatenate %36, %38, %40, %42, %44, %46, %48, %50, %52 in 1 : vector<256x8xf32>, vector<256x8xf32>, vector<256x8xf32>, vector<256x8xf32>, vector<256x8xf32>, vector<256x8xf32>, vector<256x8xf32>, vector<256x8xf32>, vector<256x8xf32> -> vector<256x72xf32>
    %c0_74 = arith.constant 0 : index
    %c0_75 = arith.constant 0 : index
    %54 = vector.load %arg4[%c0_74, %c0_75] : memref<72x16xf32, #tpu.memory_space<vmem>>, vector<72x16xf32>
    %cst_76 = arith.constant dense<0.000000e+00> : vector<256x16xf32>
    %55 = tpu.matmul %53, %54, %cst_76 {dimension_numbers = #tpu.dot_dimension_numbers<[1], [0], [0], [1], [0, 0, 1, 1], [], []>} : vector<256x72xf32>, vector<72x16xf32>, vector<256x16xf32> -> vector<256x16xf32>
    %c0_77 = arith.constant 0 : index
    %c0_78 = arith.constant 0 : index
    %56 = vector.load %arg5[%c0_77, %c0_78] : memref<1x16xf32, #tpu.memory_space<vmem>>, vector<1x16xf32>
    %57 = vector.broadcast %56 : vector<1x16xf32> to vector<256x16xf32>
    %58 = arith.addf %55, %57 : vector<256x16xf32>
    %cst_79 = arith.constant 0.000000e+00 : f32
    %59 = vector.broadcast %cst_79 : f32 to vector<256x16xf32>
    %60 = arith.maximumf %58, %59 : vector<256x16xf32>
    %61 = tpu.transpose %60, [1, 0] : vector<256x16xf32> -> vector<16x256xf32>
    %c0_80 = arith.constant 0 : index
    %c0_81 = arith.constant 0 : index
    %62 = vector.load %arg6[%c0_80, %c0_81] : memref<16x16xf32, #tpu.memory_space<vmem>>, vector<16x16xf32>
    %cst_82 = arith.constant dense<0.000000e+00> : vector<16x256xf32>
    %63 = tpu.matmul %62, %61, %cst_82 {dimension_numbers = #tpu.dot_dimension_numbers<[1], [0], [0], [1], [0, 0, 1, 1], [], []>} : vector<16x16xf32>, vector<16x256xf32>, vector<16x256xf32> -> vector<16x256xf32>
    %c0_83 = arith.constant 0 : index
    %c0_84 = arith.constant 0 : index
    %64 = vector.load %arg7[%c0_83, %c0_84] : memref<16x1xf32, #tpu.memory_space<vmem>>, vector<16x1xf32>
    %65 = vector.broadcast %64 : vector<16x1xf32> to vector<16x256xf32>
    %66 = arith.addf %63, %65 : vector<16x256xf32>
    %cst_85 = arith.constant 0.000000e+00 : f32
    %67 = vector.broadcast %cst_85 : f32 to vector<16x256xf32>
    %68 = arith.maximumf %66, %67 : vector<16x256xf32>
    %c0_86 = arith.constant 0 : index
    %c0_87 = arith.constant 0 : index
    %69 = vector.load %arg8[%c0_86, %c0_87] : memref<5x16xf32, #tpu.memory_space<vmem>>, vector<5x16xf32>
    %cst_88 = arith.constant dense<0.000000e+00> : vector<5x256xf32>
    %70 = tpu.matmul %69, %68, %cst_88 {dimension_numbers = #tpu.dot_dimension_numbers<[1], [0], [0], [1], [0, 0, 1, 1], [], []>} : vector<5x16xf32>, vector<16x256xf32>, vector<5x256xf32> -> vector<5x256xf32>
    %c0_89 = arith.constant 0 : index
    %c0_90 = arith.constant 0 : index
    %71 = vector.load %arg9[%c0_89, %c0_90] : memref<5x1xf32, #tpu.memory_space<vmem>>, vector<5x1xf32>
    %72 = vector.broadcast %71 : vector<5x1xf32> to vector<5x256xf32>
    %73 = arith.addf %70, %72 : vector<5x256xf32>
    %c0_91 = arith.constant 0 : index
    %c0_92 = arith.constant 0 : index
    %c0_93 = arith.constant 0 : index
    %74 = vector.load %arg12[%c0_91, %c0_92, %c0_93] : memref<1x5x256xf32, #tpu.memory_space<vmem>>, vector<1x5x256xf32>
    %75 = vector.shape_cast %74 : vector<1x5x256xf32> to vector<5x256xf32>
    %76 = vector.shape_cast %73 : vector<5x256xf32> to vector<1x5x256xf32>
    tpu.vector_store %arg12[%c0_91, %c0_92, %c0_93], %76 {strides = array<i32>} : memref<1x5x256xf32, #tpu.memory_space<vmem>>, vector<1x5x256xf32>,
    %cst_94 = arith.constant dense<0.000000e+00> : vector<16xf32>
    %77 = vector.multi_reduction <add>, %68, %cst_94 [1] : vector<16x256xf32> to vector<16xf32>
    %78 = vector.shape_cast %77 : vector<16xf32> to vector<16x1xf32>
    %cst_95 = arith.constant 3.906250e-03 : f32
    %79 = vector.broadcast %cst_95 : f32 to vector<16x1xf32>
    %80 = arith.mulf %78, %79 : vector<16x1xf32>
    %c0_96 = arith.constant 0 : index
    %c0_97 = arith.constant 0 : index
    %81 = vector.load %arg10[%c0_96, %c0_97] : memref<4x16xf32, #tpu.memory_space<vmem>>, vector<4x16xf32>
    %cst_98 = arith.constant dense<0.000000e+00> : vector<4x1xf32>
    %82 = tpu.matmul %81, %80, %cst_98 {dimension_numbers = #tpu.dot_dimension_numbers<[1], [0], [0], [1], [0, 0, 1, 1], [], []>} : vector<4x16xf32>, vector<16x1xf32>, vector<4x1xf32> -> vector<4x1xf32>
    %c0_99 = arith.constant 0 : index
    %c0_100 = arith.constant 0 : index
    %83 = vector.load %arg11[%c0_99, %c0_100] : memref<4x1xf32, #tpu.memory_space<vmem>>, vector<4x1xf32>
    %84 = arith.addf %82, %83 : vector<4x1xf32>
    %85 = arith.negf %84 : vector<4x1xf32>
    %86 = math.exp %85 : vector<4x1xf32>
    %cst_101 = arith.constant 1.000000e+00 : f32
    %87 = vector.broadcast %cst_101 : f32 to vector<4x1xf32>
    %88 = arith.addf %87, %86 : vector<4x1xf32>
    %89 = arith.divf %87, %88 : vector<4x1xf32>
    %c0_102 = arith.constant 0 : index
    %c0_103 = arith.constant 0 : index
    %c0_104 = arith.constant 0 : index
    %90 = vector.load %arg13[%c0_102, %c0_103, %c0_104] : memref<1x4x1xf32, #tpu.memory_space<vmem>>, vector<1x4x1xf32>
    %91 = vector.shape_cast %90 : vector<1x4x1xf32> to vector<4x1xf32>
    %92 = vector.shape_cast %89 : vector<4x1xf32> to vector<1x4x1xf32>
    tpu.vector_store %arg13[%c0_102, %c0_103, %c0_104], %92 {strides = array<i32>} : memref<1x4x1xf32, #tpu.memory_space<vmem>>, vector<1x4x1xf32>,
    return
  }
  func.func @transform_0(%arg0: i32) -> (i32, i32, i32, i32) {
    %c0_i32 = arith.constant 0 : i32
    %c0_i32_0 = arith.constant 0 : i32
    %c0_i32_1 = arith.constant 0 : i32
    %c0_i32_2 = arith.constant 0 : i32
    return %arg0, %c0_i32, %c0_i32_0, %c0_i32_1 : i32, i32, i32, i32
  }
  func.func @transform_1(%arg0: i32) -> (i32, i32) {
    %c0_i32 = arith.constant 0 : i32
    %c0_i32_0 = arith.constant 0 : i32
    %c0_i32_1 = arith.constant 0 : i32
    return %c0_i32, %c0_i32_0 : i32, i32
  }
  func.func @transform_2(%arg0: i32) -> (i32, i32) {
    %c0_i32 = arith.constant 0 : i32
    %c0_i32_0 = arith.constant 0 : i32
    %c0_i32_1 = arith.constant 0 : i32
    return %c0_i32, %c0_i32_0 : i32, i32
  }
  func.func @transform_3(%arg0: i32) -> (i32, i32) {
    %c0_i32 = arith.constant 0 : i32
    %c0_i32_0 = arith.constant 0 : i32
    %c0_i32_1 = arith.constant 0 : i32
    return %c0_i32, %c0_i32_0 : i32, i32
  }
  func.func @transform_4(%arg0: i32) -> (i32, i32) {
    %c0_i32 = arith.constant 0 : i32
    %c0_i32_0 = arith.constant 0 : i32
    %c0_i32_1 = arith.constant 0 : i32
    return %c0_i32, %c0_i32_0 : i32, i32
  }
  func.func @transform_5(%arg0: i32) -> (i32, i32) {
    %c0_i32 = arith.constant 0 : i32
    %c0_i32_0 = arith.constant 0 : i32
    %c0_i32_1 = arith.constant 0 : i32
    return %c0_i32, %c0_i32_0 : i32, i32
  }
  func.func @transform_6(%arg0: i32) -> (i32, i32) {
    %c0_i32 = arith.constant 0 : i32
    %c0_i32_0 = arith.constant 0 : i32
    %c0_i32_1 = arith.constant 0 : i32
    return %c0_i32, %c0_i32_0 : i32, i32
  }
  func.func @transform_7(%arg0: i32) -> (i32, i32) {
    %c0_i32 = arith.constant 0 : i32
    %c0_i32_0 = arith.constant 0 : i32
    %c0_i32_1 = arith.constant 0 : i32
    return %c0_i32, %c0_i32_0 : i32, i32
  }
  func.func @transform_8(%arg0: i32) -> (i32, i32) {
    %c0_i32 = arith.constant 0 : i32
    %c0_i32_0 = arith.constant 0 : i32
    %c0_i32_1 = arith.constant 0 : i32
    return %c0_i32, %c0_i32_0 : i32, i32
  }
  func.func @transform_9(%arg0: i32) -> (i32, i32) {
    %c0_i32 = arith.constant 0 : i32
    %c0_i32_0 = arith.constant 0 : i32
    %c0_i32_1 = arith.constant 0 : i32
    return %c0_i32, %c0_i32_0 : i32, i32
  }
  func.func @transform_10(%arg0: i32) -> (i32, i32) {
    %c0_i32 = arith.constant 0 : i32
    %c0_i32_0 = arith.constant 0 : i32
    %c0_i32_1 = arith.constant 0 : i32
    return %c0_i32, %c0_i32_0 : i32, i32
  }
  func.func @transform_11(%arg0: i32) -> (i32, i32, i32) {
    %c0_i32 = arith.constant 0 : i32
    %c0_i32_0 = arith.constant 0 : i32
    %c0_i32_1 = arith.constant 0 : i32
    return %arg0, %c0_i32, %c0_i32_0 : i32, i32, i32
  }
  func.func @transform_12(%arg0: i32) -> (i32, i32, i32) {
    %c0_i32 = arith.constant 0 : i32
    %c0_i32_0 = arith.constant 0 : i32
    %c0_i32_1 = arith.constant 0 : i32
    return %arg0, %c0_i32, %c0_i32_0 : i32, i32, i32
  }
}

</mosaic_0001>

<bundles_post_ra>
// kernel: tpu_custom_call.1
= control target key start
LH: loop header
LB: loop body
LE: loop exit
PB: predicated region body
PF: predicated region fallthrough
CT: control target
= control target key end

     0   :  { %s5555_s21 = smov 0   ;;  %s8122_s0 = inlined_call_operand.vmem [shape: f32[2,16,16,3], index: 0, kind: input, shape index: {}]   ;;  %s8123_s1 = inlined_call_operand.vmem [shape: f32[27,8], index: 1, kind: input, shape index: {}]   ;;  %s8124_s2 = inlined_call_operand.vmem [shape: f32[1,8], index: 2, kind: input, shape index: {}]   ;;  %s8125_s3 = inlined_call_operand.vmem [shape: f32[72,16], index: 3, kind: input, shape index: {}]   ;;  %s8126_s4 = inlined_call_operand.vmem [shape: f32[1,16], index: 4, kind: input, shape index: {}]   ;;  %s8127_s5 = inlined_call_operand.vmem [shape: f32[16,16], index: 5, kind: input, shape index: {}]   ;;  %s8128_s6 = inlined_call_operand.vmem [shape: f32[16,1], index: 6, kind: input, shape index: {}]   ;;  %s8129_s7 = inlined_call_operand.vmem [shape: f32[5,16], index: 7, kind: input, shape index: {}]   ;;  %s8130_s8 = inlined_call_operand.vmem [shape: f32[5,1], index: 8, kind: input, shape index: {}]   ;;  %s8131_s9 = inlined_call_operand.vmem [shape: f32[4,16], index: 9, kind: input, shape index: {}]   ;;  %s8132_s10 = inlined_call_operand.vmem [shape: f32[4,1], index: 10, kind: input, shape index: {}]   ;;  %s8133_s11 = inlined_call_operand.vmem [shape: f32[2,5,256], index: 11, kind: output, shape index: {0}]   ;;  %s8134_s12 = inlined_call_operand.vmem [shape: f32[2,4,1], index: 12, kind: output, shape index: {1}]  }
   0x1 LB: > { %s4982_s22 = sadd.s32 4294967295, %s5468_s21   ;;  %p4986_p0 = scmp.ge.s32.totalorder %s5468_s21, 1  ;;  %s5468_s21 = sphi %s5555_s21, %s23_s21  }
   0x2   : > { %p365_p1 = scmp.lt.s32.totalorder %s5468_s21, 3 }
   0x4   : > { %p366_p2 = pnand %p4986_p0, %p365_p1 }
   0x5   : > { %vm425_vm0 = vcmask (!%p366_p2), 23552   ;;  %vm428_vm1 = vcmask (!%p366_p2), 17408   ;;  %v5470_v0 = vmov (!%p366_p2), 0.0   ;;  %p411_p3 = scmp.lt.s32.totalorder (!%p366_p2), %s4982_s22, 1  ;;  %s5471_s27 = smov (!%p366_p2), 6   ;;  %v2122_v24 = vld [vmem:[%s8123_s1] sm:$0xff] (!%p366_p2) }
   0x6   : > { %369 = sbr.rel (%p366_p2) target bundleno = 2011 (0x7db), region = 64  ;;  %426 = vst.msk [vmem:[#allocation2] sm:$0xff] (!%p366_p2), %vm425_vm0, %v5470_v0  ;;  %427 = vst.msk [vmem:[#allocation2 + $0x8] sm:$0xff] (!%p366_p2), %vm425_vm0, %v5470_v0  ;;  %s5472_s28 = smov (!%p366_p2), 3   ;;  %v2123_v25 = vld [vmem:[%s8123_s1 + $0x8] sm:$0xff] (!%p366_p2)  ;;  %v2124_v29 = vld [vmem:[%s8123_s1 + $0x10] sm:$0xff] (!%p366_p2) }
   0x7   : > { %430 = vst.msk [vmem:[#allocation2 + $0x18] sm:$0xff] (!%p366_p2), %vm425_vm0, %v5470_v0  ;;  %431 = vst.msk [vmem:[#allocation2 + $0x20] sm:$0xff] (!%p366_p2), %vm425_vm0, %v5470_v0  ;;  %s5473_s29 = smov (!%p366_p2), 9   ;;  %s5474_s30 = smov (!%p366_p2), 12   ;;  %v5345_v26 = vpack.c.bf16 (!%p366_p2), %v2123_v25, %v2122_v24  ;;  %v2125_v30 = vld [vmem:[%s8123_s1 + $0x18] sm:$0x7] (!%p366_p2) }
   0x8   : > { %433 = vst.msk [vmem:[#allocation2 + $0x30] sm:$0xff] (!%p366_p2), %vm425_vm0, %v5470_v0  ;;  %434 = vst.msk [vmem:[#allocation2 + $0x38] sm:$0xff] (!%p366_p2), %vm425_vm0, %v5470_v0  ;;  %s5475_s13 = smov (!%p366_p2), 15   ;;  %s5476_s14 = smov (!%p366_p2), 18   ;;  %vm2230_vm2 = vcmask (!%p366_p2), 1042432   ;;  %v5349_v31 = vpack.c.bf16 (!%p366_p2), %v2125_v30, %v2124_v29  ;;  %vm5478_vm3 = vmmov (!%p366_p2), 1  }
   0x9   : > { %436 = vst.msk [vmem:[#allocation2 + $0x48] sm:$0xff] (!%p366_p2), %vm425_vm0, %v5470_v0  ;;  %437 = vst.msk [vmem:[#allocation2 + $0x50] sm:$0xff] (!%p366_p2), %vm425_vm0, %v5470_v0  ;;  %5346 = vmatprep.subr.bf16.mxu0 (!%p366_p2), %v5345_v26  ;;  %s5477_s25 = smov (!%p366_p2), 21   ;;  %s5479_s15 = smov (!%p366_p2), 24   ;;  %vm1891_vm5 = vcmask (!%p366_p2), 48128   ;;  %vm1924_vm6 = vcmask (!%p366_p2), 72704  }
   0xa   : > { %439 = vst.msk [vmem:[#allocation2 + $0x60] sm:$0xff] (!%p366_p2), %vm425_vm0, %v5470_v0  ;;  %440 = vst.msk [vmem:[#allocation2 + $0x68] sm:$0xff] (!%p366_p2), %vm425_vm0, %v5470_v0  ;;  %5348 = vmatpush3.bf16.msra.mxu0 (!%p366_p2), %v5345_v26  ;;  %vm1957_vm7 = vcmask (!%p366_p2), 97280   ;;  %vm1990_vm8 = vcmask (!%p366_p2), 121856   ;;  %vm2023_vm9 = vcmask (!%p366_p2), 146432   ;;  %vm2056_vm10 = vcmask (!%p366_p2), 171008  }
   0xb   : > { %442 = vst.msk [vmem:[#allocation2 + $0x78] sm:$0xff] (!%p366_p2), %vm425_vm0, %v5470_v0  ;;  %443 = vst.msk [vmem:[#allocation2 + $0x80] sm:$0xff] (!%p366_p2), %vm425_vm0, %v5470_v0  ;;  %vm2089_vm11 = vcmask (!%p366_p2), 195584   ;;  %vm2133_vm12 = vcmask (!%p366_p2), 220160   ;;  %vm2491_vm13 = vcmask (!%p366_p2), 64512   ;;  %vm2494_vm14 = vcmask (!%p366_p2), 58368  }
   0xc   : > { %445 = vst.msk [vmem:[#allocation2 + $0x90] sm:$0xff] (!%p366_p2), %vm425_vm0, %v5470_v0  ;;  %446 = vst.msk [vmem:[#allocation2 + $0x98] sm:$0xff] (!%p366_p2), %vm425_vm0, %v5470_v0  ;;  %s5486_s16 = smov (!%p366_p2), 64   ;;  %vm3925_vm15 = vcmask (!%p366_p2), 130048  }
   0xd   : > { %448 = vst.msk [vmem:[#allocation2 + $0xa8] sm:$0xff] %vm425_vm0, %v5470_v0  ;;  %449 = vst.msk [vmem:[#allocation2 + $0xb0] sm:$0xff] %vm425_vm0, %v5470_v0  ;;  %s8138_s22 = smov (!%p411_p3, %s4982_s22), 1  ;;  %v610_v4 = vld [vmem:[#allocation2 + $0x2] sm:$0xff] }
   0xe   : > { %451 = vst.msk [vmem:[#allocation2 + $0xc0] sm:$0xff] %vm425_vm0, %v5470_v0  ;;  %452 = vst.msk [vmem:[#allocation2 + $0xc8] sm:$0xff] %vm425_vm0, %v5470_v0  ;;  %s5098_s23 = sshll.u32 %s8138_s22, 8  ;;  %v578_v5 = vld [vmem:[#allocation2 + $0x1] sm:$0xff]  ;;  %995 = vrot.lane.b32.xlu1 %v610_v4, %s5471_s27  ;;  %s4991_s19 = sshll.u32 %s8138_s22, 2 }
   0xf   : > { %454 = vst.msk [vmem:[#allocation2 + $0xd8] sm:$0xff] %vm425_vm0, %v5470_v0  ;;  %455 = vst.msk [vmem:[#allocation2 + $0xe0] sm:$0xff] %vm425_vm0, %v5470_v0  ;;  %s5681_s26 = scalar_lea.vmem %s8122_s0, %s5098_s23  ;;  %867 = vrot.lane.b32.xlu0 %v578_v5, %s5472_s28  ;;  %v547_v25 = vld [vmem:[#allocation2 + $0x8] sm:$0xff]  ;;  %s5485_s23 = smov 56  }
  0x10   : > { %457 = vst.msk [vmem:[#allocation2 + $0xf0] sm:$0xff] %vm425_vm0, %v5470_v0  ;;  %458 = vst.msk [vmem:[#allocation2 + $0xf8] sm:$0xff] %vm425_vm0, %v5470_v0  ;;  %v481_v1 = vld [vmem:[%s5681_s26] sm:$0xff]  ;;  %v482_v2 = vld [vmem:[%s5681_s26 + $0x8] sm:$0xff]  ;;  %s424_s24 = scalar_lea.vmem %s8134_s12, %s4991_s19 }
  0x11   : > { %460 = vst.msk [vmem:[#allocation2 + $0x108] sm:$0xff] %vm425_vm0, %v5470_v0  ;;  %461 = vst.msk [vmem:[#allocation2 + $0x110] sm:$0xff] %vm425_vm0, %v5470_v0  ;;  %v483_v3 = vld [vmem:[%s5681_s26 + $0x10] sm:$0xff]  ;;  %v484_v8 = vld [vmem:[%s5681_s26 + $0x18] sm:$0xff] }
  0x12   : > { %463 = vst.msk [vmem:[#allocation2 + $0x120] sm:$0xff] %vm425_vm0, %v5470_v0  ;;  %464 = vst.msk [vmem:[#allocation2 + $0x128] sm:$0xff] %vm425_vm0, %v5470_v0  ;;  %v485_v9 = vld [vmem:[%s5681_s26 + $0x20] sm:$0xff]  ;;  %v486_v10 = vld [vmem:[%s5681_s26 + $0x28] sm:$0xff] }
  0x13   : > { %466 = vst.msk [vmem:[#allocation2 + $0x138] sm:$0xff] %vm425_vm0, %v5470_v0  ;;  %467 = vst.msk [vmem:[#allocation2 + $0x140] sm:$0xff] %vm425_vm0, %v5470_v0  ;;  %v487_v11 = vld [vmem:[%s5681_s26 + $0x30] sm:$0xff]  ;;  %v488_v12 = vld [vmem:[%s5681_s26 + $0x38] sm:$0xff] }
  0x14   : > { %469 = vst.msk [vmem:[#allocation2 + $0x150] sm:$0xff] %vm425_vm0, %v5470_v0  ;;  %470 = vst.msk [vmem:[#allocation2 + $0x158] sm:$0xff] %vm425_vm0, %v5470_v0  ;;  %v489_v13 = vld [vmem:[%s5681_s26 + $0x40] sm:$0xff]  ;;  %v490_v14 = vld [vmem:[%s5681_s26 + $0x48] sm:$0xff] }
  0x15   : > { %472 = vst.msk [vmem:[#allocation2 + $0x168] sm:$0xff] %vm425_vm0, %v5470_v0  ;;  %473 = vst.msk [vmem:[#allocation2 + $0x170] sm:$0xff] %vm425_vm0, %v5470_v0  ;;  %v491_v20 = vld [vmem:[%s5681_s26 + $0x50] sm:$0xff]  ;;  %v492_v23 = vld [vmem:[%s5681_s26 + $0x58] sm:$0xff] }
  0x16   : > { %475 = vst.msk [vmem:[#allocation2 + $0x180] sm:$0xff] %vm425_vm0, %v5470_v0  ;;  %476 = vst.msk [vmem:[#allocation2 + $0x188] sm:$0xff] %vm425_vm0, %v5470_v0  ;;  %v493_v35 = vld [vmem:[%s5681_s26 + $0x60] sm:$0xff]  ;;  %v494_v37 = vld [vmem:[%s5681_s26 + $0x68] sm:$0xff] }
  0x17   : > { %478 = vst.msk [vmem:[#allocation2 + $0x198] sm:$0xff] %vm425_vm0, %v5470_v0  ;;  %479 = vst.msk [vmem:[#allocation2 + $0x1a0] sm:$0xff] %vm425_vm0, %v5470_v0  ;;  %v495_v43 = vld [vmem:[%s5681_s26 + $0x70] sm:$0xff]  ;;  %v496_v45 = vld [vmem:[%s5681_s26 + $0x78] sm:$0xff] }
  0x18   : > { %429 = vst.msk [vmem:[#allocation2 + $0x10] sm:$0x3] %vm428_vm1, %v5470_v0  ;;  %432 = vst.msk [vmem:[#allocation2 + $0x28] sm:$0x3] %vm428_vm1, %v5470_v0  ;;  %v497_v51 = vld [vmem:[%s5681_s26 + $0x80] sm:$0xff]  ;;  %v498_v57 = vld [vmem:[%s5681_s26 + $0x88] sm:$0xff] }
  0x19   : > { %435 = vst.msk [vmem:[#allocation2 + $0x40] sm:$0x3] %vm428_vm1, %v5470_v0  ;;  %438 = vst.msk [vmem:[#allocation2 + $0x58] sm:$0x3] %vm428_vm1, %v5470_v0  ;;  %v500_v29 = vld [vmem:[%s5681_s26 + $0x98] sm:$0xff] }
  0x1a   : > { %441 = vst.msk [vmem:[#allocation2 + $0x70] sm:$0x3] %vm428_vm1, %v5470_v0  ;;  %444 = vst.msk [vmem:[#allocation2 + $0x88] sm:$0x3] %vm428_vm1, %v5470_v0 }
  0x1b   : > { %447 = vst.msk [vmem:[#allocation2 + $0xa0] sm:$0x3] %vm428_vm1, %v5470_v0  ;;  %450 = vst.msk [vmem:[#allocation2 + $0xb8] sm:$0x3] %vm428_vm1, %v5470_v0 }
  0x1c   : > { %453 = vst.msk [vmem:[#allocation2 + $0xd0] sm:$0x3] %vm428_vm1, %v5470_v0  ;;  %456 = vst.msk [vmem:[#allocation2 + $0xe8] sm:$0x3] %vm428_vm1, %v5470_v0 }
  0x1d   : > { %459 = vst.msk [vmem:[#allocation2 + $0x100] sm:$0x3] %vm428_vm1, %v5470_v0  ;;  %462 = vst.msk [vmem:[#allocation2 + $0x118] sm:$0x3] %vm428_vm1, %v5470_v0 }
  0x1e   : > { %465 = vst.msk [vmem:[#allocation2 + $0x130] sm:$0x3] %vm428_vm1, %v5470_v0  ;;  %468 = vst.msk [vmem:[#allocation2 + $0x148] sm:$0x3] %vm428_vm1, %v5470_v0 }
  0x1f   : > { %471 = vst.msk [vmem:[#allocation2 + $0x160] sm:$0x3] %vm428_vm1, %v5470_v0  ;;  %474 = vst.msk [vmem:[#allocation2 + $0x178] sm:$0x3] %vm428_vm1, %v5470_v0  ;;  %v611_v6 = vld [vmem:[#allocation2 + $0xa] sm:$0xff] }
  0x20   : > { %477 = vst.msk [vmem:[#allocation2 + $0x190] sm:$0x3] %vm428_vm1, %v5470_v0  ;;  %480 = vst.msk [vmem:[#allocation2 + $0x1a8] sm:$0x3] %vm428_vm1, %v5470_v0  ;;  %v579_v7 = vld [vmem:[#allocation2 + $0x9] sm:$0xff]  ;;  %997 = vrot.lane.b32.xlu1 %v611_v6, %s5471_s27  ;;  %vm4023_vm1 = vcmask 326656  }
  0x21   : > { %514 = vst.msk [vmem:[#allocation2 + $0x19] sm:$0xff] %vm425_vm0, %v481_v1  ;;  %515 = vst.msk [vmem:[#allocation2 + $0x21] sm:$0xff] %vm425_vm0, %v482_v2  ;;  %869 = vrot.lane.b32.xlu0 %v579_v7, %s5472_s28 }
  0x22   : > { %516 = vst.msk [vmem:[#allocation2 + $0x31] sm:$0xff] %vm425_vm0, %v483_v3  ;;  %517 = vst.msk [vmem:[#allocation2 + $0x39] sm:$0xff] %vm425_vm0, %v484_v8 }
  0x23   : > { %518 = vst.msk [vmem:[#allocation2 + $0x49] sm:$0xff] %vm425_vm0, %v485_v9  ;;  %519 = vst.msk [vmem:[#allocation2 + $0x51] sm:$0xff] %vm425_vm0, %v486_v10 }
  0x24   : > { %520 = vst.msk [vmem:[#allocation2 + $0x61] sm:$0xff] %vm425_vm0, %v487_v11  ;;  %521 = vst.msk [vmem:[#allocation2 + $0x69] sm:$0xff] %vm425_vm0, %v488_v12  ;;  %v546_v12 = vld [vmem:[#allocation2] sm:$0xff] }
  0x25   : > { %522 = vst.msk [vmem:[#allocation2 + $0x79] sm:$0xff] %vm425_vm0, %v489_v13  ;;  %523 = vst.msk [vmem:[#allocation2 + $0x81] sm:$0xff] %vm425_vm0, %v490_v14  ;;  %v499_v13 = vld [vmem:[%s5681_s26 + $0x90] sm:$0xff] }
  0x26   : > { %524 = vst.msk [vmem:[#allocation2 + $0x91] sm:$0xff] %vm425_vm0, %v491_v20  ;;  %525 = vst.msk [vmem:[#allocation2 + $0x99] sm:$0xff] %vm425_vm0, %v492_v23 }
  0x27   : > { %vm5350_vm4 = vmpackc.low %vm2230_vm2, %vm5478_vm3  ;;  %526 = vst.msk [vmem:[#allocation2 + $0xa9] sm:$0xff] %vm425_vm0, %v493_v35  ;;  %vm4056_vm2 = vcmask 392192   ;;  %vm4089_vm3 = vcmask 457728  }
  0x28   : > { %v5707_v15 = vld [vmem:[#allocation2 + $0x20] sm:$0xff]  ;;  %v5709_v16 = vld [vmem:[#allocation2 + $0x18] sm:$0xff]  ;;  %5351 = vmatprep.subr.msk.bf16.mxu0 %vm5350_vm4, %v5349_v31  ;;  %527 = vst.msk [vmem:[#allocation2 + $0xb1] sm:$0xff] %vm425_vm0, %v494_v37  ;;  %528 = vst.msk [vmem:[#allocation2 + $0xc1] sm:$0xff] %vm425_vm0, %v495_v43 }
  0x29   : > { %1125 = vrot.lane.b32.xlu1 %v5707_v15, %s5473_s29  ;;  %1123 = vrot.lane.b32.xlu0 %v5709_v16, %s5473_s29  ;;  %v674_v17 = vld [vmem:[#allocation2 + $0x19] sm:$0xff]  ;;  %v675_v18 = vld [vmem:[#allocation2 + $0x21] sm:$0xff]  ;;  %v5723_v22 = vld [vmem:[#allocation2 + $0x30] sm:$0xff]  ;;  %529 = vst.msk [vmem:[#allocation2 + $0xc9] sm:$0xff] %vm425_vm0, %v496_v45 }
  0x2a   : > { %v706_v19 = vld [vmem:[#allocation2 + $0x1a] sm:$0xff]  ;;  %v707_v21 = vld [vmem:[#allocation2 + $0x22] sm:$0xff]  ;;  %v771_v28 = vld [vmem:[#allocation2 + $0x31] sm:$0xff]  ;;  %5354 = vmatpush3.bf16.msk.msra.mxu0 %vm5350_vm4, %v5349_v31  ;;  %530 = vst.msk [vmem:[#allocation2 + $0xd9] sm:$0xff] %vm425_vm0, %v497_v51  ;;  %vm4122_vm4 = vcmask 523264  }
  0x2b   : > { %v5739_v27 = vld [vmem:[#allocation2 + $0x38] sm:$0xff]  ;;  %v5763_v36 = vld [vmem:[#allocation2 + $0x48] sm:$0xff]  ;;  %v5773_v38 = vld [vmem:[#allocation2 + $0x50] sm:$0xff]  ;;  %531 = vst.msk [vmem:[#allocation2 + $0xe1] sm:$0xff] %vm425_vm0, %v498_v57 }
  0x2c   : > { %v772_v32 = vld [vmem:[#allocation2 + $0x39] sm:$0xff]  ;;  %v773_v39 = vld [vmem:[#allocation2 + $0x49] sm:$0xff]  ;;  %v774_v40 = vld [vmem:[#allocation2 + $0x51] sm:$0xff]  ;;  %532 = vst.msk [vmem:[#allocation2 + $0xf1] sm:$0xff] %vm425_vm0, %v499_v13 }
  0x2d   : > { %1251 = vrot.lane.b32.xlu0 %v674_v17, %s5474_s30  ;;  %871 = vrot.lane.b32.xlu1 %v674_v17, %s5472_s28  ;;  %v803_v33 = vld [vmem:[#allocation2 + $0x32] sm:$0xff]  ;;  %v804_v34 = vld [vmem:[#allocation2 + $0x3a] sm:$0xff]  ;;  %v805_v41 = vld [vmem:[#allocation2 + $0x4a] sm:$0xff]  ;;  %533 = vst.msk [vmem:[#allocation2 + $0xf9] sm:$0xff] %vm425_vm0, %v500_v29 }
  0x2e   : > { %v806_v42 = vld [vmem:[#allocation2 + $0x52] sm:$0xff]  ;;  %v5791_v44 = vld [vmem:[#allocation2 + $0x60] sm:$0xff]  ;;  %v5801_v46 = vld [vmem:[#allocation2 + $0x68] sm:$0xff]  ;;  %2497 = vst.msk [vmem:[#allocation3 + $0x20] sm:$0xff] %vm2491_vm13, %v5470_v0 }
  0x2f   : > { %v775_v47 = vld [vmem:[#allocation2 + $0x61] sm:$0xff]  ;;  %v776_v48 = vld [vmem:[#allocation2 + $0x69] sm:$0xff]  ;;  %v5819_v54 = vld [vmem:[#allocation2 + $0x78] sm:$0xff]  ;;  %2498 = vst.msk [vmem:[#allocation3 + $0x28] sm:$0x3] %vm2494_vm14, %v5470_v0 }
  0x30   : > { %v807_v49 = vld [vmem:[#allocation2 + $0x62] sm:$0xff]  ;;  %v808_v50 = vld [vmem:[#allocation2 + $0x6a] sm:$0xff]  ;;  %v777_v61 = vld [vmem:[#allocation2 + $0x79] sm:$0xff]  ;;  %2492 = vst.msk [vmem:[#allocation3] sm:$0xff] %vm2491_vm13, %v5470_v0 }
  0x31   : > { %1253 = vrot.lane.b32.xlu0 %v675_v18, %s5474_s30  ;;  %1379 = vrot.lane.b32.xlu1 %v706_v19, %s5475_s13  ;;  %v5835_v60 = vld [vmem:[#allocation2 + $0x80] sm:$0xff]  ;;  %v5867_v20 = vld [vmem:[#allocation2 + $0x90] sm:$0xff]  ;;  %2493 = vst.msk [vmem:[#allocation3 + $0x8] sm:$0xff] %vm2491_vm13, %v5470_v0  ;;  %2496 = vst.msk [vmem:[#allocation3 + $0x18] sm:$0xff] %vm2491_vm13, %v5470_v0 }
  0x32   : > { %v778_v3 = vld [vmem:[#allocation2 + $0x81] sm:$0xff]  ;;  %2495 = vst.msk [vmem:[#allocation3 + $0x10] sm:$0x3] %vm2494_vm14, %v5470_v0  ;;  %2501 = vst.msk [vmem:[#allocation3 + $0x40] sm:$0x3] %vm2494_vm14, %v5470_v0 }
  0x33   : > { %v809_v4 = vld [vmem:[#allocation2 + $0x7a] sm:$0xff]  ;;  %v810_v9 = vld [vmem:[#allocation2 + $0x82] sm:$0xff]  ;;  %2499 = vst.msk [vmem:[#allocation3 + $0x30] sm:$0xff] %vm2491_vm13, %v5470_v0  ;;  %2500 = vst.msk [vmem:[#allocation3 + $0x38] sm:$0xff] %vm2491_vm13, %v5470_v0 }
  0x34   : > { %2502 = vst.msk [vmem:[#allocation3 + $0x48] sm:$0xff] %vm2491_vm13, %v5470_v0  ;;  %2503 = vst.msk [vmem:[#allocation3 + $0x50] sm:$0xff] %vm2491_vm13, %v5470_v0 }
  0x35   : > { %873 = vrot.lane.b32.xlu0 %v675_v18, %s5472_s28  ;;  %999 = vrot.lane.b32.xlu1 %v706_v19, %s5471_s27  ;;  %2504 = vst.msk [vmem:[#allocation3 + $0x58] sm:$0x3] %vm2494_vm14, %v5470_v0  ;;  %2507 = vst.msk [vmem:[#allocation3 + $0x70] sm:$0x3] %vm2494_vm14, %v5470_v0 }
  0x36   : > { %2505 = vst.msk [vmem:[#allocation3 + $0x60] sm:$0xff] %vm2491_vm13, %v5470_v0  ;;  %2506 = vst.msk [vmem:[#allocation3 + $0x68] sm:$0xff] %vm2491_vm13, %v5470_v0 }
  0x37   : > { %2508 = vst.msk [vmem:[#allocation3 + $0x78] sm:$0xff] %vm2491_vm13, %v5470_v0  ;;  %2509 = vst.msk [vmem:[#allocation3 + $0x80] sm:$0xff] %vm2491_vm13, %v5470_v0 }
  0x38   : > { %2510 = vst.msk [vmem:[#allocation3 + $0x88] sm:$0x3] %vm2494_vm14, %v5470_v0  ;;  %2513 = vst.msk [vmem:[#allocation3 + $0xa0] sm:$0x3] %vm2494_vm14, %v5470_v0 }
  0x39   : > { %1381 = vrot.lane.b32.xlu0 %v707_v21, %s5475_s13  ;;  %1507 = vrot.lane.b32.xlu1 %v5723_v22, %s5476_s14  ;;  %2511 = vst.msk [vmem:[#allocation3 + $0x90] sm:$0xff] %vm2491_vm13, %v5470_v0  ;;  %2512 = vst.msk [vmem:[#allocation3 + $0x98] sm:$0xff] %vm2491_vm13, %v5470_v0 }
  0x3a   : > { %2514 = vst.msk [vmem:[#allocation3 + $0xa8] sm:$0xff] %vm2491_vm13, %v5470_v0  ;;  %2515 = vst.msk [vmem:[#allocation3 + $0xb0] sm:$0xff] %vm2491_vm13, %v5470_v0 }
  0x3b   : > { %2516 = vst.msk [vmem:[#allocation3 + $0xb8] sm:$0x3] %vm2494_vm14, %v5470_v0  ;;  %2519 = vst.msk [vmem:[#allocation3 + $0xd0] sm:$0x3] %vm2494_vm14, %v5470_v0 }
  0x3c   : > { %2517 = vst.msk [vmem:[#allocation3 + $0xc0] sm:$0xff] %vm2491_vm13, %v5470_v0  ;;  %2518 = vst.msk [vmem:[#allocation3 + $0xc8] sm:$0xff] %vm2491_vm13, %v5470_v0 }
  0x3d   : > { %1001 = vrot.lane.b32.xlu0 %v707_v21, %s5471_s27  ;;  %1127 = vrot.lane.b32.xlu1 %v5723_v22, %s5473_s29  ;;  %2520 = vst.msk [vmem:[#allocation3 + $0xd8] sm:$0xff] %vm2491_vm13, %v5470_v0  ;;  %2521 = vst.msk [vmem:[#allocation3 + $0xe0] sm:$0xff] %vm2491_vm13, %v5470_v0 }
  0x3e   : > { %2522 = vst.msk [vmem:[#allocation3 + $0xe8] sm:$0x3] %vm2494_vm14, %v5470_v0  ;;  %2525 = vst.msk [vmem:[#allocation3 + $0x100] sm:$0x3] %vm2494_vm14, %v5470_v0 }
  0x3f   : > { %2523 = vst.msk [vmem:[#allocation3 + $0xf0] sm:$0xff] %vm2491_vm13, %v5470_v0  ;;  %2524 = vst.msk [vmem:[#allocation3 + $0xf8] sm:$0xff] %vm2491_vm13, %v5470_v0 }
  0x40   : > { %2526 = vst.msk [vmem:[#allocation3 + $0x108] sm:$0xff] %vm2491_vm13, %v5470_v0  ;;  %2527 = vst.msk [vmem:[#allocation3 + $0x110] sm:$0xff] %vm2491_vm13, %v5470_v0 }
  0x41   : > { %1509 = vrot.lane.b32.xlu0 %v5739_v27, %s5476_s14  ;;  %1635 = vrot.lane.b32.xlu1 %v771_v28, %s5477_s25  ;;  %2528 = vst.msk [vmem:[#allocation3 + $0x118] sm:$0x3] %vm2494_vm14, %v5470_v0  ;;  %2531 = vst.msk [vmem:[#allocation3 + $0x130] sm:$0x3] %vm2494_vm14, %v5470_v0 }
  0x42   : > { %2529 = vst.msk [vmem:[#allocation3 + $0x120] sm:$0xff] %vm2491_vm13, %v5470_v0  ;;  %2530 = vst.msk [vmem:[#allocation3 + $0x128] sm:$0xff] %vm2491_vm13, %v5470_v0 }
  0x43   : > { %2532 = vst.msk [vmem:[#allocation3 + $0x138] sm:$0xff] %vm2491_vm13, %v5470_v0  ;;  %2533 = vst.msk [vmem:[#allocation3 + $0x140] sm:$0xff] %vm2491_vm13, %v5470_v0 }
  0x44   : > { %2534 = vst.msk [vmem:[#allocation3 + $0x148] sm:$0x3] %vm2494_vm14, %v5470_v0  ;;  %2537 = vst.msk [vmem:[#allocation3 + $0x160] sm:$0x3] %vm2494_vm14, %v5470_v0 }
  0x45   : > { %1129 = vrot.lane.b32.xlu0 %v5739_v27, %s5473_s29  ;;  %1255 = vrot.lane.b32.xlu1 %v771_v28, %s5474_s30  ;;  %2535 = vst.msk [vmem:[#allocation3 + $0x150] sm:$0xff] %vm2491_vm13, %v5470_v0  ;;  %2536 = vst.msk [vmem:[#allocation3 + $0x158] sm:$0xff] %vm2491_vm13, %v5470_v0 }
  0x46   : > { %2538 = vst.msk [vmem:[#allocation3 + $0x168] sm:$0xff] %vm2491_vm13, %v5470_v0  ;;  %2539 = vst.msk [vmem:[#allocation3 + $0x170] sm:$0xff] %vm2491_vm13, %v5470_v0 }
  0x47   : > { %2540 = vst.msk [vmem:[#allocation3 + $0x178] sm:$0x3] %vm2494_vm14, %v5470_v0  ;;  %2543 = vst.msk [vmem:[#allocation3 + $0x190] sm:$0x3] %vm2494_vm14, %v5470_v0 }
  0x48   : > { %2541 = vst.msk [vmem:[#allocation3 + $0x180] sm:$0xff] %vm2491_vm13, %v5470_v0  ;;  %2542 = vst.msk [vmem:[#allocation3 + $0x188] sm:$0xff] %vm2491_vm13, %v5470_v0 }
  0x49   : > { %1637 = vrot.lane.b32.xlu0 %v772_v32, %s5477_s25  ;;  %1763 = vrot.lane.b32.xlu1 %v803_v33, %s5479_s15  ;;  %2544 = vst.msk [vmem:[#allocation3 + $0x198] sm:$0xff] %vm2491_vm13, %v5470_v0  ;;  %2545 = vst.msk [vmem:[#allocation3 + $0x1a0] sm:$0xff] %vm2491_vm13, %v5470_v0 }
  0x4a   : > { %2546 = vst.msk [vmem:[#allocation3 + $0x1a8] sm:$0x3] %vm2494_vm14, %v5470_v0 }
  0x4d   : > { %875 = vrot.lane.b32.xlu0 %v771_v28, %s5472_s28  ;;  %1257 = vrot.lane.b32.xlu1 %v772_v32, %s5474_s30 }
  0x51   : > { %1383 = vrot.lane.b32.xlu0 %v803_v33, %s5475_s13  ;;  %1765 = vrot.lane.b32.xlu1 %v804_v34, %s5479_s15 }
  0x55   : > { %877 = vrot.lane.b32.xlu0 %v772_v32, %s5472_s28  ;;  %1003 = vrot.lane.b32.xlu1 %v803_v33, %s5471_s27 }
  0x59   : > { %1385 = vrot.lane.b32.xlu0 %v804_v34, %s5475_s13  ;;  %1511 = vrot.lane.b32.xlu1 %v5763_v36, %s5476_s14 }
  0x5d   : > { %1005 = vrot.lane.b32.xlu0 %v804_v34, %s5471_s27  ;;  %1131 = vrot.lane.b32.xlu1 %v5763_v36, %s5473_s29 }
  0x61   : > { %1513 = vrot.lane.b32.xlu0 %v5773_v38, %s5476_s14  ;;  %1639 = vrot.lane.b32.xlu1 %v773_v39, %s5477_s25 }
  0x65   : > { %1133 = vrot.lane.b32.xlu0 %v5773_v38, %s5473_s29  ;;  %1259 = vrot.lane.b32.xlu1 %v773_v39, %s5474_s30 }
  0x69   : > { %1641 = vrot.lane.b32.xlu0 %v774_v40, %s5477_s25  ;;  %1767 = vrot.lane.b32.xlu1 %v805_v41, %s5479_s15 }
  0x6d   : > { %879 = vrot.lane.b32.xlu0 %v773_v39, %s5472_s28  ;;  %1261 = vrot.lane.b32.xlu1 %v774_v40, %s5474_s30  ;;  %v5892_v39 = vld [vmem:[#allocation2 + $0x98] sm:$0xff] }
  0x71   : > { %1387 = vrot.lane.b32.xlu0 %v805_v41, %s5475_s13  ;;  %1769 = vrot.lane.b32.xlu1 %v806_v42, %s5479_s15 }
  0x75   : > { %881 = vrot.lane.b32.xlu0 %v774_v40, %s5472_s28  ;;  %1007 = vrot.lane.b32.xlu1 %v805_v41, %s5471_s27  ;;  %v779_v40 = vld [vmem:[#allocation2 + $0x91] sm:$0xff] }
  0x79   : > { %1389 = vrot.lane.b32.xlu0 %v806_v42, %s5475_s13  ;;  %1515 = vrot.lane.b32.xlu1 %v5791_v44, %s5476_s14 }
  0x7d   : > { %1009 = vrot.lane.b32.xlu0 %v806_v42, %s5471_s27  ;;  %1135 = vrot.lane.b32.xlu1 %v5791_v44, %s5473_s29 }
  0x80   : > { %v996_v52 = vpop.permute.xlu1 %995 }
  0x81   : > { %1517 = vrot.lane.b32.xlu0 %v5801_v46, %s5476_s14  ;;  %1643 = vrot.lane.b32.xlu1 %v775_v47, %s5477_s25  ;;  %v868_v53 = vpop.permute.xlu0 %867 }
  0x82   : > { %v1859_v14 = vsel %vm425_vm0, %v546_v12, %v868_v53  ;;  %v780_v53 = vld [vmem:[#allocation2 + $0x99] sm:$0xff]  ;;  %v5936_v12 = vld [vmem:[#allocation2 + $0xa8] sm:$0xff] }
  0x83   : > { %v1892_v19 = vsel %vm1891_vm5, %v1859_v14, %v996_v52 }
  0x85   : > { %1137 = vrot.lane.b32.xlu0 %v5801_v46, %s5473_s29  ;;  %1263 = vrot.lane.b32.xlu1 %v775_v47, %s5474_s30 }
  0x89   : > { %1645 = vrot.lane.b32.xlu0 %v776_v48, %s5477_s25  ;;  %1771 = vrot.lane.b32.xlu1 %v807_v49, %s5479_s15 }
  0x8d   : > { %883 = vrot.lane.b32.xlu0 %v775_v47, %s5472_s28  ;;  %1265 = vrot.lane.b32.xlu1 %v776_v48, %s5474_s30 }
  0x91   : > { %1391 = vrot.lane.b32.xlu0 %v807_v49, %s5475_s13  ;;  %1773 = vrot.lane.b32.xlu1 %v808_v50, %s5479_s15 }
  0x92   : > { %v5821_v55 = vpop.permute.xlu1 %997 }
  0x93   : > { %v5823_v56 = vpop.permute.xlu0 %869 }
  0x94   : > { %v1860_v31 = vsel %vm425_vm0, %v547_v25, %v5823_v56 }
  0x95   : > { %885 = vrot.lane.b32.xlu0 %v776_v48, %s5472_s28  ;;  %1011 = vrot.lane.b32.xlu1 %v807_v49, %s5471_s27  ;;  %v1893_v37 = vsel %vm1891_vm5, %v1860_v31, %v5821_v55  ;;  %v811_v55 = vld [vmem:[#allocation2 + $0x92] sm:$0xff] }
  0x99   : > { %1393 = vrot.lane.b32.xlu0 %v808_v50, %s5475_s13  ;;  %1519 = vrot.lane.b32.xlu1 %v5819_v54, %s5476_s14 }
  0x9b   : > { %v5830_v58 = vpop.permute.xlu1 %1125  ;;  %v1124_v59 = vpop.permute.xlu0 %1123 }
  0x9c   : > { %v1925_v21 = vsel %vm1924_vm6, %v1892_v19, %v1124_v59  ;;  %v1926_v41 = vsel %vm1924_vm6, %v1893_v37, %v5830_v58  ;;  %v813_v37 = vld [vmem:[#allocation2 + $0xaa] sm:$0xff] }
  0x9d   : > { %1013 = vrot.lane.b32.xlu0 %v808_v50, %s5471_s27  ;;  %1139 = vrot.lane.b32.xlu1 %v5819_v54, %s5473_s29 }
  0x9f   : > { %v1252_v62 = vpop.permute.xlu0 %1251  ;;  %v5837_v63 = vpop.permute.xlu1 %871 }
  0xa0   : > { %v1958_v26 = vsel %vm1957_vm7, %v1925_v21, %v1252_v62  ;;  %v502_v62 = vld [vmem:[%s5681_s26 + $0xa8] sm:$0xff] }
  0xa1   : > { %1521 = vrot.lane.b32.xlu0 %v5835_v60, %s5476_s14  ;;  %1647 = vrot.lane.b32.xlu1 %v777_v61, %s5477_s25  ;;  %535 = vst.msk [vmem:[#allocation2 + $0x111] sm:$0xff] %vm425_vm0, %v502_v62 }
  0xa3   : > { %v5842_v1 = vpop.permute.xlu0 %1253  ;;  %v1380_v2 = vpop.permute.xlu1 %1379 }
  0xa4   : > { %v1991_v28 = vsel %vm1990_vm8, %v1958_v26, %v1380_v2  ;;  %v1959_v45 = vsel %vm1957_vm7, %v1926_v41, %v5842_v1  ;;  %v812_v1 = vld [vmem:[#allocation2 + $0x9a] sm:$0xff]  ;;  %v5960_v26 = vld [vmem:[#allocation2 + $0xb0] sm:$0xff] }
  0xa5   : > { %1141 = vrot.lane.b32.xlu0 %v5835_v60, %s5473_s29  ;;  %1267 = vrot.lane.b32.xlu1 %v777_v61, %s5474_s30 }
  0xa7   : > { %v5847_v5 = vpop.permute.xlu0 %873  ;;  %v5849_v6 = vpop.permute.xlu1 %999 }
  0xa8   : > { %v1862_v25 = vsel %vm425_vm0, %v5707_v15, %v5847_v5 }
  0xa9   : > { %1649 = vrot.lane.b32.xlu0 %v778_v3, %s5477_s25  ;;  %1775 = vrot.lane.b32.xlu1 %v809_v4, %s5479_s15 }
  0xab   : > { %v1382_v7 = vpop.permute.xlu0 %1381  ;;  %v1508_v8 = vpop.permute.xlu1 %1507 }
  0xac   : > { %v2024_v30 = vsel %vm2023_vm9, %v1991_v28, %v1508_v8  ;;  %v1992_v47 = vsel %vm1990_vm8, %v1959_v45, %v1382_v7  ;;  %v1861_v8 = vsel %vm425_vm0, %v5709_v16, %v5837_v63  ;;  %v781_v28 = vld [vmem:[#allocation2 + $0xa9] sm:$0xff] }
  0xad   : > { %887 = vrot.lane.b32.xlu0 %v777_v61, %s5472_s28  ;;  %1269 = vrot.lane.b32.xlu1 %v778_v3, %s5474_s30  ;;  %v501_v61 = vld [vmem:[%s5681_s26 + $0xa0] sm:$0xff] }
  0xae   : > { %534 = vst.msk [vmem:[#allocation2 + $0x109] sm:$0xff] %vm425_vm0, %v501_v61 }
  0xaf   : > { %v5855_v10 = vpop.permute.xlu0 %1001  ;;  %v5857_v11 = vpop.permute.xlu1 %1127 }
  0xb1   : > { %1395 = vrot.lane.b32.xlu0 %v809_v4, %s5475_s13  ;;  %1777 = vrot.lane.b32.xlu1 %v810_v9, %s5479_s15 }
  0xb3   : > { %v1510_v17 = vpop.permute.xlu0 %1509  ;;  %v1636_v18 = vpop.permute.xlu1 %1635 }
  0xb4   : > { %v2057_v32 = vsel %vm2056_vm10, %v2024_v30, %v1636_v18  ;;  %v2025_v48 = vsel %vm2023_vm9, %v1992_v47, %v1510_v17  ;;  %v503_v47 = vld [vmem:[%s5681_s26 + $0xb0] sm:$0xff] }
  0xb5   : > { %889 = vrot.lane.b32.xlu0 %v778_v3, %s5472_s28  ;;  %1015 = vrot.lane.b32.xlu1 %v809_v4, %s5471_s27  ;;  %536 = vst.msk [vmem:[#allocation2 + $0x121] sm:$0xff] %vm425_vm0, %v503_v47 }
  0xb7   : > { %v5870_v23 = vpop.permute.xlu0 %1129  ;;  %v5872_v24 = vpop.permute.xlu1 %1255 }
  0xb9   : > { %1397 = vrot.lane.b32.xlu0 %v810_v9, %s5475_s13  ;;  %1523 = vrot.lane.b32.xlu1 %v5867_v20, %s5476_s14 }
  0xbb   : > { %v1638_v33 = vpop.permute.xlu0 %1637  ;;  %v1764_v34 = vpop.permute.xlu1 %1763 }
  0xbc   : > { %v2090_v35 = vsel %vm2089_vm11, %v2057_v32, %v1764_v34  ;;  %v2058_v49 = vsel %vm2056_vm10, %v2025_v48, %v1638_v33  ;;  %v504_v48 = vld [vmem:[%s5681_s26 + $0xb8] sm:$0xff] }
  0xbd   : > { %1017 = vrot.lane.b32.xlu0 %v810_v9, %s5471_s27  ;;  %1143 = vrot.lane.b32.xlu1 %v5867_v20, %s5473_s29  ;;  %v1894_v9 = vsel %vm1891_vm5, %v1861_v8, %v5849_v6  ;;  %537 = vst.msk [vmem:[#allocation2 + $0x129] sm:$0xff] %vm425_vm0, %v504_v48 }
  0xbe   : > { %5224 = vmatprep.mubr.msk.f32.mxu0 %vm2133_vm12, %v2090_v35  ;;  %v1927_v13 = vsel %vm1924_vm6, %v1894_v9, %v5857_v11  ;;  %v782_v35 = vld [vmem:[#allocation2 + $0xb1] sm:$0xff] }
  0xbf   : > { %v5896_v42 = vpop.permute.xlu0 %875  ;;  %v1258_v43 = vpop.permute.xlu1 %1257  ;;  %v1960_v18 = vsel %vm1957_vm7, %v1927_v13, %v5872_v24  ;;  %v1895_v24 = vsel %vm1891_vm5, %v1862_v25, %v5855_v10  ;;  %v784_v25 = vld [vmem:[#allocation2 + $0xc9] sm:$0xff] }
  0xc0   : > { %v1928_v29 = vsel %vm1924_vm6, %v1895_v24, %v5870_v23  ;;  %v815_v24 = vld [vmem:[#allocation2 + $0xc2] sm:$0xff] }
  0xc1   : > { %1525 = vrot.lane.b32.xlu0 %v5892_v39, %s5476_s14  ;;  %1651 = vrot.lane.b32.xlu1 %v779_v40, %s5477_s25  ;;  %v1961_v15 = vsel %vm1957_vm7, %v1928_v29, %v1258_v43 }
  0xc3   : > { %v1384_v50 = vpop.permute.xlu0 %1383  ;;  %v1766_v51 = vpop.permute.xlu1 %1765 }
  0xc4   : > { %v2091_v52 = vsel %vm2089_vm11, %v2058_v49, %v1766_v51  ;;  %v1993_v16 = vsel %vm1990_vm8, %v1960_v18, %v1384_v50  ;;  %v814_v49 = vld [vmem:[#allocation2 + $0xb2] sm:$0xff]  ;;  %v783_v18 = vld [vmem:[#allocation2 + $0xc1] sm:$0xff] }
  0xc5   : > { %1145 = vrot.lane.b32.xlu0 %v5892_v39, %s5473_s29  ;;  %1271 = vrot.lane.b32.xlu1 %v779_v40, %s5474_s30 }
  0xc6   : > { %5225 = vmatmul.mubr.msk.f32.vlgmr.msra.gmra.mrb[0].mxu0 %vm2133_vm12, %v2091_v52 }
  0xc7   : > { %v5911_v56 = vpop.permute.xlu0 %877  ;;  %v5913_v57 = vpop.permute.xlu1 %1003 }
  0xc8   : > { %v1864_v9 = vsel %vm425_vm0, %v5739_v27, %v5911_v56 }
  0xc9   : > { %1653 = vrot.lane.b32.xlu0 %v780_v53, %s5477_s25  ;;  %1779 = vrot.lane.b32.xlu1 %v811_v55, %s5479_s15 }
  0xcb   : > { %v1386_v58 = vpop.permute.xlu0 %1385  ;;  %v1512_v59 = vpop.permute.xlu1 %1511 }
  0xcc   : > { %v2026_v63 = vsel %vm2023_vm9, %v1993_v16, %v1512_v59  ;;  %v1994_v5 = vsel %vm1990_vm8, %v1961_v15, %v1386_v58  ;;  %v6003_v59 = vld [vmem:[#allocation2 + $0xc0] sm:$0xff] }
  0xcd   : > { %891 = vrot.lane.b32.xlu0 %v779_v40, %s5472_s28  ;;  %1273 = vrot.lane.b32.xlu1 %v780_v53, %s5474_s30 }
  0xcf   : > { %v5923_v2 = vpop.permute.xlu0 %1005  ;;  %v5925_v3 = vpop.permute.xlu1 %1131 }
  0xd0   : > { %v1897_v13 = vsel %vm1891_vm5, %v1864_v9, %v5923_v2  ;;  %v786_v9 = vld [vmem:[#allocation2 + $0xe1] sm:$0xff] }
  0xd1   : > { %1399 = vrot.lane.b32.xlu0 %v811_v55, %s5475_s13  ;;  %1781 = vrot.lane.b32.xlu1 %v812_v1, %s5479_s15 }
  0xd3   : > { %v1514_v4 = vpop.permute.xlu0 %1513  ;;  %v1640_v7 = vpop.permute.xlu1 %1639 }
  0xd4   : > { %v2059_v6 = vsel %vm2056_vm10, %v2026_v63, %v1640_v7  ;;  %v2027_v10 = vsel %vm2023_vm9, %v1994_v5, %v1514_v4  ;;  %v505_v5 = vld [vmem:[%s5681_s26 + $0xc0] sm:$0xff] }
  0xd5   : > { %893 = vrot.lane.b32.xlu0 %v780_v53, %s5472_s28  ;;  %1019 = vrot.lane.b32.xlu1 %v811_v55, %s5471_s27  ;;  %v1863_v55 = vsel %vm425_vm0, %v5723_v22, %v5896_v42  ;;  %538 = vst.msk [vmem:[#allocation2 + $0x139] sm:$0xff] %vm425_vm0, %v505_v5 }
  0xd6   : > { %v1896_v58 = vsel %vm1891_vm5, %v1863_v55, %v5913_v57 }
  0xd7   : > { %v5940_v14 = vpop.permute.xlu0 %1133  ;;  %v1260_v17 = vpop.permute.xlu1 %1259  ;;  %v1929_v61 = vsel %vm1924_vm6, %v1896_v58, %v5925_v3 }
  0xd8   : > { %v1962_v4 = vsel %vm1957_vm7, %v1929_v61, %v1260_v17  ;;  %v6026_v17 = vld [vmem:[#allocation2 + $0xc8] sm:$0xff]  ;;  %v1930_v16 = vsel %vm1924_vm6, %v1897_v13, %v5940_v14  ;;  %v785_v61 = vld [vmem:[#allocation2 + $0xd9] sm:$0xff] }
  0xd9   : > { %1401 = vrot.lane.b32.xlu0 %v812_v1, %s5475_s13  ;;  %1527 = vrot.lane.b32.xlu1 %v5936_v12, %s5476_s14  ;;  %v817_v13 = vld [vmem:[#allocation2 + $0xda] sm:$0xff] }
  0xdb   : > { %v1642_v19 = vpop.permute.xlu0 %1641  ;;  %v1768_v21 = vpop.permute.xlu1 %1767 }
  0xdc   : > { %v2092_v11 = vsel %vm2089_vm11, %v2059_v6, %v1768_v21  ;;  %v2060_v32 = vsel %vm2056_vm10, %v2027_v10, %v1642_v19  ;;  %v506_v10 = vld [vmem:[%s5681_s26 + $0xc8] sm:$0xff] }
  0xdd   : > { %1021 = vrot.lane.b32.xlu0 %v812_v1, %s5471_s27  ;;  %1147 = vrot.lane.b32.xlu1 %v5936_v12, %s5473_s29  ;;  %539 = vst.msk [vmem:[#allocation2 + $0x141] sm:$0xff] %vm425_vm0, %v506_v10 }
  0xde   : > { %5227 = vmatprep.mubr.msk.f32.mxu0 %vm2133_vm12, %v2092_v11 }
  0xdf   : > { %v5964_v30 = vpop.permute.xlu0 %879  ;;  %v1262_v31 = vpop.permute.xlu1 %1261 }
  0xe0   : > { %v1963_v27 = vsel %vm1957_vm7, %v1930_v16, %v1262_v31 }
  0xe1   : > { %1529 = vrot.lane.b32.xlu0 %v5960_v26, %s5476_s14  ;;  %1655 = vrot.lane.b32.xlu1 %v781_v28, %s5477_s25 }
  0xe3   : > { %v1388_v33 = vpop.permute.xlu0 %1387  ;;  %v1770_v34 = vpop.permute.xlu1 %1769 }
  0xe4   : > { %v2093_v23 = vsel %vm2089_vm11, %v2060_v32, %v1770_v34  ;;  %v1995_v7 = vsel %vm1990_vm8, %v1962_v4, %v1388_v33  ;;  %v816_v32 = vld [vmem:[#allocation2 + $0xca] sm:$0xff] }
  0xe5   : > { %1149 = vrot.lane.b32.xlu0 %v5960_v26, %s5473_s29  ;;  %1275 = vrot.lane.b32.xlu1 %v781_v28, %s5474_s30 }
  0xe6   : > { %5228 = vmatmul.mubr.msk.f32.gmra.mrb[2].mxu0 %vm2133_vm12, %v2093_v23 }
  0xe7   : > { %v5978_v40 = vpop.permute.xlu0 %881  ;;  %v5980_v41 = vpop.permute.xlu1 %1007 }
  0xe8   : > { %v1866_v58 = vsel %vm425_vm0, %v5773_v38, %v5978_v40  ;;  %v6210_v40 = vld [vmem:[#allocation2 + $0xe0] sm:$0xff] }
  0xe9   : > { %1657 = vrot.lane.b32.xlu0 %v782_v35, %s5477_s25  ;;  %1783 = vrot.lane.b32.xlu1 %v813_v37, %s5479_s15 }
  0xeb   : > { %v1390_v43 = vpop.permute.xlu0 %1389  ;;  %v1516_v45 = vpop.permute.xlu1 %1515 }
  0xec   : > { %v2028_v22 = vsel %vm2023_vm9, %v1995_v7, %v1516_v45  ;;  %v1996_v56 = vsel %vm1990_vm8, %v1963_v27, %v1390_v43  ;;  %v6075_v45 = vld [vmem:[#allocation2 + $0xd8] sm:$0xff] }
  0xed   : > { %895 = vrot.lane.b32.xlu0 %v781_v28, %s5472_s28  ;;  %1277 = vrot.lane.b32.xlu1 %v782_v35, %s5474_s30 }
  0xef   : > { %v5990_v50 = vpop.permute.xlu0 %1009  ;;  %v5992_v51 = vpop.permute.xlu1 %1135 }
  0xf0   : > { %v1899_v38 = vsel %vm1891_vm5, %v1866_v58, %v5990_v50  ;;  %v788_v58 = vld [vmem:[#allocation2 + $0xf9] sm:$0xff] }
  0xf1   : > { %1403 = vrot.lane.b32.xlu0 %v813_v37, %s5475_s13  ;;  %1785 = vrot.lane.b32.xlu1 %v814_v49, %s5479_s15 }
  0xf3   : > { %v1518_v52 = vpop.permute.xlu0 %1517  ;;  %v1644_v53 = vpop.permute.xlu1 %1643 }
  0xf4   : > { %v2061_v42 = vsel %vm2056_vm10, %v2028_v22, %v1644_v53  ;;  %v2029_v2 = vsel %vm2023_vm9, %v1996_v56, %v1518_v52  ;;  %v507_v56 = vld [vmem:[%s5681_s26 + $0xd0] sm:$0xff] }
  0xf5   : > { %897 = vrot.lane.b32.xlu0 %v782_v35, %s5472_s28  ;;  %1023 = vrot.lane.b32.xlu1 %v813_v37, %s5471_s27  ;;  %v1865_v37 = vsel %vm425_vm0, %v5763_v36, %v5964_v30  ;;  %540 = vst.msk [vmem:[#allocation2 + $0x151] sm:$0xff] %vm425_vm0, %v507_v56 }
  0xf6   : > { %v1898_v43 = vsel %vm1891_vm5, %v1865_v37, %v5980_v41 }
  0xf7   : > { %v6007_v62 = vpop.permute.xlu0 %1137  ;;  %v1264_v1 = vpop.permute.xlu1 %1263  ;;  %v1931_v47 = vsel %vm1924_vm6, %v1898_v43, %v5992_v51 }
  0xf8   : > { %v1964_v52 = vsel %vm1957_vm7, %v1931_v47, %v1264_v1  ;;  %v1932_v1 = vsel %vm1924_vm6, %v1899_v38, %v6007_v62  ;;  %v819_v38 = vld [vmem:[#allocation2 + $0xf2] sm:$0xff] }
  0xf9   : > { %1405 = vrot.lane.b32.xlu0 %v814_v49, %s5475_s13  ;;  %1531 = vrot.lane.b32.xlu1 %v6003_v59, %s5476_s14 }
  0xfb   : > { %v1646_v57 = vpop.permute.xlu0 %1645  ;;  %v1772_v8 = vpop.permute.xlu1 %1771 }
  0xfc   : > { %v2094_v3 = vsel %vm2089_vm11, %v2061_v42, %v1772_v8  ;;  %v2062_v19 = vsel %vm2056_vm10, %v2029_v2, %v1646_v57  ;;  %v508_v2 = vld [vmem:[%s5681_s26 + $0xd8] sm:$0xff] }
  0xfd   : > { %1025 = vrot.lane.b32.xlu0 %v814_v49, %s5471_s27  ;;  %1151 = vrot.lane.b32.xlu1 %v6003_v59, %s5473_s29  ;;  %541 = vst.msk [vmem:[#allocation2 + $0x159] sm:$0xff] %vm425_vm0, %v508_v2  ;;  %v6334_v2 = vld [vmem:[#allocation2 + $0x109] sm:$0xff] }
  0xfe   : > { %5230 = vmatprep.mubr.msk.f32.mxu0 %vm2133_vm12, %v2094_v3 }
  0xff   : > { %v6030_v63 = vpop.permute.xlu0 %883  ;;  %v6032_v6 = vpop.permute.xlu1 %1265 }
 0x100   : > { %v1965_v22 = vsel %vm1957_vm7, %v1932_v1, %v6032_v6 }
 0x101   : > { %1533 = vrot.lane.b32.xlu0 %v6026_v17, %s5476_s14  ;;  %1659 = vrot.lane.b32.xlu1 %v783_v18, %s5477_s25 }
 0x103   : > { %v1392_v21 = vpop.permute.xlu0 %1391  ;;  %v1774_v14 = vpop.permute.xlu1 %1773 }
 0x104   : > { %v2095_v11 = vsel %vm2089_vm11, %v2062_v19, %v1774_v14  ;;  %v1997_v36 = vsel %vm1990_vm8, %v1964_v52, %v1392_v21  ;;  %v818_v19 = vld [vmem:[#allocation2 + $0xe2] sm:$0xff]  ;;  %v787_v52 = vld [vmem:[#allocation2 + $0xf1] sm:$0xff] }
 0x105   : > { %1153 = vrot.lane.b32.xlu0 %v6026_v17, %s5473_s29  ;;  %1279 = vrot.lane.b32.xlu1 %v783_v18, %s5474_s30 }
 0x106   : > { %5231 = vmatmul.mubr.msk.f32.gmra.mrb[4].mxu0 %vm2133_vm12, %v2095_v11 }
 0x107   : > { %v6046_v28 = vpop.permute.xlu0 %885  ;;  %v6048_v29 = vpop.permute.xlu1 %1011 }
 0x108   : > { %v1868_v43 = vsel %vm425_vm0, %v5801_v46, %v6046_v28 }
 0x109   : > { %1661 = vrot.lane.b32.xlu0 %v784_v25, %s5477_s25  ;;  %1787 = vrot.lane.b32.xlu1 %v815_v24, %s5479_s15 }
 0x10b   : > { %v6052_v31 = vpop.permute.xlu0 %1393  ;;  %v1520_v15 = vpop.permute.xlu1 %1519 }
 0x10c   : > { %v2030_v30 = vsel %vm2023_vm9, %v1997_v36, %v1520_v15  ;;  %v1998_v42 = vsel %vm1990_vm8, %v1965_v22, %v6052_v31  ;;  %v6257_v15 = vld [vmem:[#allocation2 + $0xf0] sm:$0xff] }
 0x10d   : > { %899 = vrot.lane.b32.xlu0 %v783_v18, %s5472_s28  ;;  %1281 = vrot.lane.b32.xlu1 %v784_v25, %s5474_s30 }
 0x10f   : > { %v6060_v33 = vpop.permute.xlu0 %1013  ;;  %v6062_v34 = vpop.permute.xlu1 %1139 }
 0x110   : > { %v1901_v47 = vsel %vm1891_vm5, %v1868_v43, %v6060_v33 }
 0x111   : > { %1407 = vrot.lane.b32.xlu0 %v815_v24, %s5475_s13  ;;  %1789 = vrot.lane.b32.xlu1 %v816_v32, %s5479_s15 }
 0x113   : > { %v6066_v23 = vpop.permute.xlu0 %1521  ;;  %v1648_v35 = vpop.permute.xlu1 %1647 }
 0x114   : > { %v2063_v41 = vsel %vm2056_vm10, %v2030_v30, %v1648_v35  ;;  %v2031_v50 = vsel %vm2023_vm9, %v1998_v42, %v6066_v23  ;;  %v509_v42 = vld [vmem:[%s5681_s26 + $0xe0] sm:$0xff] }
 0x115   : > { %901 = vrot.lane.b32.xlu0 %v784_v25, %s5472_s28  ;;  %1027 = vrot.lane.b32.xlu1 %v815_v24, %s5471_s27  ;;  %v1867_v24 = vsel %vm425_vm0, %v5791_v44, %v6030_v63  ;;  %542 = vst.msk [vmem:[#allocation2 + $0x169] sm:$0xff] %vm425_vm0, %v509_v42 }
 0x116   : > { %v1900_v31 = vsel %vm1891_vm5, %v1867_v24, %v6048_v29 }
 0x117   : > { %v6079_v48 = vpop.permute.xlu0 %1141  ;;  %v6081_v49 = vpop.permute.xlu1 %1267  ;;  %v1933_v5 = vsel %vm1924_vm6, %v1900_v31, %v6062_v34  ;;  %v6350_v31 = vld [vmem:[#allocation2 + $0x10a] sm:$0xff] }
 0x118   : > { %v1966_v23 = vsel %vm1957_vm7, %v1933_v5, %v6081_v49  ;;  %v6283_v49 = vld [vmem:[#allocation2 + $0xf8] sm:$0xff]  ;;  %v1934_v36 = vsel %vm1924_vm6, %v1901_v47, %v6079_v48 }
 0x119   : > { %1409 = vrot.lane.b32.xlu0 %v816_v32, %s5475_s13  ;;  %1535 = vrot.lane.b32.xlu1 %v6075_v45, %s5476_s14 }
 0x11b   : > { %v6090_v53 = vpop.permute.xlu0 %1649  ;;  %v1776_v51 = vpop.permute.xlu1 %1775 }
 0x11c   : > { %v2096_v55 = vsel %vm2089_vm11, %v2063_v41, %v1776_v51  ;;  %v2064_v62 = vsel %vm2056_vm10, %v2031_v50, %v6090_v53  ;;  %v510_v50 = vld [vmem:[%s5681_s26 + $0xe8] sm:$0xff] }
 0x11d   : > { %1029 = vrot.lane.b32.xlu0 %v816_v32, %s5471_s27  ;;  %1155 = vrot.lane.b32.xlu1 %v6075_v45, %s5473_s29  ;;  %543 = vst.msk [vmem:[#allocation2 + $0x171] sm:$0xff] %vm425_vm0, %v510_v50  ;;  %v6418_v50 = vld [vmem:[#allocation2 + $0x121] sm:$0xff] }
 0x11e   : > { %5233 = vmatprep.mubr.msk.f32.mxu0 %vm2133_vm12, %v2096_v55 }
 0x11f   : > { %v6214_v4 = vpop.permute.xlu0 %887  ;;  %v1270_v7 = vpop.permute.xlu1 %1269 }
 0x120   : > { %v1967_v46 = vsel %vm1957_vm7, %v1934_v36, %v1270_v7 }
 0x121   : > { %1537 = vrot.lane.b32.xlu0 %v6210_v40, %s5476_s14  ;;  %1663 = vrot.lane.b32.xlu1 %v785_v61, %s5477_s25 }
 0x123   : > { %v1396_v57 = vpop.permute.xlu0 %1395  ;;  %v1778_v8 = vpop.permute.xlu1 %1777 }
 0x124   : > { %v2097_v3 = vsel %vm2089_vm11, %v2064_v62, %v1778_v8  ;;  %v1999_v44 = vsel %vm1990_vm8, %v1966_v23, %v1396_v57  ;;  %v820_v62 = vld [vmem:[#allocation2 + $0xfa] sm:$0xff] }
 0x125   : > { %1157 = vrot.lane.b32.xlu0 %v6210_v40, %s5473_s29  ;;  %1283 = vrot.lane.b32.xlu1 %v785_v61, %s5474_s30 }
 0x126   : > { %5234 = vmatmul.mubr.msk.f32.gmra.mrb[6].mxu0 %vm2133_vm12, %v2097_v3  ;;  %v6321_v3 = vld [vmem:[#allocation2 + $0x108] sm:$0xff] }
 0x127   : > { %v6232_v18 = vpop.permute.xlu0 %889  ;;  %v6234_v16 = vpop.permute.xlu1 %1015 }
 0x129   : > { %1665 = vrot.lane.b32.xlu0 %v786_v9, %s5477_s25  ;;  %1791 = vrot.lane.b32.xlu1 %v817_v13, %s5479_s15 }
 0x12b   : > { %v1398_v6 = vpop.permute.xlu0 %1397  ;;  %v1524_v27 = vpop.permute.xlu1 %1523 }
 0x12c   : > { %v2032_v63 = vsel %vm2023_vm9, %v1999_v44, %v1524_v27  ;;  %v2000_v28 = vsel %vm1990_vm8, %v1967_v46, %v1398_v6  ;;  %v1869_v27 = vsel %vm425_vm0, %v5819_v54, %v6214_v4 }
 0x12d   : > { %903 = vrot.lane.b32.xlu0 %v785_v61, %s5472_s28  ;;  %1285 = vrot.lane.b32.xlu1 %v786_v9, %s5474_s30  ;;  %v1902_v56 = vsel %vm1891_vm5, %v1869_v27, %v6234_v16 }
 0x12f   : > { %v6244_v21 = vpop.permute.xlu0 %1017  ;;  %v6246_v14 = vpop.permute.xlu1 %1143 }
 0x131   : > { %1411 = vrot.lane.b32.xlu0 %v817_v13, %s5475_s13  ;;  %1793 = vrot.lane.b32.xlu1 %v818_v19, %s5479_s15 }
 0x133   : > { %v1526_v11 = vpop.permute.xlu0 %1525  ;;  %v1652_v25 = vpop.permute.xlu1 %1651 }
 0x134   : > { %v2065_v29 = vsel %vm2056_vm10, %v2032_v63, %v1652_v25  ;;  %v2033_v33 = vsel %vm2023_vm9, %v2000_v28, %v1526_v11  ;;  %v1935_v11 = vsel %vm1924_vm6, %v1902_v56, %v6246_v14  ;;  %v6433_v56 = vld [vmem:[#allocation2 + $0x122] sm:$0xff] }
 0x135   : > { %905 = vrot.lane.b32.xlu0 %v786_v9, %s5472_s28  ;;  %1031 = vrot.lane.b32.xlu1 %v817_v13, %s5471_s27  ;;  %v6323_v9 = vld [vmem:[#allocation2 + $0x110] sm:$0xff] }
 0x137   : > { %v6261_v10 = vpop.permute.xlu0 %1145  ;;  %v6263_v32 = vpop.permute.xlu1 %1271 }
 0x138   : > { %v1968_v54 = vsel %vm1957_vm7, %v1935_v11, %v6263_v32  ;;  %v1870_v32 = vsel %vm425_vm0, %v5835_v60, %v6232_v18 }
 0x139   : > { %1413 = vrot.lane.b32.xlu0 %v818_v19, %s5475_s13  ;;  %1539 = vrot.lane.b32.xlu1 %v6257_v15, %s5476_s14  ;;  %v1903_v63 = vsel %vm1891_vm5, %v1870_v32, %v6244_v21 }
 0x13b   : > { %v1654_v35 = vpop.permute.xlu0 %1653  ;;  %v1780_v34 = vpop.permute.xlu1 %1779 }
 0x13c   : > { %v2098_v37 = vsel %vm2089_vm11, %v2065_v29, %v1780_v34  ;;  %v2066_v53 = vsel %vm2056_vm10, %v2033_v33, %v1654_v35  ;;  %v6363_v29 = vld [vmem:[#allocation2 + $0x112] sm:$0xff]  ;;  %v1936_v35 = vsel %vm1924_vm6, %v1903_v63, %v6261_v10 }
 0x13d   : > { %1033 = vrot.lane.b32.xlu0 %v818_v19, %s5471_s27  ;;  %1159 = vrot.lane.b32.xlu1 %v6257_v15, %s5473_s29  ;;  %v6336_v19 = vld [vmem:[#allocation2 + $0x111] sm:$0xff] }
 0x13e   : > { %5236 = vmatprep.mubr.msk.f32.mxu0 %vm2133_vm12, %v2098_v37  ;;  %v511_v33 = vld [vmem:[%s5681_s26 + $0xf0] sm:$0xff] }
 0x13f   : > { %v6287_v30 = vpop.permute.xlu0 %891  ;;  %v6289_v41 = vpop.permute.xlu1 %1273  ;;  %544 = vst.msk [vmem:[#allocation2 + $0x181] sm:$0xff] %vm425_vm0, %v511_v33 }
 0x140   : > { %v1969_v60 = vsel %vm1957_vm7, %v1936_v35, %v6289_v41 }
 0x141   : > { %1541 = vrot.lane.b32.xlu0 %v6283_v49, %s5476_s14  ;;  %1667 = vrot.lane.b32.xlu1 %v787_v52, %s5477_s25 }
 0x143   : > { %v1400_v51 = vpop.permute.xlu0 %1399  ;;  %v1782_v48 = vpop.permute.xlu1 %1781 }
 0x144   : > { %v2099_v55 = vsel %vm2089_vm11, %v2066_v53, %v1782_v48  ;;  %v2001_v4 = vsel %vm1990_vm8, %v1968_v54, %v1400_v51  ;;  %v512_v53 = vld [vmem:[%s5681_s26 + $0xf8] sm:$0xff] }
 0x145   : > { %1161 = vrot.lane.b32.xlu0 %v6283_v49, %s5473_s29  ;;  %1287 = vrot.lane.b32.xlu1 %v787_v52, %s5474_s30  ;;  %545 = vst.msk [vmem:[#allocation2 + $0x189] sm:$0xff] %vm425_vm0, %v512_v53 }
 0x146   : > { %5237 = vmatmul.mubr.msk.f32.gmra.mrb[8].mxu0 %vm2133_vm12, %v2099_v55  ;;  %v6405_v55 = vld [vmem:[#allocation2 + $0x120] sm:$0xff] }
 0x147   : > { %v6303_v61 = vpop.permute.xlu0 %893  ;;  %v6305_v1 = vpop.permute.xlu1 %1019 }
 0x149   : > { %1669 = vrot.lane.b32.xlu0 %v788_v58, %s5477_s25  ;;  %1795 = vrot.lane.b32.xlu1 %v819_v38, %s5479_s15 }
 0x14b   : > { %v1402_v7 = vpop.permute.xlu0 %1401  ;;  %v1528_v22 = vpop.permute.xlu1 %1527 }
 0x14c   : > { %v2034_v16 = vsel %vm2023_vm9, %v2001_v4, %v1528_v22  ;;  %v2002_v18 = vsel %vm1990_vm8, %v1969_v60, %v1402_v7  ;;  %v1871_v22 = vsel %vm425_vm0, %v5867_v20, %v6287_v30 }
 0x14d   : > { %1289 = vrot.lane.b32.xlu0 %v788_v58, %s5474_s30  ;;  %1415 = vrot.lane.b32.xlu1 %v819_v38, %s5475_s13  ;;  %v1904_v42 = vsel %vm1891_vm5, %v1871_v22, %v6305_v1 }
 0x14f   : > { %v6315_v57 = vpop.permute.xlu0 %1021  ;;  %v6317_v8 = vpop.permute.xlu1 %1147 }
 0x151   : > { %1797 = vrot.lane.b32.xlu0 %v820_v62, %s5479_s15  ;;  %1417 = vrot.lane.b32.xlu1 %v820_v62, %s5475_s13 }
 0x153   : > { %v1530_v13 = vpop.permute.xlu0 %1529  ;;  %v1656_v6 = vpop.permute.xlu1 %1655 }
 0x154   : > { %v2067_v14 = vsel %vm2056_vm10, %v2034_v16, %v1656_v6  ;;  %v2035_v21 = vsel %vm2023_vm9, %v2002_v18, %v1530_v13  ;;  %v1937_v13 = vsel %vm1924_vm6, %v1904_v42, %v6317_v8  ;;  %v6489_v18 = vld [vmem:[#allocation2 + $0x138] sm:$0xff] }
 0x155   : > { %1543 = vrot.lane.b32.xlu0 %v6321_v3, %s5476_s14  ;;  %1545 = vrot.lane.b32.xlu1 %v6323_v9, %s5476_s14 }
 0x157   : > { %v6340_v25 = vpop.permute.xlu0 %1149  ;;  %v1276_v24 = vpop.permute.xlu1 %1275 }
 0x158   : > { %v1970_v20 = vsel %vm1957_vm7, %v1937_v13, %v1276_v24  ;;  %v1872_v24 = vsel %vm425_vm0, %v5892_v39, %v6303_v61  ;;  %v6525_v13 = vld [vmem:[#allocation2 + $0x13a] sm:$0xff] }
 0x159   : > { %1671 = vrot.lane.b32.xlu0 %v6334_v2, %s5477_s25  ;;  %1673 = vrot.lane.b32.xlu1 %v6336_v19, %s5477_s25  ;;  %v1905_v16 = vsel %vm1891_vm5, %v1872_v24, %v6315_v57 }
 0x15b   : > { %v1658_v5 = vpop.permute.xlu0 %1657  ;;  %v1784_v23 = vpop.permute.xlu1 %1783 }
 0x15c   : > { %v2100_v44 = vsel %vm2089_vm11, %v2067_v14, %v1784_v23  ;;  %v2068_v43 = vsel %vm2056_vm10, %v2035_v21, %v1658_v5  ;;  %v6447_v14 = vld [vmem:[#allocation2 + $0x12a] sm:$0xff]  ;;  %v1938_v5 = vsel %vm1924_vm6, %v1905_v16, %v6340_v25  ;;  %v6491_v21 = vld [vmem:[#allocation2 + $0x140] sm:$0xff] }
 0x15d   : > { %1799 = vrot.lane.b32.xlu0 %v6350_v31, %s5479_s15  ;;  %907 = vrot.lane.b32.xlu1 %v787_v52, %s5472_s28  ;;  %v6541_v16 = vld [vmem:[#allocation2 + $0x142] sm:$0xff] }
 0x15e   : > { %5239 = vmatprep.mubr.msk.f32.mxu0 %vm2133_vm12, %v2100_v44 }
 0x15f   : > { %v6367_v34 = vpop.permute.xlu0 %895  ;;  %v1278_v37 = vpop.permute.xlu1 %1277 }
 0x160   : > { %v1971_v39 = vsel %vm1957_vm7, %v1938_v5, %v1278_v37 }
 0x161   : > { %1801 = vrot.lane.b32.xlu0 %v6363_v29, %s5479_s15  ;;  %909 = vrot.lane.b32.xlu1 %v788_v58, %s5472_s28  ;;  %v6407_v58 = vld [vmem:[#allocation2 + $0x128] sm:$0xff] }
 0x163   : > { %v1404_v10 = vpop.permute.xlu0 %1403  ;;  %v1786_v47 = vpop.permute.xlu1 %1785 }
 0x164   : > { %v2101_v52 = vsel %vm2089_vm11, %v2068_v43, %v1786_v47  ;;  %v2003_v30 = vsel %vm1990_vm8, %v1970_v20, %v1404_v10  ;;  %v1873_v47 = vsel %vm425_vm0, %v5936_v12, %v6367_v34  ;;  %v6515_v12 = vld [vmem:[%s8124_s2] ss:$0 sm:$0xff] }
 0x165   : > { %1035 = vrot.lane.b32.xlu0 %v819_v38, %s5471_s27  ;;  %1037 = vrot.lane.b32.xlu1 %v820_v62, %s5471_s27  ;;  %v6420_v62 = vld [vmem:[#allocation2 + $0x129] sm:$0xff] }
 0x166   : > { %5240 = vmatmul.mubr.msk.f32.gmra.mrb[10].mxu0 %vm2133_vm12, %v2101_v52 }
 0x167   : > { %v6381_v36 = vpop.permute.xlu0 %897  ;;  %v6383_v41 = vpop.permute.xlu1 %1023 }
 0x168   : > { %v1906_v52 = vsel %vm1891_vm5, %v1873_v47, %v6383_v41 }
 0x169   : > { %1163 = vrot.lane.b32.xlu0 %v6321_v3, %s5473_s29  ;;  %1165 = vrot.lane.b32.xlu1 %v6323_v9, %s5473_s29 }
 0x16b   : > { %v1406_v46 = vpop.permute.xlu0 %1405  ;;  %v1532_v28 = vpop.permute.xlu1 %1531 }
 0x16c   : > { %v2036_v1 = vsel %vm2023_vm9, %v2003_v30, %v1532_v28  ;;  %v2004_v61 = vsel %vm1990_vm8, %v1971_v39, %v1406_v46  ;;  %v6502_v46 = vld [vmem:[#allocation2 + $0x139] sm:$0xff]  ;;  %v6504_v28 = vld [vmem:[#allocation2 + $0x141] sm:$0xff] }
 0x16d   : > { %1291 = vrot.lane.b32.xlu0 %v6334_v2, %s5474_s30  ;;  %1293 = vrot.lane.b32.xlu1 %v6336_v19, %s5474_s30 }
 0x16f   : > { %v6397_v51 = vpop.permute.xlu0 %1025  ;;  %v6399_v48 = vpop.permute.xlu1 %1151 }
 0x170   : > { %v1939_v33 = vsel %vm1924_vm6, %v1906_v52, %v6399_v48  ;;  %v6596_v52 = vld [vmem:[#allocation2 + $0x151] sm:$0xff] }
 0x171   : > { %1419 = vrot.lane.b32.xlu0 %v6350_v31, %s5475_s13  ;;  %1421 = vrot.lane.b32.xlu1 %v6363_v29, %s5475_s13 }
 0x173   : > { %v1534_v38 = vpop.permute.xlu0 %1533  ;;  %v1660_v7 = vpop.permute.xlu1 %1659 }
 0x174   : > { %v2069_v11 = vsel %vm2056_vm10, %v2036_v1, %v1660_v7  ;;  %v2037_v57 = vsel %vm2023_vm9, %v2004_v61, %v1534_v38 }
 0x175   : > { %1547 = vrot.lane.b32.xlu0 %v6405_v55, %s5476_s14  ;;  %1549 = vrot.lane.b32.xlu1 %v6407_v58, %s5476_s14 }
 0x177   : > { %v6424_v6 = vpop.permute.xlu0 %1153  ;;  %v1280_v27 = vpop.permute.xlu1 %1279 }
 0x178   : > { %v1972_v34 = vsel %vm1957_vm7, %v1939_v33, %v1280_v27  ;;  %v6598_v33 = vld [vmem:[#allocation2 + $0x159] sm:$0xff] }
 0x179   : > { %1675 = vrot.lane.b32.xlu0 %v6418_v50, %s5477_s25  ;;  %1677 = vrot.lane.b32.xlu1 %v6420_v62, %s5477_s25 }
 0x17b   : > { %v1662_v8 = vpop.permute.xlu0 %1661  ;;  %v1788_v54 = vpop.permute.xlu1 %1787 }
 0x17c   : > { %v2102_v4 = vsel %vm2089_vm11, %v2069_v11, %v1788_v54  ;;  %v1874_v54 = vsel %vm425_vm0, %v5960_v26, %v6381_v36 }
 0x17d   : > { %1803 = vrot.lane.b32.xlu0 %v6433_v56, %s5479_s15  ;;  %911 = vrot.lane.b32.xlu1 %v6334_v2, %s5472_s28  ;;  %v2070_v2 = vsel %vm2056_vm10, %v2037_v57, %v1662_v8  ;;  %v1907_v24 = vsel %vm1891_vm5, %v1874_v54, %v6397_v51 }
 0x17e   : > { %5242 = vmatprep.mubr.msk.f32.mxu0 %vm2133_vm12, %v2102_v4  ;;  %v1940_v5 = vsel %vm1924_vm6, %v1907_v24, %v6424_v6  ;;  %v6627_v24 = vld [vmem:[#allocation2 + $0x15a] sm:$0xff] }
 0x17f   : > { %v6451_v23 = vpop.permute.xlu0 %899  ;;  %v6453_v44 = vpop.permute.xlu1 %1281 }
 0x181   : > { %1805 = vrot.lane.b32.xlu0 %v6447_v14, %s5479_s15  ;;  %913 = vrot.lane.b32.xlu1 %v6336_v19, %s5472_s28 }
 0x183   : > { %v1408_v32 = vpop.permute.xlu0 %1407  ;;  %v1790_v25 = vpop.permute.xlu1 %1789 }
 0x184   : > { %v2103_v63 = vsel %vm2089_vm11, %v2070_v2, %v1790_v25  ;;  %v2005_v41 = vsel %vm1990_vm8, %v1972_v34, %v1408_v32 }
 0x185   : > { %1039 = vrot.lane.b32.xlu0 %v6350_v31, %s5471_s27  ;;  %1041 = vrot.lane.b32.xlu1 %v6363_v29, %s5471_s27 }
 0x186   : > { %5243 = vmatmul.mubr.msk.f32.gmra.mrb[12].mxu0 %vm2133_vm12, %v2103_v63  ;;  %v6583_v63 = vld [vmem:[#allocation2 + $0x150] sm:$0xff] }
 0x187   : > { %v6469_v35 = vpop.permute.xlu0 %901  ;;  %v6471_v37 = vpop.permute.xlu1 %1027 }
 0x189   : > { %1167 = vrot.lane.b32.xlu0 %v6405_v55, %s5473_s29  ;;  %1169 = vrot.lane.b32.xlu1 %v6407_v58, %s5473_s29 }
 0x18b   : > { %v1410_v19 = vpop.permute.xlu0 %1409  ;;  %v1536_v60 = vpop.permute.xlu1 %1535 }
 0x18c   : > { %v2038_v48 = vsel %vm2023_vm9, %v2005_v41, %v1536_v60 }
 0x18d   : > { %1295 = vrot.lane.b32.xlu0 %v6418_v50, %s5474_s30  ;;  %1297 = vrot.lane.b32.xlu1 %v6420_v62, %s5474_s30 }
 0x18f   : > { %v6481_v31 = vpop.permute.xlu0 %1029  ;;  %v6483_v29 = vpop.permute.xlu1 %1155 }
 0x191   : > { %1423 = vrot.lane.b32.xlu0 %v6433_v56, %s5475_s13  ;;  %1425 = vrot.lane.b32.xlu1 %v6447_v14, %s5475_s13 }
 0x193   : > { %v1538_v43 = vpop.permute.xlu0 %1537  ;;  %v1664_v10 = vpop.permute.xlu1 %1663 }
 0x194   : > { %v2071_v20 = vsel %vm2056_vm10, %v2038_v48, %v1664_v10  ;;  %v1875_v10 = vsel %vm425_vm0, %v6003_v59, %v6451_v23 }
 0x195   : > { %1551 = vrot.lane.b32.xlu0 %v6489_v18, %s5476_s14  ;;  %1553 = vrot.lane.b32.xlu1 %v6491_v21, %s5476_s14  ;;  %v1908_v47 = vsel %vm1891_vm5, %v1875_v10, %v6471_v37 }
 0x196   : > { %v1941_v34 = vsel %vm1924_vm6, %v1908_v47, %v6483_v29  ;;  %v6611_v29 = vld [vmem:[#allocation2 + $0x152] sm:$0xff] }
 0x197   : > { %v6508_v53 = vpop.permute.xlu0 %1157  ;;  %v6510_v38 = vpop.permute.xlu1 %1283 }
 0x198   : > { %v1974_v59 = vsel %vm1957_vm7, %v1941_v34, %v6510_v38  ;;  %v6680_v34 = vld [vmem:[#allocation2 + $0x168] sm:$0xff] }
 0x199   : > { %v5226_v7 = vpop.f32.mrb[0].mxu0  ;;  %1679 = vrot.lane.b32.xlu0 %v6502_v46, %s5477_s25  ;;  %1681 = vrot.lane.b32.xlu1 %v6504_v28, %s5477_s25 }
 0x19a   : > { %v2306_v22 = vadd.f32 %v5226_v7, %v6515_v12  ;;  %v2300_v42 = vpop.f32.mrb[1].mxu0 }
 0x19b   : > { %v2301_v27 = vadd.f32 %v6515_v12, %v2300_v42  ;;  %v1666_v30 = vpop.permute.xlu0 %1665  ;;  %v1792_v1 = vpop.permute.xlu1 %1791 }
 0x19c   : > { %v2460_v11 = vmax.f32 %v2306_v22, 0.0  ;;  %v2104_v8 = vsel %vm2089_vm11, %v2071_v20, %v1792_v1 }
 0x19d   : > { %v2459_v4 = vmax.f32 %v2301_v27, 0.0  ;;  %1807 = vrot.lane.b32.xlu0 %v6525_v13, %s5479_s15  ;;  %915 = vrot.lane.b32.xlu1 %v6418_v50, %s5472_s28  ;;  %v1973_v50 = vsel %vm1957_vm7, %v1940_v5, %v6453_v44 }
 0x19e   : > { %2549 = vst.msk [vmem:[#allocation3 + $0x21] sm:$0xff] %vm2491_vm13, %v2460_v11  ;;  %5245 = vmatprep.mubr.msk.f32.mxu0 %vm2133_vm12, %v2104_v8  ;;  %v2006_v51 = vsel %vm1990_vm8, %v1973_v50, %v1410_v19  ;;  %v6585_v19 = vld [vmem:[#allocation2 + $0x158] sm:$0xff]  ;;  %v1876_v8 = vsel %vm425_vm0, %v6026_v17, %v6469_v35 }
 0x19f   : > { %2548 = vst.msk [vmem:[#allocation3 + $0x19] sm:$0xff] %vm2491_vm13, %v2459_v4  ;;  %v6546_v26 = vpop.permute.xlu0 %903  ;;  %v6548_v36 = vpop.permute.xlu1 %1285  ;;  %v2039_v39 = vsel %vm2023_vm9, %v2006_v51, %v1538_v43  ;;  %v1909_v4 = vsel %vm1891_vm5, %v1876_v8, %v6481_v31 }
 0x1a0   : > { %v2072_v6 = vsel %vm2056_vm10, %v2039_v39, %v1666_v30  ;;  %v1942_v5 = vsel %vm1924_vm6, %v1909_v4, %v6508_v53 }
 0x1a1   : > { %1809 = vrot.lane.b32.xlu0 %v6541_v16, %s5479_s15  ;;  %917 = vrot.lane.b32.xlu1 %v6420_v62, %s5472_s28  ;;  %v1975_v50 = vsel %vm1957_vm7, %v1942_v5, %v6548_v36 }
 0x1a3   : > { %v1412_v61 = vpop.permute.xlu0 %1411  ;;  %v1794_v57 = vpop.permute.xlu1 %1793 }
 0x1a4   : > { %v2105_v2 = vsel %vm2089_vm11, %v2072_v6, %v1794_v57  ;;  %v2007_v23 = vsel %vm1990_vm8, %v1974_v59, %v1412_v61 }
 0x1a5   : > { %1043 = vrot.lane.b32.xlu0 %v6433_v56, %s5471_s27  ;;  %1045 = vrot.lane.b32.xlu1 %v6447_v14, %s5471_s27 }
 0x1a6   : > { %5246 = vmatmul.mubr.msk.f32.gmra.mrb[14].mxu0 %vm2133_vm12, %v2105_v2 }
 0x1a7   : > { %v6565_v44 = vpop.permute.xlu0 %905  ;;  %v6567_v32 = vpop.permute.xlu1 %1031 }
 0x1a9   : > { %1171 = vrot.lane.b32.xlu0 %v6489_v18, %s5473_s29  ;;  %1173 = vrot.lane.b32.xlu1 %v6491_v21, %s5473_s29 }
 0x1ab   : > { %v1414_v62 = vpop.permute.xlu0 %1413  ;;  %v1540_v25 = vpop.permute.xlu1 %1539 }
 0x1ac   : > { %v2040_v37 = vsel %vm2023_vm9, %v2007_v23, %v1540_v25  ;;  %v1878_v25 = vsel %vm425_vm0, %v6210_v40, %v6565_v44 }
 0x1ad   : > { %1299 = vrot.lane.b32.xlu0 %v6502_v46, %s5474_s30  ;;  %1301 = vrot.lane.b32.xlu1 %v6504_v28, %s5474_s30 }
 0x1af   : > { %v6577_v56 = vpop.permute.xlu0 %1033  ;;  %v1160_v14 = vpop.permute.xlu1 %1159 }
 0x1b1   : > { %1427 = vrot.lane.b32.xlu0 %v6525_v13, %s5475_s13  ;;  %1429 = vrot.lane.b32.xlu1 %v6541_v16, %s5475_s13 }
 0x1b3   : > { %v1542_v60 = vpop.permute.xlu0 %1541  ;;  %v1668_v43 = vpop.permute.xlu1 %1667 }
 0x1b4   : > { %v2073_v20 = vsel %vm2056_vm10, %v2040_v37, %v1668_v43  ;;  %v6691_v37 = vld [vmem:[#allocation2 + $0x169] sm:$0xff] }
 0x1b5   : > { %1555 = vrot.lane.b32.xlu0 %v6583_v63, %s5476_s14  ;;  %1557 = vrot.lane.b32.xlu1 %v6585_v19, %s5476_s14 }
 0x1b7   : > { %v1162_v41 = vpop.permute.xlu0 %1161  ;;  %v1288_v7 = vpop.permute.xlu1 %1287 }
 0x1b9   : > { %v5229_v48 = vpop.f32.mrb[2].mxu0  ;;  %1683 = vrot.lane.b32.xlu0 %v6596_v52, %s5477_s25  ;;  %1685 = vrot.lane.b32.xlu1 %v6598_v33, %s5477_s25 }
 0x1ba   : > { %v2316_v22 = vadd.f32 %v5229_v48, %v6515_v12  ;;  %v2310_v42 = vpop.f32.mrb[3].mxu0 }
 0x1bb   : > { %v2311_v38 = vadd.f32 %v6515_v12, %v2310_v42  ;;  %v1670_v27 = vpop.permute.xlu0 %1669  ;;  %v1796_v30 = vpop.permute.xlu1 %1795 }
 0x1bc   : > { %v2462_v1 = vmax.f32 %v2316_v22, 0.0  ;;  %v2106_v11 = vsel %vm2089_vm11, %v2073_v20, %v1796_v30  ;;  %v6693_v22 = vld [vmem:[#allocation2 + $0x171] sm:$0xff] }
 0x1bd   : > { %v2461_v54 = vmax.f32 %v2311_v38, 0.0  ;;  %1811 = vrot.lane.b32.xlu0 %v6611_v29, %s5479_s15  ;;  %919 = vrot.lane.b32.xlu1 %v6502_v46, %s5472_s28  ;;  %v2008_v46 = vsel %vm1990_vm8, %v1975_v50, %v1414_v62 }
 0x1be   : > { %2551 = vst.msk [vmem:[#allocation3 + $0x39] sm:$0xff] %vm2491_vm13, %v2462_v1  ;;  %5248 = vmatprep.mubr.msk.f32.mxu0 %vm2133_vm12, %v2106_v11  ;;  %v2041_v31 = vsel %vm2023_vm9, %v2008_v46, %v1542_v60  ;;  %v6700_v1 = vld [vmem:[#allocation2 + $0x16a] sm:$0xff] }
 0x1bf   : > { %2550 = vst.msk [vmem:[#allocation3 + $0x31] sm:$0xff] %vm2491_vm13, %v2461_v54  ;;  %v1290_v17 = vpop.permute.xlu0 %1289  ;;  %v1416_v35 = vpop.permute.xlu1 %1415  ;;  %v2074_v51 = vsel %vm2056_vm10, %v2041_v31, %v1670_v27 }
 0x1c1   : > { %1813 = vrot.lane.b32.xlu0 %v6627_v24, %s5479_s15  ;;  %921 = vrot.lane.b32.xlu1 %v6504_v28, %s5472_s28  ;;  %v1877_v28 = vsel %vm425_vm0, %v6075_v45, %v6546_v26  ;;  %v1911_v26 = vsel %vm1891_vm5, %v1878_v25, %v6577_v56 }
 0x1c3   : > { %v1798_v53 = vpop.permute.xlu0 %1797  ;;  %v1418_v39 = vpop.permute.xlu1 %1417 }
 0x1c4   : > { %v2107_v6 = vsel %vm2089_vm11, %v2074_v51, %v1798_v53 }
 0x1c5   : > { %1047 = vrot.lane.b32.xlu0 %v6525_v13, %s5471_s27  ;;  %1049 = vrot.lane.b32.xlu1 %v6541_v16, %s5471_s27  ;;  %v1910_v13 = vsel %vm1891_vm5, %v1877_v28, %v6567_v32 }
 0x1c6   : > { %5249 = vmatmul.mubr.msk.f32.gmra.mrb[16].mxu0 %vm2133_vm12, %v2107_v6  ;;  %v1943_v57 = vsel %vm1924_vm6, %v1910_v13, %v1160_v14  ;;  %v1944_v14 = vsel %vm1924_vm6, %v1911_v26, %v1162_v41  ;;  %v6682_v41 = vld [vmem:[#allocation2 + $0x170] sm:$0xff]  ;;  %v767_v26 = vld [vmem:[#allocation2 + $0x180] sm:$0xff] }
 0x1c7   : > { %v1544_v36 = vpop.permute.xlu0 %1543  ;;  %v1546_v61 = vpop.permute.xlu1 %1545  ;;  %v1976_v62 = vsel %vm1957_vm7, %v1943_v57, %v1288_v7  ;;  %v1977_v40 = vsel %vm1957_vm7, %v1944_v14, %v1290_v17  ;;  %v6708_v17 = vld [vmem:[#allocation2 + $0x172] sm:$0xff] }
 0x1c8   : > { %v2009_v45 = vsel %vm1990_vm8, %v1976_v62, %v1416_v35  ;;  %v2010_v47 = vsel %vm1990_vm8, %v1977_v40, %v1418_v39  ;;  %v799_v40 = vld [vmem:[#allocation2 + $0x181] sm:$0xff] }
 0x1c9   : > { %1175 = vrot.lane.b32.xlu0 %v6583_v63, %s5473_s29  ;;  %1177 = vrot.lane.b32.xlu1 %v6585_v19, %s5473_s29  ;;  %v2042_v32 = vsel %vm2023_vm9, %v2009_v45, %v1544_v36  ;;  %v2043_v56 = vsel %vm2023_vm9, %v2010_v47, %v1546_v61 }
 0x1cb   : > { %v1672_v16 = vpop.permute.xlu0 %1671  ;;  %v1674_v2 = vpop.permute.xlu1 %1673 }
 0x1cc   : > { %v2075_v60 = vsel %vm2056_vm10, %v2042_v32, %v1672_v16  ;;  %v2076_v7 = vsel %vm2056_vm10, %v2043_v56, %v1674_v2  ;;  %v768_v32 = vld [vmem:[#allocation2 + $0x188] sm:$0xff] }
 0x1cd   : > { %1303 = vrot.lane.b32.xlu0 %v6596_v52, %s5474_s30  ;;  %1305 = vrot.lane.b32.xlu1 %v6598_v33, %s5474_s30 }
 0x1cf   : > { %v1800_v43 = vpop.permute.xlu0 %1799  ;;  %v908_v10 = vpop.permute.xlu1 %907 }
 0x1d0   : > { %v2108_v44 = vsel %vm2089_vm11, %v2075_v60, %v1800_v43  ;;  %v1879_v53 = vsel %vm425_vm0, %v6257_v15, %v908_v10 }
 0x1d1   : > { %1431 = vrot.lane.b32.xlu0 %v6611_v29, %s5475_s13  ;;  %1433 = vrot.lane.b32.xlu1 %v6627_v24, %s5475_s13 }
 0x1d2   : > { %5251 = vmatprep.mubr.msk.f32.mxu0 %vm2133_vm12, %v2108_v44  ;;  %v800_v44 = vld [vmem:[#allocation2 + $0x189] sm:$0xff] }
 0x1d3   : > { %v1802_v59 = vpop.permute.xlu0 %1801  ;;  %v910_v23 = vpop.permute.xlu1 %909 }
 0x1d4   : > { %v2109_v48 = vsel %vm2089_vm11, %v2076_v7, %v1802_v59 }
 0x1d5   : > { %1559 = vrot.lane.b32.xlu0 %v6680_v34, %s5476_s14  ;;  %1561 = vrot.lane.b32.xlu1 %v6682_v41, %s5476_s14 }
 0x1d6   : > { %5252 = vmatmul.mubr.msk.f32.gmra.mrb[18].mxu0 %vm2133_vm12, %v2109_v48  ;;  %v831_v48 = vld [vmem:[#allocation2 + $0x182] sm:$0xff] }
 0x1d7   : > { %v1036_v42 = vpop.permute.xlu0 %1035  ;;  %v1038_v20 = vpop.permute.xlu1 %1037 }
 0x1d9   : > { %v5232_v38 = vpop.f32.mrb[4].mxu0  ;;  %1687 = vrot.lane.b32.xlu0 %v6691_v37, %s5477_s25  ;;  %1689 = vrot.lane.b32.xlu1 %v6693_v22, %s5477_s25 }
 0x1da   : > { %v2326_v27 = vadd.f32 %v5232_v38, %v6515_v12  ;;  %v2320_v30 = vpop.f32.mrb[5].mxu0 }
 0x1db   : > { %v2321_v11 = vadd.f32 %v6515_v12, %v2320_v30  ;;  %v1164_v8 = vpop.permute.xlu0 %1163  ;;  %v1166_v54 = vpop.permute.xlu1 %1165 }
 0x1dc   : > { %v2464_v4 = vmax.f32 %v2326_v27, 0.0 }
 0x1dd   : > { %v2463_v5 = vmax.f32 %v2321_v11, 0.0  ;;  %1815 = vrot.lane.b32.xlu0 %v6700_v1, %s5479_s15  ;;  %923 = vrot.lane.b32.xlu1 %v6596_v52, %s5472_s28  ;;  %v832_v11 = vld [vmem:[#allocation2 + $0x18a] sm:$0xff] }
 0x1de   : > { %2553 = vst.msk [vmem:[#allocation3 + $0x51] sm:$0xff] %vm2491_vm13, %v2464_v4 }
 0x1df   : > { %2552 = vst.msk [vmem:[#allocation3 + $0x49] sm:$0xff] %vm2491_vm13, %v2463_v5  ;;  %v1292_v35 = vpop.permute.xlu0 %1291  ;;  %v1294_v50 = vpop.permute.xlu1 %1293 }
 0x1e1   : > { %1817 = vrot.lane.b32.xlu0 %v6708_v17, %s5479_s15  ;;  %925 = vrot.lane.b32.xlu1 %v6598_v33, %s5472_s28  ;;  %v1912_v33 = vsel %vm1891_vm5, %v1879_v53, %v1036_v42 }
 0x1e2   : > { %v1945_v39 = vsel %vm1924_vm6, %v1912_v33, %v1164_v8 }
 0x1e3   : > { %v1420_v46 = vpop.permute.xlu0 %1419  ;;  %v1422_v31 = vpop.permute.xlu1 %1421  ;;  %v1978_v36 = vsel %vm1957_vm7, %v1945_v39, %v1292_v35 }
 0x1e4   : > { %v2011_v61 = vsel %vm1990_vm8, %v1978_v36, %v1420_v46 }
 0x1e5   : > { %1051 = vrot.lane.b32.xlu0 %v6611_v29, %s5471_s27  ;;  %1053 = vrot.lane.b32.xlu1 %v6627_v24, %s5471_s27  ;;  %v1880_v24 = vsel %vm425_vm0, %v6283_v49, %v910_v23 }
 0x1e6   : > { %v1913_v15 = vsel %vm1891_vm5, %v1880_v24, %v1038_v20 }
 0x1e7   : > { %v1548_v52 = vpop.permute.xlu0 %1547  ;;  %v1550_v51 = vpop.permute.xlu1 %1549  ;;  %v1946_v13 = vsel %vm1924_vm6, %v1913_v15, %v1166_v54  ;;  %v769_v15 = vld [vmem:[#allocation2 + $0x198] sm:$0xff] }
 0x1e8   : > { %v2044_v28 = vsel %vm2023_vm9, %v2011_v61, %v1548_v52  ;;  %v1979_v49 = vsel %vm1957_vm7, %v1946_v13, %v1294_v50 }
 0x1e9   : > { %1179 = vrot.lane.b32.xlu0 %v6680_v34, %s5473_s29  ;;  %1181 = vrot.lane.b32.xlu1 %v6682_v41, %s5473_s29  ;;  %v2012_v25 = vsel %vm1990_vm8, %v1979_v49, %v1422_v31  ;;  %v801_v49 = vld [vmem:[#allocation2 + $0x199] sm:$0xff] }
 0x1ea   : > { %v2045_v45 = vsel %vm2023_vm9, %v2012_v25, %v1550_v51 }
 0x1eb   : > { %v1676_v6 = vpop.permute.xlu0 %1675  ;;  %v1678_v29 = vpop.permute.xlu1 %1677 }
 0x1ec   : > { %v2077_v57 = vsel %vm2056_vm10, %v2044_v28, %v1676_v6  ;;  %v2078_v14 = vsel %vm2056_vm10, %v2045_v45, %v1678_v29  ;;  %v770_v28 = vld [vmem:[#allocation2 + $0x1a0] sm:$0xff] }
 0x1ed   : > { %1307 = vrot.lane.b32.xlu0 %v6691_v37, %s5474_s30  ;;  %1309 = vrot.lane.b32.xlu1 %v6693_v22, %s5474_s30 }
 0x1ef   : > { %v1804_v16 = vpop.permute.xlu0 %1803  ;;  %v912_v2 = vpop.permute.xlu1 %911 }
 0x1f0   : > { %v2110_v62 = vsel %vm2089_vm11, %v2077_v57, %v1804_v16  ;;  %v1881_v50 = vsel %vm425_vm0, %v6321_v3, %v912_v2 }
 0x1f1   : > { %1435 = vrot.lane.b32.xlu0 %v6700_v1, %s5475_s13  ;;  %1437 = vrot.lane.b32.xlu1 %v6708_v17, %s5475_s13 }
 0x1f2   : > { %5254 = vmatprep.mubr.msk.f32.mxu0 %vm2133_vm12, %v2110_v62  ;;  %v802_v62 = vld [vmem:[#allocation2 + $0x1a1] sm:$0xff] }
 0x1f3   : > { %v1806_v60 = vpop.permute.xlu0 %1805  ;;  %v914_v43 = vpop.permute.xlu1 %913 }
 0x1f4   : > { %v2111_v10 = vsel %vm2089_vm11, %v2078_v14, %v1806_v60  ;;  %v833_v60 = vld [vmem:[#allocation2 + $0x19a] sm:$0xff] }
 0x1f5   : > { %1563 = vrot.lane.b32.xlu0 %v767_v26, %s5476_s14  ;;  %1565 = vrot.lane.b32.xlu1 %v768_v32, %s5476_s14 }
 0x1f6   : > { %5255 = vmatmul.mubr.msk.f32.gmra.mrb[20].mxu0 %vm2133_vm12, %v2111_v10 }
 0x1f7   : > { %v1040_v47 = vpop.permute.xlu0 %1039  ;;  %v1042_v56 = vpop.permute.xlu1 %1041 }
 0x1f8   : > { %v1914_v46 = vsel %vm1891_vm5, %v1881_v50, %v1040_v47 }
 0x1f9   : > { %v5235_v7 = vpop.f32.mrb[6].mxu0  ;;  %1691 = vrot.lane.b32.xlu0 %v799_v40, %s5477_s25  ;;  %1693 = vrot.lane.b32.xlu1 %v800_v44, %s5477_s25 }
 0x1fa   : > { %v2336_v59 = vadd.f32 %v5235_v7, %v6515_v12  ;;  %v2330_v23 = vpop.f32.mrb[7].mxu0  ;;  %v2612_v7 = vld [vmem:[#allocation3 + $0x1] sm:$0xff] }
 0x1fb   : > { %v2331_v42 = vadd.f32 %v6515_v12, %v2330_v23  ;;  %v1168_v20 = vpop.permute.xlu0 %1167  ;;  %v1170_v38 = vpop.permute.xlu1 %1169 }
 0x1fc   : > { %v2466_v27 = vmax.f32 %v2336_v59, 0.0  ;;  %v2613_v59 = vld [vmem:[#allocation3 + $0x9] sm:$0xff] }
 0x1fd   : > { %v2465_v30 = vmax.f32 %v2331_v42, 0.0  ;;  %1819 = vrot.lane.b32.xlu0 %v831_v48, %s5479_s15  ;;  %927 = vrot.lane.b32.xlu1 %v6691_v37, %s5472_s28  ;;  %v2644_v42 = vld [vmem:[#allocation3 + $0x2] sm:$0xff] }
 0x1fe   : > { %2555 = vst.msk [vmem:[#allocation3 + $0x69] sm:$0xff] %vm2491_vm13, %v2466_v27 }
 0x1ff   : > { %2554 = vst.msk [vmem:[#allocation3 + $0x61] sm:$0xff] %vm2491_vm13, %v2465_v30  ;;  %v1296_v8 = vpop.permute.xlu0 %1295  ;;  %v1298_v54 = vpop.permute.xlu1 %1297 }
 0x201   : > { %1821 = vrot.lane.b32.xlu0 %v832_v11, %s5479_s15  ;;  %929 = vrot.lane.b32.xlu1 %v6693_v22, %s5472_s28  ;;  %v1947_v22 = vsel %vm1924_vm6, %v1914_v46, %v1168_v20  ;;  %v2645_v20 = vld [vmem:[#allocation3 + $0xa] sm:$0xff]  ;;  %s5481_s28 = smov 16  }
 0x203   : > { %v1424_v4 = vpop.permute.xlu0 %1423  ;;  %v1426_v5 = vpop.permute.xlu1 %1425 }
 0x205   : > { %1055 = vrot.lane.b32.xlu0 %v6700_v1, %s5471_s27  ;;  %1057 = vrot.lane.b32.xlu1 %v6708_v17, %s5471_s27  ;;  %v1980_v1 = vsel %vm1957_vm7, %v1947_v22, %v1296_v8  ;;  %v1882_v17 = vsel %vm425_vm0, %v6323_v9, %v914_v43  ;;  %v834_v43 = vld [vmem:[#allocation2 + $0x1a2] sm:$0xff]  ;;  %s5480_s27 = smov 8  }
 0x206   : > { %v2013_v51 = vsel %vm1990_vm8, %v1980_v1, %v1424_v4  ;;  %v1915_v3 = vsel %vm1891_vm5, %v1882_v17, %v1042_v56  ;;  %v6809_v8 = vld [vmem:[#allocation3 + $0x18] sm:$0xff] }
 0x207   : > { %v1552_v37 = vpop.permute.xlu0 %1551  ;;  %v1554_v35 = vpop.permute.xlu1 %1553  ;;  %v1948_v33 = vsel %vm1924_vm6, %v1915_v3, %v1170_v38  ;;  %v2708_v22 = vld [vmem:[#allocation3 + $0x19] sm:$0xff] }
 0x208   : > { %v2046_v53 = vsel %vm2023_vm9, %v2013_v51, %v1552_v37  ;;  %v1981_v36 = vsel %vm1957_vm7, %v1948_v33, %v1298_v54  ;;  %v6811_v54 = vld [vmem:[#allocation3 + $0x20] sm:$0xff] }
 0x209   : > { %1183 = vrot.lane.b32.xlu0 %v767_v26, %s5473_s29  ;;  %1185 = vrot.lane.b32.xlu1 %v768_v32, %s5473_s29  ;;  %v2014_v24 = vsel %vm1990_vm8, %v1981_v36, %v1426_v5  ;;  %s5482_s29 = smov 32  }
 0x20a   : > { %v2047_v61 = vsel %vm2023_vm9, %v2014_v24, %v1554_v35  ;;  %v4156_v24 = vld [vmem:[%s8125_s3 + $0x8] sm:$0xff] }
 0x20b   : > { %v1680_v31 = vpop.permute.xlu0 %1679  ;;  %v1682_v52 = vpop.permute.xlu1 %1681 }
 0x20c   : > { %v2079_v39 = vsel %vm2056_vm10, %v2046_v53, %v1680_v31  ;;  %v2080_v13 = vsel %vm2056_vm10, %v2047_v61, %v1682_v52 }
 0x20d   : > { %1311 = vrot.lane.b32.xlu0 %v799_v40, %s5474_s30  ;;  %1313 = vrot.lane.b32.xlu1 %v800_v44, %s5474_s30  ;;  %s5483_s30 = smov 40  }
 0x20f   : > { %v1808_v6 = vpop.permute.xlu0 %1807  ;;  %v916_v29 = vpop.permute.xlu1 %915 }
 0x210   : > { %v2112_v9 = vsel %vm2089_vm11, %v2079_v39, %v1808_v6  ;;  %v1883_v4 = vsel %vm425_vm0, %v6405_v55, %v916_v29  ;;  %v2709_v39 = vld [vmem:[#allocation3 + $0x21] sm:$0xff] }
 0x211   : > { %1439 = vrot.lane.b32.xlu0 %v831_v48, %s5475_s13  ;;  %1441 = vrot.lane.b32.xlu1 %v832_v11, %s5475_s13  ;;  %v2740_v6 = vld [vmem:[#allocation3 + $0x1a] sm:$0xff] }
 0x212   : > { %5257 = vmatprep.mubr.msk.f32.mxu0 %vm2133_vm12, %v2112_v9  ;;  %v4155_v9 = vld [vmem:[%s8125_s3] sm:$0xff] }
 0x213   : > { %v1810_v57 = vpop.permute.xlu0 %1809  ;;  %v918_v16 = vpop.permute.xlu1 %917 }
 0x214   : > { %v2113_v2 = vsel %vm2089_vm11, %v2080_v13, %v1810_v57  ;;  %v1884_v31 = vsel %vm425_vm0, %v6407_v58, %v918_v16  ;;  %v5355_v13 = vpack.c.bf16 %v4156_v24, %v4155_v9  ;;  %v4157_v16 = vld [vmem:[%s8125_s3 + $0x10] sm:$0xff] }
 0x215   : > { %1567 = vrot.lane.b32.xlu0 %v769_v15, %s5476_s14  ;;  %1569 = vrot.lane.b32.xlu1 %v770_v28, %s5476_s14 }
 0x216   : > { %5258 = vmatmul.mubr.msk.f32.gmra.mrb[22].mxu0 %vm2133_vm12, %v2113_v2  ;;  %5356 = vmatprep.subr.bf16.mxu1 %v5355_v13  ;;  %v4158_v2 = vld [vmem:[%s8125_s3 + $0x18] sm:$0xff] }
 0x217   : > { %v1044_v25 = vpop.permute.xlu0 %1043  ;;  %v1046_v45 = vpop.permute.xlu1 %1045  ;;  %5358 = vmatpush3.bf16.msra.mxu1 %v5355_v13 }
 0x218   : > { %v1916_v5 = vsel %vm1891_vm5, %v1883_v4, %v1044_v25  ;;  %v1917_v52 = vsel %vm1891_vm5, %v1884_v31, %v1046_v45  ;;  %v5359_v25 = vpack.c.bf16 %v4158_v2, %v4157_v16  ;;  %v2741_v45 = vld [vmem:[#allocation3 + $0x22] sm:$0xff] }
 0x219   : > { %v5238_v26 = vpop.f32.mrb[8].mxu0  ;;  %1695 = vrot.lane.b32.xlu0 %v801_v49, %s5477_s25  ;;  %1697 = vrot.lane.b32.xlu1 %v802_v62, %s5477_s25  ;;  %s5484_s25 = smov 48   ;;  %v6927_v2 = vld [vmem:[#allocation3 + $0x48] sm:$0xff] }
 0x21a   : > { %v2346_v32 = vadd.f32 %v5238_v26, %v6515_v12  ;;  %v2340_v14 = vpop.f32.mrb[9].mxu0  ;;  %v6861_v26 = vld [vmem:[#allocation3 + $0x30] sm:$0xff]  ;;  %5360 = vmatprep.subr.bf16.mxu1 %v5359_v25 }
 0x21b   : > { %v2341_v10 = vadd.f32 %v6515_v12, %v2340_v14  ;;  %v1172_v40 = vpop.permute.xlu0 %1171  ;;  %v1174_v44 = vpop.permute.xlu1 %1173  ;;  %5362 = vmatpush3.bf16.msra.mxu1 %v5359_v25 }
 0x21c   : > { %v2468_v47 = vmax.f32 %v2346_v32, 0.0  ;;  %v1949_v37 = vsel %vm1924_vm6, %v1916_v5, %v1172_v40  ;;  %v1950_v17 = vsel %vm1924_vm6, %v1917_v52, %v1174_v44 }
 0x21d   : > { %v2467_v56 = vmax.f32 %v2341_v10, 0.0  ;;  %1823 = vrot.lane.b32.xlu0 %v833_v60, %s5479_s15  ;;  %1825 = vrot.lane.b32.xlu1 %v834_v43, %s5479_s15  ;;  %v4159_v43 = vld [vmem:[%s8125_s3 + $0x20] sm:$0xff]  ;;  %v4160_v10 = vld [vmem:[%s8125_s3 + $0x28] sm:$0xff] }
 0x21e   : > { %2557 = vst.msk [vmem:[#allocation3 + $0x81] sm:$0xff] %vm2491_vm13, %v2468_v47 }
 0x21f   : > { %2556 = vst.msk [vmem:[#allocation3 + $0x79] sm:$0xff] %vm2491_vm13, %v2467_v56  ;;  %v1300_v23 = vpop.permute.xlu0 %1299  ;;  %v1302_v48 = vpop.permute.xlu1 %1301  ;;  %v5363_v56 = vpack.c.bf16 %v4160_v10, %v4159_v43 }
 0x220   : > { %v1982_v46 = vsel %vm1957_vm7, %v1949_v37, %v1300_v23  ;;  %v1983_v58 = vsel %vm1957_vm7, %v1950_v17, %v1302_v48  ;;  %v4161_v23 = vld [vmem:[%s8125_s3 + $0x30] sm:$0xff]  ;;  %v4162_v48 = vld [vmem:[%s8125_s3 + $0x38] sm:$0xff] }
 0x221   : > { %2901 = vrot.lane.b32.xlu0 %v2612_v7, %s5480_s27  ;;  %2903 = vrot.lane.b32.xlu1 %v2613_v59, %s5480_s27 }
 0x222   : > { %5364 = vmatprep.subr.bf16.mxu1 %v5363_v56 }
 0x223   : > { %v1428_v38 = vpop.permute.xlu0 %1427  ;;  %v1430_v27 = vpop.permute.xlu1 %1429  ;;  %5366 = vmatpush3.bf16.msra.mxu1 %v5363_v56 }
 0x224   : > { %v2015_v55 = vsel %vm1990_vm8, %v1982_v46, %v1428_v38  ;;  %v2016_v29 = vsel %vm1990_vm8, %v1983_v58, %v1430_v27  ;;  %v5367_v38 = vpack.c.bf16 %v4162_v48, %v4161_v23  ;;  %v6885_v27 = vld [vmem:[#allocation3 + $0x38] sm:$0xff]  ;;  %v2839_v48 = vld [vmem:[#allocation3 + $0x4a] sm:$0xff] }
 0x225   : > { %3029 = vrot.lane.b32.xlu0 %v2644_v42, %s5481_s28  ;;  %3031 = vrot.lane.b32.xlu1 %v2645_v20, %s5481_s28  ;;  %v2837_v46 = vld [vmem:[#allocation3 + $0x32] sm:$0xff] }
 0x226   : > { %5368 = vmatprep.subr.bf16.mxu1 %v5367_v38 }
 0x227   : > { %v1556_v30 = vpop.permute.xlu0 %1555  ;;  %v1558_v11 = vpop.permute.xlu1 %1557  ;;  %5370 = vmatpush3.bf16.msra.mxu1 %v5367_v38 }
 0x228   : > { %v2048_v1 = vsel %vm2023_vm9, %v2015_v55, %v1556_v30  ;;  %v2049_v36 = vsel %vm2023_vm9, %v2016_v29, %v1558_v11  ;;  %v2805_v30 = vld [vmem:[#allocation3 + $0x31] sm:$0xff] }
 0x229   : > { %3157 = vrot.lane.b32.xlu0 %v6809_v8, %s5479_s15  ;;  %3159 = vrot.lane.b32.xlu1 %v6811_v54, %s5479_s15  ;;  %v4163_v11 = vld [vmem:[%s8125_s3 + $0x40] sm:$0xff] }
 0x22a   : > { %5288 = vmatprep.subr.mxu1 %v4163_v11 }
 0x22b   : > { %v1684_v35 = vpop.permute.xlu0 %1683  ;;  %v1686_v50 = vpop.permute.xlu1 %1685  ;;  %5289 = vmatpush3.msra.mxu1 %v4163_v11 }
 0x22c   : > { %v2081_v51 = vsel %vm2056_vm10, %v2048_v1, %v1684_v35  ;;  %v2082_v61 = vsel %vm2056_vm10, %v2049_v36, %v1686_v50  ;;  %v2806_v50 = vld [vmem:[#allocation3 + $0x39] sm:$0xff] }
 0x22d   : > { %3285 = vrot.lane.b32.xlu0 %v2708_v22, %s5482_s29  ;;  %2905 = vrot.lane.b32.xlu1 %v2708_v22, %s5480_s27  ;;  %v2838_v36 = vld [vmem:[#allocation3 + $0x3a] sm:$0xff] }
 0x22f   : > { %v1812_v3 = vpop.permute.xlu0 %1811  ;;  %v6831_v53 = vpop.permute.xlu1 %919 }
 0x230   : > { %v2114_v33 = vsel %vm2089_vm11, %v2081_v51, %v1812_v3  ;;  %v1885_v22 = vsel %vm425_vm0, %v6489_v18, %v6831_v53 }
 0x231   : > { %3287 = vrot.lane.b32.xlu0 %v2709_v39, %s5482_s29  ;;  %3413 = vrot.lane.b32.xlu1 %v2740_v6, %s5483_s30 }
 0x232   : > { %5260 = vmatprep.mubr.msk.f32.mxu0 %vm2133_vm12, %v2114_v33 }
 0x233   : > { %v1814_v15 = vpop.permute.xlu0 %1813  ;;  %v6847_v28 = vpop.permute.xlu1 %921 }
 0x234   : > { %v2115_v57 = vsel %vm2089_vm11, %v2082_v61, %v1814_v15  ;;  %v1886_v51 = vsel %vm425_vm0, %v6491_v21, %v6847_v28 }
 0x235   : > { %2907 = vrot.lane.b32.xlu0 %v2709_v39, %s5480_s27  ;;  %3033 = vrot.lane.b32.xlu1 %v2740_v6, %s5481_s28 }
 0x236   : > { %5261 = vmatmul.mubr.msk.f32.gmra.mrb[24].mxu0 %vm2133_vm12, %v2115_v57 }
 0x237   : > { %v1048_v49 = vpop.permute.xlu0 %1047  ;;  %v6859_v62 = vpop.permute.xlu1 %1049 }
 0x238   : > { %v1918_v31 = vsel %vm1891_vm5, %v1885_v22, %v1048_v49  ;;  %v1919_v18 = vsel %vm1891_vm5, %v1886_v51, %v6859_v62 }
 0x239   : > { %v5241_v32 = vpop.f32.mrb[10].mxu0  ;;  %3415 = vrot.lane.b32.xlu0 %v2741_v45, %s5483_s30  ;;  %3541 = vrot.lane.b32.xlu1 %v6861_v26, %s5484_s25 }
 0x23a   : > { %v2356_v14 = vadd.f32 %v5241_v32, %v6515_v12  ;;  %v2350_v60 = vpop.f32.mrb[11].mxu0 }
 0x23b   : > { %v2351_v40 = vadd.f32 %v6515_v12, %v2350_v60  ;;  %v1176_v44 = vpop.permute.xlu0 %1175  ;;  %v1178_v47 = vpop.permute.xlu1 %1177 }
 0x23c   : > { %v2470_v7 = vmax.f32 %v2356_v14, 0.0  ;;  %v1951_v55 = vsel %vm1924_vm6, %v1918_v31, %v1176_v44  ;;  %v1952_v58 = vsel %vm1924_vm6, %v1919_v18, %v1178_v47  ;;  %v2807_v44 = vld [vmem:[#allocation3 + $0x49] sm:$0xff] }
 0x23d   : > { %v2469_v59 = vmax.f32 %v2351_v40, 0.0  ;;  %3035 = vrot.lane.b32.xlu0 %v2741_v45, %s5481_s28  ;;  %3161 = vrot.lane.b32.xlu1 %v6861_v26, %s5479_s15  ;;  %v6940_v47 = vld [vmem:[#allocation3 + $0x50] sm:$0xff] }
 0x23e   : > { %2559 = vst.msk [vmem:[#allocation3 + $0x99] sm:$0xff] %vm2491_vm13, %v2470_v7 }
 0x23f   : > { %2558 = vst.msk [vmem:[#allocation3 + $0x91] sm:$0xff] %vm2491_vm13, %v2469_v59  ;;  %v1304_v42 = vpop.permute.xlu0 %1303  ;;  %v1306_v20 = vpop.permute.xlu1 %1305 }
 0x240   : > { %v1984_v17 = vsel %vm1957_vm7, %v1951_v55, %v1304_v42  ;;  %v1985_v29 = vsel %vm1957_vm7, %v1952_v58, %v1306_v20  ;;  %v2808_v20 = vld [vmem:[#allocation3 + $0x51] sm:$0xff] }
 0x241   : > { %3543 = vrot.lane.b32.xlu0 %v6885_v27, %s5484_s25  ;;  %3669 = vrot.lane.b32.xlu1 %v2805_v30, %s5485_s23 }
 0x243   : > { %v1432_v4 = vpop.permute.xlu0 %1431  ;;  %v1434_v5 = vpop.permute.xlu1 %1433 }
 0x244   : > { %v2017_v3 = vsel %vm1990_vm8, %v1984_v17, %v1432_v4  ;;  %v2018_v9 = vsel %vm1990_vm8, %v1985_v29, %v1434_v5 }
 0x245   : > { %3163 = vrot.lane.b32.xlu0 %v6885_v27, %s5479_s15  ;;  %3289 = vrot.lane.b32.xlu1 %v2805_v30, %s5482_s29 }
 0x247   : > { %v1560_v37 = vpop.permute.xlu0 %1559  ;;  %v1562_v35 = vpop.permute.xlu1 %1561 }
 0x248   : > { %v2050_v53 = vsel %vm2023_vm9, %v2017_v3, %v1560_v37  ;;  %v2051_v24 = vsel %vm2023_vm9, %v2018_v9, %v1562_v35 }
 0x249   : > { %3671 = vrot.lane.b32.xlu0 %v2806_v50, %s5485_s23  ;;  %3797 = vrot.lane.b32.xlu1 %v2837_v46, %s5486_s16 }
 0x24b   : > { %v1688_v52 = vpop.permute.xlu0 %1687  ;;  %v1690_v1 = vpop.permute.xlu1 %1689 }
 0x24c   : > { %v2083_v33 = vsel %vm2056_vm10, %v2050_v53, %v1688_v52  ;;  %v2084_v61 = vsel %vm2056_vm10, %v2051_v24, %v1690_v1  ;;  %v2840_v1 = vld [vmem:[#allocation3 + $0x52] sm:$0xff] }
 0x24d   : > { %3291 = vrot.lane.b32.xlu1 %v2806_v50, %s5482_s29  ;;  %2909 = vrot.lane.b32.xlu0 %v2805_v30, %s5480_s27 }
 0x24f   : > { %v1816_v39 = vpop.permute.xlu0 %1815  ;;  %v924_v6 = vpop.permute.xlu1 %923 }
 0x250   : > { %v2116_v21 = vsel %vm2089_vm11, %v2083_v33, %v1816_v39  ;;  %v1887_v42 = vsel %vm425_vm0, %v6583_v63, %v924_v6  ;;  %v6975_v6 = vld [vmem:[#allocation3 + $0x60] sm:$0xff] }
 0x251   : > { %5263 = vmatprep.mubr.msk.f32.mxu0 %vm2133_vm12, %v2116_v21  ;;  %3799 = vrot.lane.b32.xlu1 %v2838_v36, %s5486_s16 }
 0x252   : > { %3417 = vrot.lane.b32.xlu0 %v2837_v46, %s5483_s30 }
 0x253   : > { %v1818_v15 = vpop.permute.xlu0 %1817  ;;  %v926_v28 = vpop.permute.xlu1 %925 }
 0x254   : > { %v2117_v13 = vsel %vm2089_vm11, %v2084_v61, %v1818_v15  ;;  %v1888_v37 = vsel %vm425_vm0, %v6585_v19, %v926_v28 }
 0x255   : > { %5264 = vmatmul.mubr.msk.f32.gmra.mrb[26].mxu0 %vm2133_vm12, %v2117_v13  ;;  %3037 = vrot.lane.b32.xlu1 %v2837_v46, %s5481_s28 }
 0x256   : > { %2911 = vrot.lane.b32.xlu0 %v2806_v50, %s5480_s27 }
 0x257   : > { %v1052_v57 = vpop.permute.xlu0 %1051  ;;  %v1054_v16 = vpop.permute.xlu1 %1053 }
 0x258   : > { %v1920_v38 = vsel %vm1891_vm5, %v1887_v42, %v1052_v57  ;;  %v1921_v63 = vsel %vm1891_vm5, %v1888_v37, %v1054_v16  ;;  %v2809_v16 = vld [vmem:[#allocation3 + $0x61] sm:$0xff] }
 0x259   : > { %v5244_v49 = vpop.f32.mrb[12].mxu0  ;;  %3545 = vrot.lane.b32.xlu1 %v6927_v2, %s5484_s25 }
 0x25a   : > { %v2366_v62 = vadd.f32 %v5244_v49, %v6515_v12  ;;  %v2360_v25 = vpop.f32.mrb[13].mxu0  ;;  %3419 = vrot.lane.b32.xlu0 %v2838_v36, %s5483_s30  ;;  %v6988_v49 = vld [vmem:[#allocation3 + $0x68] sm:$0xff] }
 0x25b   : > { %v2361_v45 = vadd.f32 %v6515_v12, %v2360_v25  ;;  %v1180_v32 = vpop.permute.xlu0 %1179  ;;  %v1182_v14 = vpop.permute.xlu1 %1181 }
 0x25c   : > { %v2472_v60 = vmax.f32 %v2366_v62, 0.0  ;;  %v1953_v30 = vsel %vm1924_vm6, %v1920_v38, %v1180_v32  ;;  %v1954_v46 = vsel %vm1924_vm6, %v1921_v63, %v1182_v14  ;;  %v2841_v32 = vld [vmem:[#allocation3 + $0x62] sm:$0xff] }
 0x25d   : > { %v2471_v43 = vmax.f32 %v2361_v45, 0.0  ;;  %3165 = vrot.lane.b32.xlu1 %v6927_v2, %s5479_s15 }
 0x25e   : > { %2561 = vst.msk [vmem:[#allocation3 + $0xb1] sm:$0xff] %vm2491_vm13, %v2472_v60  ;;  %3039 = vrot.lane.b32.xlu0 %v2838_v36, %s5481_s28 }
 0x25f   : > { %2560 = vst.msk [vmem:[#allocation3 + $0xa9] sm:$0xff] %vm2491_vm13, %v2471_v43  ;;  %v1308_v10 = vpop.permute.xlu0 %1307  ;;  %v1310_v40 = vpop.permute.xlu1 %1309  ;;  %v2810_v43 = vld [vmem:[#allocation3 + $0x69] sm:$0xff] }
 0x260   : > { %v1986_v5 = vsel %vm1957_vm7, %v1953_v30, %v1308_v10  ;;  %v1987_v52 = vsel %vm1957_vm7, %v1954_v46, %v1310_v40 }
 0x261   : > { %3673 = vrot.lane.b32.xlu1 %v2807_v44, %s5485_s23 }
 0x262   : > { %3547 = vrot.lane.b32.xlu0 %v6940_v47, %s5484_s25 }
 0x263   : > { %v1436_v56 = vpop.permute.xlu0 %1435  ;;  %v1438_v7 = vpop.permute.xlu1 %1437 }
 0x264   : > { %v2019_v35 = vsel %vm1990_vm8, %v1986_v5, %v1436_v56  ;;  %v2020_v17 = vsel %vm1990_vm8, %v1987_v52, %v1438_v7  ;;  %v7034_v52 = vld [vmem:[%s8124_s2] ss:$0 sm:$0xff] }
 0x265   : > { %3293 = vrot.lane.b32.xlu1 %v2807_v44, %s5482_s29 }
 0x266   : > { %3167 = vrot.lane.b32.xlu0 %v6940_v47, %s5479_s15 }
 0x267   : > { %v1564_v59 = vpop.permute.xlu0 %1563  ;;  %v1566_v23 = vpop.permute.xlu1 %1565 }
 0x268   : > { %v2052_v50 = vsel %vm2023_vm9, %v2019_v35, %v1564_v59  ;;  %v2053_v51 = vsel %vm2023_vm9, %v2020_v17, %v1566_v23  ;;  %v2842_v35 = vld [vmem:[#allocation3 + $0x6a] sm:$0xff] }
 0x269   : > { %3801 = vrot.lane.b32.xlu1 %v2839_v48, %s5486_s16 }
 0x26a   : > { %3675 = vrot.lane.b32.xlu0 %v2808_v20, %s5485_s23 }
 0x26b   : > { %v1692_v11 = vpop.permute.xlu0 %1691  ;;  %v1694_v4 = vpop.permute.xlu1 %1693 }
 0x26c   : > { %v2085_v22 = vsel %vm2056_vm10, %v2052_v50, %v1692_v11  ;;  %v2086_v3 = vsel %vm2056_vm10, %v2053_v51, %v1694_v4 }
 0x26d   : > { %3295 = vrot.lane.b32.xlu1 %v2808_v20, %s5482_s29 }
 0x26e   : > { %2913 = vrot.lane.b32.xlu0 %v2807_v44, %s5480_s27 }
 0x26f   : > { %v1820_v31 = vpop.permute.xlu0 %1819  ;;  %v928_v55 = vpop.permute.xlu1 %927 }
 0x270   : > { %v2118_v19 = vsel %vm2089_vm11, %v2085_v22, %v1820_v31  ;;  %v1889_v14 = vsel %vm425_vm0, %v6680_v34, %v928_v55  ;;  %v7027_v31 = vld [vmem:[#allocation3 + $0x78] sm:$0xff] }
 0x271   : > { %5266 = vmatprep.mubr.msk.f32.mxu0 %vm2133_vm12, %v2118_v19  ;;  %3803 = vrot.lane.b32.xlu1 %v2840_v1, %s5486_s16 }
 0x272   : > { %3421 = vrot.lane.b32.xlu0 %v2839_v48, %s5483_s30 }
 0x273   : > { %v1822_v18 = vpop.permute.xlu0 %1821  ;;  %v930_v53 = vpop.permute.xlu1 %929 }
 0x274   : > { %v2119_v58 = vsel %vm2089_vm11, %v2086_v3, %v1822_v18  ;;  %v1890_v60 = vsel %vm425_vm0, %v6682_v41, %v930_v53  ;;  %vm3990_vm0 = vcmask 261120  }
 0x275   : > { %5267 = vmatmul.mubr.msk.f32.gmra.mrb[28].mxu0 %vm2133_vm12, %v2119_v58  ;;  %3041 = vrot.lane.b32.xlu1 %v2839_v48, %s5481_s28 }
 0x276   : > { %2915 = vrot.lane.b32.xlu0 %v2808_v20, %s5480_s27 }
 0x277   : > { %v1056_v33 = vpop.permute.xlu0 %1055  ;;  %v1058_v39 = vpop.permute.xlu1 %1057 }
 0x278   : > { %v1922_v10 = vsel %vm1891_vm5, %v1889_v14, %v1056_v33  ;;  %v1923_v40 = vsel %vm1891_vm5, %v1890_v60, %v1058_v39  ;;  %v2811_v39 = vld [vmem:[#allocation3 + $0x79] sm:$0xff]  ;;  %v2844_v60 = vld [vmem:[#allocation3 + $0x82] sm:$0xff]  ;;  %vm4171_vm5 = vcmask 588800  }
 0x279   : > { %v5247_v29 = vpop.f32.mrb[14].mxu0  ;;  %3549 = vrot.lane.b32.xlu1 %v6975_v6, %s5484_s25 }
 0x27a   : > { %v2376_v21 = vadd.f32 %v5247_v29, %v6515_v12  ;;  %v2370_v36 = vpop.f32.mrb[15].mxu0  ;;  %3423 = vrot.lane.b32.xlu0 %v2840_v1, %s5483_s30  ;;  %v7049_v29 = vld [vmem:[#allocation3 + $0x80] sm:$0xff] }
 0x27b   : > { %v2371_v9 = vadd.f32 %v6515_v12, %v2370_v36  ;;  %v1184_v24 = vpop.permute.xlu0 %1183  ;;  %v1186_v61 = vpop.permute.xlu1 %1185 }
 0x27c   : > { %v2474_v15 = vmax.f32 %v2376_v21, 0.0  ;;  %v1955_v44 = vsel %vm1924_vm6, %v1922_v10, %v1184_v24  ;;  %v1956_v56 = vsel %vm1924_vm6, %v1923_v40, %v1186_v61  ;;  %v2843_v61 = vld [vmem:[#allocation3 + $0x7a] sm:$0xff]  ;;  %vm8013_vm6 = vmpackc.low %vm3925_vm15, %vm3925_vm15 }
 0x27d   : > { %v2473_v28 = vmax.f32 %v2371_v9, 0.0  ;;  %3169 = vrot.lane.b32.xlu1 %v6975_v6, %s5479_s15 }
 0x27e   : > { %2563 = vst.msk [vmem:[#allocation3 + $0xc9] sm:$0xff] %vm2491_vm13, %v2474_v15  ;;  %3043 = vrot.lane.b32.xlu0 %v2840_v1, %s5481_s28 }
 0x27f   : > { %2562 = vst.msk [vmem:[#allocation3 + $0xc1] sm:$0xff] %vm2491_vm13, %v2473_v28  ;;  %v1312_v13 = vpop.permute.xlu0 %1311  ;;  %v1314_v57 = vpop.permute.xlu1 %1313  ;;  %v2812_v28 = vld [vmem:[#allocation3 + $0x81] sm:$0xff] }
 0x280   : > { %v1988_v34 = vsel %vm1957_vm7, %v1955_v44, %v1312_v13  ;;  %v1989_v23 = vsel %vm1957_vm7, %v1956_v56, %v1314_v57  ;;  %vm5489_vm7 = vmmov 0  }
 0x281   : > { %3677 = vrot.lane.b32.xlu1 %v2809_v16, %s5485_s23 }
 0x282   : > { %3551 = vrot.lane.b32.xlu0 %v6988_v49, %s5484_s25 }
 0x283   : > { %v1440_v12 = vpop.permute.xlu0 %1439  ;;  %v1442_v62 = vpop.permute.xlu1 %1441 }
 0x284   : > { %v2021_v41 = vsel %vm1990_vm8, %v1988_v34, %v1440_v12  ;;  %v2022_v48 = vsel %vm1990_vm8, %v1989_v23, %v1442_v62  ;;  %vm4894_vm8 = vcmask 3072  }
 0x285   : > { %3297 = vrot.lane.b32.xlu1 %v2809_v16, %s5482_s29 }
 0x286   : > { %3171 = vrot.lane.b32.xlu0 %v6988_v49, %s5479_s15 }
 0x287   : > { %v1568_v25 = vpop.permute.xlu0 %1567  ;;  %v1570_v45 = vpop.permute.xlu1 %1569 }
 0x288   : > { %v2054_v42 = vsel %vm2023_vm9, %v2021_v41, %v1568_v25  ;;  %v2055_v20 = vsel %vm2023_vm9, %v2022_v48, %v1570_v45  ;;  %v7086_v41 = vld [vmem:[#allocation3 + $0x90] sm:$0xff] }
 0x289   : > { %3805 = vrot.lane.b32.xlu1 %v2841_v32, %s5486_s16 }
 0x28a   : > { %3679 = vrot.lane.b32.xlu0 %v2810_v43, %s5485_s23 }
 0x28b   : > { %v1696_v7 = vpop.permute.xlu0 %1695  ;;  %v1698_v59 = vpop.permute.xlu1 %1697 }
 0x28c   : > { %v2087_v38 = vsel %vm2056_vm10, %v2054_v42, %v1696_v7  ;;  %v2088_v30 = vsel %vm2056_vm10, %v2055_v20, %v1698_v59  ;;  %v2581_v42 = vld [vmem:[#allocation3 + $0x8] sm:$0xff] }
 0x28d   : > { %3299 = vrot.lane.b32.xlu1 %v2810_v43, %s5482_s29 }
 0x28e   : > { %2917 = vrot.lane.b32.xlu0 %v2809_v16, %s5480_s27 }
 0x28f   : > { %v1824_v11 = vpop.permute.xlu0 %1823  ;;  %v1826_v4 = vpop.permute.xlu1 %1825 }
 0x290   : > { %v2120_v5 = vsel %vm2089_vm11, %v2087_v38, %v1824_v11  ;;  %v2121_v37 = vsel %vm2089_vm11, %v2088_v30, %v1826_v4 }
 0x291   : > { %5269 = vmatprep.mubr.msk.f32.mxu0 %vm2133_vm12, %v2120_v5  ;;  %3807 = vrot.lane.b32.xlu1 %v2842_v35, %s5486_s16 }
 0x292   : > { %3425 = vrot.lane.b32.xlu0 %v2841_v32, %s5483_s30  ;;  %5270 = vmatmul.mubr.msk.f32.gmra.mrb[30].mxu0 %vm2133_vm12, %v2121_v37 }
 0x293   : > { %v2902_v63 = vpop.permute.xlu0 %2901  ;;  %v7021_v50 = vpop.permute.xlu1 %2903 }
 0x294   : > { %v3894_v5 = vsel %vm2491_vm13, %v2581_v42, %v7021_v50 }
 0x295   : > { %3045 = vrot.lane.b32.xlu1 %v2841_v32, %s5481_s28 }
 0x296   : > { %2919 = vrot.lane.b32.xlu0 %v2810_v43, %s5480_s27  ;;  %v2580_v43 = vld [vmem:[#allocation3] sm:$0xff] }
 0x297   : > { %v3030_v46 = vpop.permute.xlu0 %3029  ;;  %v7025_v22 = vpop.permute.xlu1 %3031  ;;  %v3893_v44 = vsel %vm2491_vm13, %v2580_v43, %v2902_v63 }
 0x298   : > { %v3926_v56 = vsel %vm3925_vm15, %v3893_v44, %v3030_v46  ;;  %v3927_v37 = vsel %vm3925_vm15, %v3894_v5, %v7025_v22 }
 0x299   : > { %v5250_v55 = vpop.f32.mrb[16].mxu0  ;;  %3553 = vrot.lane.b32.xlu1 %v7027_v31, %s5484_s25 }
 0x29a   : > { %v2386_v19 = vadd.f32 %v7034_v52, %v5250_v55  ;;  %v2380_v1 = vpop.f32.mrb[17].mxu0  ;;  %3427 = vrot.lane.b32.xlu0 %v2842_v35, %s5483_s30  ;;  %v2813_v55 = vld [vmem:[#allocation3 + $0x91] sm:$0xff] }
 0x29b   : > { %v2381_v17 = vadd.f32 %v7034_v52, %v2380_v1  ;;  %v3158_v51 = vpop.permute.xlu0 %3157  ;;  %v7039_v3 = vpop.permute.xlu1 %3159  ;;  %v7113_v1 = vld [vmem:[#allocation3 + $0x98] sm:$0xff] }
 0x29c   : > { %v2476_v18 = vmax.f32 %v2386_v19, 0.0  ;;  %v3958_v7 = vsel %vm2089_vm11, %v3926_v56, %v3158_v51 }
 0x29d   : > { %v2475_v53 = vmax.f32 %v2381_v17, 0.0  ;;  %3173 = vrot.lane.b32.xlu1 %v7027_v31, %s5479_s15 }
 0x29e   : > { %2565 = vst.msk [vmem:[#allocation3 + $0xe1] sm:$0xff] %vm2491_vm13, %v2476_v18  ;;  %3047 = vrot.lane.b32.xlu0 %v2842_v35, %s5481_s28  ;;  %v3959_v35 = vsel %vm2089_vm11, %v3927_v37, %v7039_v3  ;;  %v7185_v37 = vld [vmem:[#allocation3 + $0xb0] sm:$0xff] }
 0x29f   : > { %2564 = vst.msk [vmem:[#allocation3 + $0xd9] sm:$0xff] %vm2491_vm13, %v2475_v53  ;;  %v3286_v58 = vpop.permute.xlu0 %3285  ;;  %v7046_v33 = vpop.permute.xlu1 %2905 }
 0x2a0   : > { %v3991_v23 = vsel %vm3990_vm0, %v3958_v7, %v3286_v58 }
 0x2a1   : > { %3681 = vrot.lane.b32.xlu1 %v2811_v39, %s5485_s23 }
 0x2a2   : > { %3555 = vrot.lane.b32.xlu0 %v7049_v29, %s5484_s25 }
 0x2a3   : > { %v7053_v21 = vpop.permute.xlu0 %3287  ;;  %v3414_v36 = vpop.permute.xlu1 %3413 }
 0x2a4   : > { %v4024_v48 = vsel %vm4023_vm1, %v3991_v23, %v3414_v36  ;;  %v3992_v50 = vsel %vm3990_vm0, %v3959_v35, %v7053_v21  ;;  %v2814_v36 = vld [vmem:[#allocation3 + $0x99] sm:$0xff] }
 0x2a5   : > { %3301 = vrot.lane.b32.xlu1 %v2811_v39, %s5482_s29 }
 0x2a6   : > { %3175 = vrot.lane.b32.xlu0 %v7049_v29, %s5479_s15 }
 0x2a7   : > { %v7058_v9 = vpop.permute.xlu0 %2907  ;;  %v7060_v24 = vpop.permute.xlu1 %3033 }
 0x2a9   : > { %v5253_v15 = vpop.f32.mrb[18].mxu0  ;;  %3809 = vrot.lane.b32.xlu1 %v2843_v61, %s5486_s16 }
 0x2aa   : > { %v2396_v13 = vadd.f32 %v7034_v52, %v5253_v15  ;;  %v2390_v57 = vpop.f32.mrb[19].mxu0  ;;  %3683 = vrot.lane.b32.xlu0 %v2812_v28, %s5485_s23 }
 0x2ab   : > { %v2391_v16 = vadd.f32 %v7034_v52, %v2390_v57  ;;  %v3416_v12 = vpop.permute.xlu0 %3415  ;;  %v3542_v62 = vpop.permute.xlu1 %3541 }
 0x2ac   : > { %v2478_v25 = vmax.f32 %v2396_v13, 0.0  ;;  %v4057_v20 = vsel %vm4056_vm2, %v4024_v48, %v3542_v62  ;;  %v4025_v19 = vsel %vm4023_vm1, %v3992_v50, %v3416_v12  ;;  %v7157_v48 = vld [vmem:[#allocation3 + $0xa8] sm:$0xff] }
 0x2ad   : > { %v2477_v45 = vmax.f32 %v2391_v16, 0.0  ;;  %3303 = vrot.lane.b32.xlu1 %v2812_v28, %s5482_s29 }
 0x2ae   : > { %2567 = vst.msk [vmem:[#allocation3 + $0xf9] sm:$0xff] %vm2491_vm13, %v2478_v25  ;;  %2921 = vrot.lane.b32.xlu0 %v2811_v39, %s5480_s27  ;;  %v2845_v39 = vld [vmem:[#allocation3 + $0x92] sm:$0xff] }
 0x2af   : > { %2566 = vst.msk [vmem:[#allocation3 + $0xf1] sm:$0xff] %vm2491_vm13, %v2477_v45  ;;  %v7070_v32 = vpop.permute.xlu0 %3035  ;;  %v7072_v14 = vpop.permute.xlu1 %3161  ;;  %v2846_v45 = vld [vmem:[#allocation3 + $0x9a] sm:$0xff] }
 0x2b1   : > { %3811 = vrot.lane.b32.xlu1 %v2844_v60, %s5486_s16 }
 0x2b2   : > { %3429 = vrot.lane.b32.xlu0 %v2843_v61, %s5483_s30 }
 0x2b3   : > { %v3544_v10 = vpop.permute.xlu0 %3543  ;;  %v3670_v40 = vpop.permute.xlu1 %3669 }
 0x2b4   : > { %v4090_v38 = vsel %vm4089_vm3, %v4057_v20, %v3670_v40  ;;  %v4058_v22 = vsel %vm4056_vm2, %v4025_v19, %v3544_v10  ;;  %v3895_v10 = vsel %vm2491_vm13, %v6809_v8, %v7046_v33 }
 0x2b5   : > { %3049 = vrot.lane.b32.xlu1 %v2843_v61, %s5481_s28  ;;  %v3928_v40 = vsel %vm3925_vm15, %v3895_v10, %v7060_v24 }
 0x2b6   : > { %2923 = vrot.lane.b32.xlu0 %v2812_v28, %s5480_s27  ;;  %v3960_v44 = vsel %vm2089_vm11, %v3928_v40, %v7072_v14 }
 0x2b7   : > { %v7081_v59 = vpop.permute.xlu0 %3163  ;;  %v7083_v34 = vpop.permute.xlu1 %3289 }
 0x2b8   : > { %v3993_v7 = vsel %vm3990_vm0, %v3960_v44, %v7083_v34  ;;  %v3896_v34 = vsel %vm2491_vm13, %v6811_v54, %v7058_v9  ;;  %v2815_v54 = vld [vmem:[#allocation3 + $0xa9] sm:$0xff] }
 0x2b9   : > { %3557 = vrot.lane.b32.xlu1 %v7086_v41, %s5484_s25 }
 0x2ba   : > { %3431 = vrot.lane.b32.xlu0 %v2844_v60, %s5483_s30 }
 0x2bb   : > { %v3672_v30 = vpop.permute.xlu0 %3671  ;;  %v3798_v11 = vpop.permute.xlu1 %3797 }
 0x2bc   : > { %v4123_v4 = vsel %vm4122_vm4, %v4090_v38, %v3798_v11  ;;  %v4091_v17 = vsel %vm4089_vm3, %v4058_v22, %v3672_v30  ;;  %v3929_v38 = vsel %vm3925_vm15, %v3896_v34, %v7070_v32  ;;  %v2847_v22 = vld [vmem:[#allocation3 + $0xaa] sm:$0xff] }
 0x2bd   : > { %5290 = vmatprep.mubr.msk.f32.mxu1 %vm4171_vm5, %v4123_v4  ;;  %3177 = vrot.lane.b32.xlu1 %v7086_v41, %s5479_s15  ;;  %v3961_v30 = vsel %vm2089_vm11, %v3929_v38, %v7081_v59  ;;  %v7257_v38 = vld [vmem:[#allocation3 + $0xc8] sm:$0xff] }
 0x2be   : > { %3051 = vrot.lane.b32.xlu0 %v2844_v60, %s5481_s28 }
 0x2bf   : > { %v7105_v63 = vpop.permute.xlu1 %3291  ;;  %v7107_v46 = vpop.permute.xlu0 %2909 }
 0x2c0   : > { %v3994_v4 = vsel %vm3990_vm0, %v3961_v30, %v7105_v63 }
 0x2c1   : > { %3685 = vrot.lane.b32.xlu1 %v2813_v55, %s5485_s23 }
 0x2c2   : > { %3559 = vrot.lane.b32.xlu0 %v7113_v1, %s5484_s25 }
 0x2c3   : > { %v3800_v51 = vpop.permute.xlu1 %3799 }
 0x2c4   : > { %v4124_v3 = vsel %vm4122_vm4, %v4091_v17, %v3800_v51  ;;  %v3418_v18 = vpop.permute.xlu0 %3417  ;;  %v2816_v51 = vld [vmem:[#allocation3 + $0xb1] sm:$0xff] }
 0x2c5   : > { %5291 = vmatmul.mubr.msk.f32.vlgmr.msra.gmra.mrb[0].mxu1 %vm4171_vm5, %v4124_v3  ;;  %3305 = vrot.lane.b32.xlu1 %v2813_v55, %s5482_s29  ;;  %v4026_v8 = vsel %vm4023_vm1, %v3993_v7, %v3418_v18  ;;  %v7229_v7 = vld [vmem:[#allocation3 + $0xc0] sm:$0xff] }
 0x2c6   : > { %3179 = vrot.lane.b32.xlu0 %v7113_v1, %s5479_s15 }
 0x2c7   : > { %v7124_v53 = vpop.permute.xlu1 %3037 }
 0x2c8   : > { %v7126_v58 = vpop.permute.xlu0 %2911 }
 0x2c9   : > { %v5256_v21 = vpop.f32.mrb[20].mxu0  ;;  %3813 = vrot.lane.b32.xlu1 %v2845_v39, %s5486_s16 }
 0x2ca   : > { %v2406_v61 = vadd.f32 %v7034_v52, %v5256_v21  ;;  %v2400_v15 = vpop.f32.mrb[21].mxu0  ;;  %3687 = vrot.lane.b32.xlu0 %v2814_v36, %s5485_s23 }
 0x2cb   : > { %v2401_v28 = vadd.f32 %v7034_v52, %v2400_v15  ;;  %v3546_v13 = vpop.permute.xlu1 %3545 }
 0x2cc   : > { %v2480_v57 = vmax.f32 %v2406_v61, 0.0  ;;  %v3420_v16 = vpop.permute.xlu0 %3419  ;;  %v4059_v33 = vsel %vm4056_vm2, %v4026_v8, %v3546_v13 }
 0x2cd   : > { %v2479_v12 = vmax.f32 %v2401_v28, 0.0  ;;  %3307 = vrot.lane.b32.xlu1 %v2814_v36, %s5482_s29  ;;  %v4027_v9 = vsel %vm4023_vm1, %v3994_v4, %v3420_v16 }
 0x2ce   : > { %2569 = vst.msk [vmem:[#allocation3 + $0x111] sm:$0xff] %vm2491_vm13, %v2480_v57  ;;  %2925 = vrot.lane.b32.xlu0 %v2813_v55, %s5480_s27  ;;  %v2848_v57 = vld [vmem:[#allocation3 + $0xb2] sm:$0xff] }
 0x2cf   : > { %2568 = vst.msk [vmem:[#allocation3 + $0x109] sm:$0xff] %vm2491_vm13, %v2479_v12  ;;  %v7136_v62 = vpop.permute.xlu1 %3165 }
 0x2d0   : > { %v7138_v25 = vpop.permute.xlu0 %3039 }
 0x2d1   : > { %3815 = vrot.lane.b32.xlu1 %v2846_v45, %s5486_s16 }
 0x2d2   : > { %3433 = vrot.lane.b32.xlu0 %v2845_v39, %s5483_s30 }
 0x2d3   : > { %v3674_v60 = vpop.permute.xlu1 %3673 }
 0x2d4   : > { %v3548_v43 = vpop.permute.xlu0 %3547  ;;  %v4092_v24 = vsel %vm4089_vm3, %v4059_v33, %v3674_v60 }
 0x2d5   : > { %3053 = vrot.lane.b32.xlu1 %v2845_v39, %s5481_s28  ;;  %v4060_v32 = vsel %vm4056_vm2, %v4027_v9, %v3548_v43 }
 0x2d6   : > { %2927 = vrot.lane.b32.xlu0 %v2814_v36, %s5480_s27 }
 0x2d7   : > { %v7151_v56 = vpop.permute.xlu1 %3293 }
 0x2d8   : > { %v7155_v23 = vpop.permute.xlu0 %3167 }
 0x2d9   : > { %3561 = vrot.lane.b32.xlu1 %v7157_v48, %s5484_s25 }
 0x2da   : > { %3435 = vrot.lane.b32.xlu0 %v2846_v45, %s5483_s30 }
 0x2db   : > { %v3802_v14 = vpop.permute.xlu1 %3801 }
 0x2dc   : > { %v4125_v42 = vsel %vm4122_vm4, %v4092_v24, %v3802_v14  ;;  %v3676_v20 = vpop.permute.xlu0 %3675 }
 0x2dd   : > { %3181 = vrot.lane.b32.xlu1 %v7157_v48, %s5479_s15  ;;  %5293 = vmatprep.mubr.msk.f32.mxu1 %vm4171_vm5, %v4125_v42  ;;  %v4093_v59 = vsel %vm4089_vm3, %v4060_v32, %v3676_v20  ;;  %v2849_v32 = vld [vmem:[#allocation3 + $0xc2] sm:$0xff] }
 0x2de   : > { %3055 = vrot.lane.b32.xlu0 %v2846_v45, %s5481_s28  ;;  %v3897_v45 = vsel %vm2491_vm13, %v6861_v26, %v7107_v46 }
 0x2df   : > { %v7177_v11 = vpop.permute.xlu1 %3295  ;;  %v3930_v60 = vsel %vm3925_vm15, %v3897_v45, %v7124_v53 }
 0x2e0   : > { %v7181_v5 = vpop.permute.xlu0 %2913  ;;  %v3962_v43 = vsel %vm2089_vm11, %v3930_v60, %v7136_v62 }
 0x2e1   : > { %3689 = vrot.lane.b32.xlu1 %v2815_v54, %s5485_s23  ;;  %v3995_v40 = vsel %vm3990_vm0, %v3962_v43, %v7151_v56  ;;  %v3898_v56 = vsel %vm2491_vm13, %v6885_v27, %v7126_v58  ;;  %v2817_v27 = vld [vmem:[#allocation3 + $0xc1] sm:$0xff] }
 0x2e2   : > { %3563 = vrot.lane.b32.xlu0 %v7185_v37, %s5484_s25  ;;  %v3931_v24 = vsel %vm3925_vm15, %v3898_v56, %v7138_v25 }
 0x2e3   : > { %v3804_v35 = vpop.permute.xlu1 %3803  ;;  %v3963_v14 = vsel %vm2089_vm11, %v3931_v24, %v7155_v23  ;;  %v7329_v24 = vld [vmem:[#allocation3 + $0xe0] sm:$0xff] }
 0x2e4   : > { %v4126_v50 = vsel %vm4122_vm4, %v4093_v59, %v3804_v35  ;;  %v3422_v63 = vpop.permute.xlu0 %3421  ;;  %v3996_v20 = vsel %vm3990_vm0, %v3963_v14, %v7177_v11  ;;  %v2818_v35 = vld [vmem:[#allocation3 + $0xc9] sm:$0xff] }
 0x2e5   : > { %3309 = vrot.lane.b32.xlu1 %v2815_v54, %s5482_s29  ;;  %5294 = vmatmul.mubr.msk.f32.gmra.mrb[2].mxu1 %vm4171_vm5, %v4126_v50  ;;  %v4028_v26 = vsel %vm4023_vm1, %v3995_v40, %v3422_v63  ;;  %v7301_v40 = vld [vmem:[#allocation3 + $0xd8] sm:$0xff] }
 0x2e6   : > { %3183 = vrot.lane.b32.xlu0 %v7185_v37, %s5479_s15 }
 0x2e7   : > { %v7196_v55 = vpop.permute.xlu1 %3041 }
 0x2e8   : > { %v7198_v19 = vpop.permute.xlu0 %2915 }
 0x2e9   : > { %v5259_v17 = vpop.f32.mrb[22].mxu0  ;;  %3817 = vrot.lane.b32.xlu1 %v2847_v22, %s5486_s16 }
 0x2ea   : > { %v2416_v3 = vadd.f32 %v7034_v52, %v5259_v17  ;;  %v2410_v18 = vpop.f32.mrb[23].mxu0  ;;  %3691 = vrot.lane.b32.xlu0 %v2816_v51, %s5485_s23 }
 0x2eb   : > { %v2411_v39 = vadd.f32 %v7034_v52, %v2410_v18  ;;  %v3550_v21 = vpop.permute.xlu1 %3549 }
 0x2ec   : > { %v2482_v36 = vmax.f32 %v2416_v3, 0.0  ;;  %v3424_v61 = vpop.permute.xlu0 %3423  ;;  %v4061_v46 = vsel %vm4056_vm2, %v4028_v26, %v3550_v21 }
 0x2ed   : > { %v2481_v15 = vmax.f32 %v2411_v39, 0.0  ;;  %3311 = vrot.lane.b32.xlu1 %v2816_v51, %s5482_s29  ;;  %v4029_v58 = vsel %vm4023_vm1, %v3996_v20, %v3424_v61 }
 0x2ee   : > { %2571 = vst.msk [vmem:[#allocation3 + $0x129] sm:$0xff] %vm2491_vm13, %v2482_v36  ;;  %2929 = vrot.lane.b32.xlu0 %v2815_v54, %s5480_s27  ;;  %v2850_v36 = vld [vmem:[#allocation3 + $0xca] sm:$0xff] }
 0x2ef   : > { %2570 = vst.msk [vmem:[#allocation3 + $0x121] sm:$0xff] %vm2491_vm13, %v2481_v15  ;;  %v7208_v28 = vpop.permute.xlu1 %3169 }
 0x2f0   : > { %v7210_v13 = vpop.permute.xlu0 %3043 }
 0x2f1   : > { %3819 = vrot.lane.b32.xlu1 %v2848_v57, %s5486_s16 }
 0x2f2   : > { %3437 = vrot.lane.b32.xlu0 %v2847_v22, %s5483_s30 }
 0x2f3   : > { %v3678_v16 = vpop.permute.xlu1 %3677 }
 0x2f4   : > { %v3552_v12 = vpop.permute.xlu0 %3551  ;;  %v4094_v53 = vsel %vm4089_vm3, %v4061_v46, %v3678_v16 }
 0x2f5   : > { %3057 = vrot.lane.b32.xlu1 %v2847_v22, %s5481_s28  ;;  %v4062_v25 = vsel %vm4056_vm2, %v4029_v58, %v3552_v12 }
 0x2f6   : > { %2931 = vrot.lane.b32.xlu0 %v2816_v51, %s5480_s27 }
 0x2f7   : > { %v7223_v10 = vpop.permute.xlu1 %3297 }
 0x2f8   : > { %v7227_v44 = vpop.permute.xlu0 %3171 }
 0x2f9   : > { %3565 = vrot.lane.b32.xlu1 %v7229_v7, %s5484_s25 }
 0x2fa   : > { %3439 = vrot.lane.b32.xlu0 %v2848_v57, %s5483_s30 }
 0x2fb   : > { %v3806_v62 = vpop.permute.xlu1 %3805 }
 0x2fc   : > { %v4127_v8 = vsel %vm4122_vm4, %v4094_v53, %v3806_v62  ;;  %v3680_v33 = vpop.permute.xlu0 %3679 }
 0x2fd   : > { %3185 = vrot.lane.b32.xlu1 %v7229_v7, %s5479_s15  ;;  %5296 = vmatprep.mubr.msk.f32.mxu1 %vm4171_vm5, %v4127_v8  ;;  %v4095_v23 = vsel %vm4089_vm3, %v4062_v25, %v3680_v33 }
 0x2fe   : > { %3059 = vrot.lane.b32.xlu0 %v2848_v57, %s5481_s28  ;;  %v3899_v57 = vsel %vm2491_vm13, %v6927_v2, %v7181_v5 }
 0x2ff   : > { %v7249_v42 = vpop.permute.xlu1 %3299  ;;  %v3932_v16 = vsel %vm3925_vm15, %v3899_v57, %v7196_v55 }
 0x300   : > { %v7253_v34 = vpop.permute.xlu0 %2917  ;;  %v3964_v12 = vsel %vm2089_vm11, %v3932_v16, %v7208_v28 }
 0x301   : > { %3693 = vrot.lane.b32.xlu1 %v2817_v27, %s5485_s23  ;;  %v3997_v60 = vsel %vm3990_vm0, %v3964_v12, %v7223_v10  ;;  %v3900_v10 = vsel %vm2491_vm13, %v6940_v47, %v7198_v19  ;;  %v2819_v47 = vld [vmem:[#allocation3 + $0xd9] sm:$0xff] }
 0x302   : > { %3567 = vrot.lane.b32.xlu0 %v7257_v38, %s5484_s25  ;;  %v3933_v53 = vsel %vm3925_vm15, %v3900_v10, %v7210_v13 }
 0x303   : > { %v3808_v30 = vpop.permute.xlu1 %3807  ;;  %v3965_v62 = vsel %vm2089_vm11, %v3933_v53, %v7227_v44 }
 0x304   : > { %v4128_v4 = vsel %vm4122_vm4, %v4095_v23, %v3808_v30  ;;  %v3426_v11 = vpop.permute.xlu0 %3425  ;;  %v3998_v33 = vsel %vm3990_vm0, %v3965_v62, %v7249_v42  ;;  %v7344_v23 = vld [vmem:[#allocation3 + $0xda] sm:$0xff] }
 0x305   : > { %3313 = vrot.lane.b32.xlu1 %v2817_v27, %s5482_s29  ;;  %5297 = vmatmul.mubr.msk.f32.gmra.mrb[4].mxu1 %vm4171_vm5, %v4128_v4  ;;  %v4030_v2 = vsel %vm4023_vm1, %v3997_v60, %v3426_v11  ;;  %v2820_v11 = vld [vmem:[#allocation3 + $0xe1] sm:$0xff] }
 0x306   : > { %3187 = vrot.lane.b32.xlu0 %v7257_v38, %s5479_s15 }
 0x307   : > { %v7268_v54 = vpop.permute.xlu1 %3045 }
 0x308   : > { %v7270_v9 = vpop.permute.xlu0 %2919 }
 0x309   : > { %v5262_v59 = vpop.f32.mrb[24].mxu0  ;;  %3821 = vrot.lane.b32.xlu1 %v2849_v32, %s5486_s16 }
 0x30a   : > { %v2426_v50 = vadd.f32 %v7034_v52, %v5262_v59  ;;  %v2420_v63 = vpop.f32.mrb[25].mxu0  ;;  %3695 = vrot.lane.b32.xlu0 %v2818_v35, %s5485_s23 }
 0x30b   : > { %v2421_v22 = vadd.f32 %v7034_v52, %v2420_v63  ;;  %v3554_v17 = vpop.permute.xlu1 %3553 }
 0x30c   : > { %v2484_v51 = vmax.f32 %v2426_v50, 0.0  ;;  %v3428_v3 = vpop.permute.xlu0 %3427  ;;  %v4063_v5 = vsel %vm4056_vm2, %v4030_v2, %v3554_v17 }
 0x30d   : > { %v2483_v18 = vmax.f32 %v2421_v22, 0.0  ;;  %3315 = vrot.lane.b32.xlu1 %v2818_v35, %s5482_s29  ;;  %v4031_v19 = vsel %vm4023_vm1, %v3998_v33, %v3428_v3 }
 0x30e   : > { %2573 = vst.msk [vmem:[#allocation3 + $0x141] sm:$0xff] %vm2491_vm13, %v2484_v51  ;;  %2933 = vrot.lane.b32.xlu0 %v2817_v27, %s5480_s27  ;;  %v2757_v51 = vld [vmem:[#allocation3 + $0xe2] sm:$0xff] }
 0x30f   : > { %2572 = vst.msk [vmem:[#allocation3 + $0x139] sm:$0xff] %vm2491_vm13, %v2483_v18  ;;  %v7280_v39 = vpop.permute.xlu1 %3173 }
 0x310   : > { %v7282_v21 = vpop.permute.xlu0 %3047 }
 0x311   : > { %3823 = vrot.lane.b32.xlu1 %v2850_v36, %s5486_s16 }
 0x312   : > { %3441 = vrot.lane.b32.xlu0 %v2849_v32, %s5483_s30 }
 0x313   : > { %v3682_v61 = vpop.permute.xlu1 %3681 }
 0x314   : > { %v3556_v15 = vpop.permute.xlu0 %3555  ;;  %v4096_v55 = vsel %vm4089_vm3, %v4063_v5, %v3682_v61  ;;  %v3901_v61 = vsel %vm2491_vm13, %v6975_v6, %v7253_v34  ;;  %v7383_v34 = vld [vmem:[#allocation3 + $0xf9] sm:$0xff] }
 0x315   : > { %3061 = vrot.lane.b32.xlu1 %v2849_v32, %s5481_s28  ;;  %v4064_v13 = vsel %vm4056_vm2, %v4031_v19, %v3556_v15  ;;  %v7369_v15 = vld [vmem:[#allocation3 + $0xf0] sm:$0xff]  ;;  %v3934_v57 = vsel %vm3925_vm15, %v3901_v61, %v7268_v54 }
 0x316   : > { %2935 = vrot.lane.b32.xlu0 %v2818_v35, %s5480_s27  ;;  %v3966_v16 = vsel %vm2089_vm11, %v3934_v57, %v7280_v39  ;;  %v7388_v54 = vld [vmem:[#allocation3 + $0xf1] sm:$0xff] }
 0x317   : > { %v7295_v45 = vpop.permute.xlu1 %3301 }
 0x318   : > { %v7299_v43 = vpop.permute.xlu0 %3175  ;;  %v3999_v60 = vsel %vm3990_vm0, %v3966_v16, %v7295_v45 }
 0x319   : > { %3569 = vrot.lane.b32.xlu1 %v7301_v40, %s5484_s25 }
 0x31a   : > { %3443 = vrot.lane.b32.xlu0 %v2850_v36, %s5483_s30 }
 0x31b   : > { %v3810_v28 = vpop.permute.xlu1 %3809 }
 0x31c   : > { %v4129_v26 = vsel %vm4122_vm4, %v4096_v55, %v3810_v28  ;;  %v3684_v46 = vpop.permute.xlu0 %3683 }
 0x31d   : > { %3189 = vrot.lane.b32.xlu1 %v7301_v40, %s5479_s15  ;;  %5299 = vmatprep.mubr.msk.f32.mxu1 %vm4171_vm5, %v4129_v26  ;;  %v4097_v44 = vsel %vm4089_vm3, %v4064_v13, %v3684_v46  ;;  %v3902_v26 = vsel %vm2491_vm13, %v6988_v49, %v7270_v9  ;;  %v7399_v46 = vld [vmem:[#allocation3 + $0xf2] sm:$0xff] }
 0x31e   : > { %3063 = vrot.lane.b32.xlu0 %v2850_v36, %s5481_s28  ;;  %v7362_v36 = vld [vmem:[#allocation3 + $0xf8] sm:$0xff]  ;;  %v3935_v10 = vsel %vm3925_vm15, %v3902_v26, %v7282_v21 }
 0x31f   : > { %v7321_v8 = vpop.permute.xlu1 %3303  ;;  %v3967_v53 = vsel %vm2089_vm11, %v3935_v10, %v7299_v43 }
 0x320   : > { %v7325_v56 = vpop.permute.xlu0 %2921  ;;  %v4000_v49 = vsel %vm3990_vm0, %v3967_v53, %v7321_v8 }
 0x321   : > { %3697 = vrot.lane.b32.xlu1 %v2819_v47, %s5485_s23 }
 0x322   : > { %3571 = vrot.lane.b32.xlu0 %v7329_v24, %s5484_s25 }
 0x323   : > { %v3812_v14 = vpop.permute.xlu1 %3811 }
 0x324   : > { %v4130_v20 = vsel %vm4122_vm4, %v4097_v44, %v3812_v14  ;;  %v3430_v42 = vpop.permute.xlu0 %3429 }
 0x325   : > { %3317 = vrot.lane.b32.xlu1 %v2819_v47, %s5482_s29  ;;  %5300 = vmatmul.mubr.msk.f32.gmra.mrb[6].mxu1 %vm4171_vm5, %v4130_v20  ;;  %v4032_v2 = vsel %vm4023_vm1, %v3999_v60, %v3430_v42 }
 0x326   : > { %3191 = vrot.lane.b32.xlu0 %v7329_v24, %s5479_s15 }
 0x327   : > { %v7340_v27 = vpop.permute.xlu1 %3049 }
 0x328   : > { %v7342_v58 = vpop.permute.xlu0 %2923  ;;  %v5265_v25 = vpop.f32.mrb[26].mxu0 }
 0x329   : > { %v2436_v30 = vadd.f32 %v7034_v52, %v5265_v25  ;;  %v2430_v4 = vpop.f32.mrb[27].mxu0  ;;  %3825 = vrot.lane.b32.xlu1 %v7344_v23, %s5486_s16 }
 0x32a   : > { %v2431_v32 = vadd.f32 %v7034_v52, %v2430_v4  ;;  %3699 = vrot.lane.b32.xlu0 %v2820_v11, %s5485_s23 }
 0x32b   : > { %v2486_v59 = vmax.f32 %v2436_v30, 0.0  ;;  %v3558_v35 = vpop.permute.xlu1 %3557 }
 0x32c   : > { %v2485_v50 = vmax.f32 %v2431_v32, 0.0  ;;  %v3432_v63 = vpop.permute.xlu0 %3431  ;;  %v4065_v5 = vsel %vm4056_vm2, %v4032_v2, %v3558_v35 }
 0x32d   : > { %2575 = vst.msk [vmem:[#allocation3 + $0x159] sm:$0xff] %vm2491_vm13, %v2486_v59  ;;  %3445 = vrot.lane.b32.xlu1 %v7344_v23, %s5483_s30  ;;  %v4033_v33 = vsel %vm4023_vm1, %v4000_v49, %v3432_v63  ;;  %v7507_v49 = vld [vmem:[#allocation3 + $0x112] sm:$0xff] }
 0x32e   : > { %2574 = vst.msk [vmem:[#allocation3 + $0x151] sm:$0xff] %vm2491_vm13, %v2485_v50  ;;  %3319 = vrot.lane.b32.xlu0 %v2820_v11, %s5482_s29 }
 0x32f   : > { %v7356_v22 = vpop.permute.xlu1 %3177 }
 0x330   : > { %v7358_v17 = vpop.permute.xlu0 %3051 }
 0x331   : > { %3447 = vrot.lane.b32.xlu1 %v2757_v51, %s5483_s30 }
 0x332   : > { %3827 = vrot.lane.b32.xlu0 %v2757_v51, %s5486_s16 }
 0x333   : > { %v3686_v3 = vpop.permute.xlu1 %3685 }
 0x334   : > { %v3560_v18 = vpop.permute.xlu0 %3559  ;;  %v4098_v39 = vsel %vm4089_vm3, %v4065_v5, %v3686_v3  ;;  %v3903_v3 = vsel %vm2491_vm13, %v7027_v31, %v7325_v56  ;;  %v7472_v56 = vld [vmem:[#allocation3 + $0x111] sm:$0xff] }
 0x335   : > { %3575 = vrot.lane.b32.xlu1 %v7362_v36, %s5484_s25  ;;  %v4066_v21 = vsel %vm4056_vm2, %v4033_v33, %v3560_v18  ;;  %v7458_v18 = vld [vmem:[#allocation3 + $0x108] sm:$0xff]  ;;  %v3936_v61 = vsel %vm3925_vm15, %v3903_v3, %v7340_v27 }
 0x336   : > { %3573 = vrot.lane.b32.xlu0 %v7369_v15, %s5484_s25  ;;  %v3968_v57 = vsel %vm2089_vm11, %v3936_v61, %v7356_v22  ;;  %v7477_v27 = vld [vmem:[#allocation3 + $0x109] sm:$0xff] }
 0x337   : > { %v7377_v12 = vpop.permute.xlu1 %3305 }
 0x338   : > { %v7381_v6 = vpop.permute.xlu0 %3179  ;;  %v4001_v60 = vsel %vm3990_vm0, %v3968_v57, %v7377_v12 }
 0x339   : > { %3703 = vrot.lane.b32.xlu1 %v7383_v34, %s5485_s23 }
 0x33a   : > { %3701 = vrot.lane.b32.xlu0 %v7388_v54, %s5485_s23 }
 0x33b   : > { %v3814_v55 = vpop.permute.xlu1 %3813 }
 0x33c   : > { %v4131_v45 = vsel %vm4122_vm4, %v4098_v39, %v3814_v55  ;;  %v3688_v28 = vpop.permute.xlu0 %3687 }
 0x33d   : > { %2937 = vrot.lane.b32.xlu1 %v2819_v47, %s5480_s27  ;;  %5302 = vmatprep.mubr.msk.f32.mxu1 %vm4171_vm5, %v4131_v45  ;;  %v7416_v47 = vld [vmem:[#allocation3 + $0xfa] sm:$0xff]  ;;  %v4099_v43 = vsel %vm4089_vm3, %v4066_v21, %v3688_v28  ;;  %v3904_v45 = vsel %vm2491_vm13, %v7049_v29, %v7342_v58  ;;  %v7489_v28 = vld [vmem:[#allocation3 + $0x10a] sm:$0xff] }
 0x33e   : > { %3829 = vrot.lane.b32.xlu0 %v7399_v46, %s5486_s16  ;;  %v3937_v26 = vsel %vm3925_vm15, %v3904_v45, %v7358_v17 }
 0x33f   : > { %v7408_v62 = vpop.permute.xlu1 %3307  ;;  %v3969_v10 = vsel %vm2089_vm11, %v3937_v26, %v7381_v6 }
 0x340   : > { %v7412_v9 = vpop.permute.xlu0 %2925  ;;  %v4002_v29 = vsel %vm3990_vm0, %v3969_v10, %v7408_v62  ;;  %v7597_v10 = vld [vmem:[#allocation3 + $0x12a] sm:$0xff] }
 0x341   : > { %2939 = vrot.lane.b32.xlu1 %v2820_v11, %s5480_s27 }
 0x342   : > { %3831 = vrot.lane.b32.xlu0 %v7416_v47, %s5486_s16 }
 0x343   : > { %v3816_v19 = vpop.permute.xlu1 %3815 }
 0x344   : > { %v4132_v13 = vsel %vm4122_vm4, %v4099_v43, %v3816_v19  ;;  %v3434_v44 = vpop.permute.xlu0 %3433 }
 0x345   : > { %3067 = vrot.lane.b32.xlu1 %v2757_v51, %s5481_s28  ;;  %5303 = vmatmul.mubr.msk.f32.gmra.mrb[8].mxu1 %vm4171_vm5, %v4132_v13  ;;  %v7451_v51 = vld [vmem:[#allocation3 + $0x110] sm:$0xff]  ;;  %v4034_v2 = vsel %vm4023_vm1, %v4001_v60, %v3434_v44 }
 0x346   : > { %3065 = vrot.lane.b32.xlu0 %v7344_v23, %s5481_s28 }
 0x347   : > { %v7427_v8 = vpop.permute.xlu1 %3053 }
 0x348   : > { %v7429_v14 = vpop.permute.xlu0 %2927  ;;  %v5268_v20 = vpop.f32.mrb[28].mxu0 }
 0x349   : > { %v2446_v42 = vadd.f32 %v7034_v52, %v5268_v20  ;;  %v2440_v25 = vpop.f32.mrb[29].mxu0  ;;  %3195 = vrot.lane.b32.xlu1 %v7362_v36, %s5479_s15 }
 0x34a   : > { %v2441_v30 = vadd.f32 %v7034_v52, %v2440_v25  ;;  %3193 = vrot.lane.b32.xlu0 %v7369_v15, %s5479_s15 }
 0x34b   : > { %v2488_v4 = vmax.f32 %v2446_v42, 0.0  ;;  %v3562_v11 = vpop.permute.xlu1 %3561 }
 0x34c   : > { %v2487_v32 = vmax.f32 %v2441_v30, 0.0  ;;  %v3436_v23 = vpop.permute.xlu0 %3435  ;;  %v4067_v5 = vsel %vm4056_vm2, %v4034_v2, %v3562_v11 }
 0x34d   : > { %2577 = vst.msk [vmem:[#allocation3 + $0x171] sm:$0xff] %vm2491_vm13, %v2488_v4  ;;  %3323 = vrot.lane.b32.xlu1 %v7383_v34, %s5482_s29 }
 0x34e   : > { %2576 = vst.msk [vmem:[#allocation3 + $0x169] sm:$0xff] %vm2491_vm13, %v2487_v32  ;;  %3321 = vrot.lane.b32.xlu0 %v7388_v54, %s5482_s29  ;;  %v7543_v32 = vld [vmem:[#allocation3 + $0x128] sm:$0xff] }
 0x34f   : > { %v7443_v59 = vpop.permute.xlu1 %3181 }
 0x350   : > { %v7445_v35 = vpop.permute.xlu0 %3055 }
 0x351   : > { %3451 = vrot.lane.b32.xlu1 %v7416_v47, %s5483_s30 }
 0x352   : > { %3449 = vrot.lane.b32.xlu0 %v7399_v46, %s5483_s30 }
 0x353   : > { %v3690_v50 = vpop.permute.xlu1 %3689 }
 0x354   : > { %v3564_v63 = vpop.permute.xlu0 %3563  ;;  %v4100_v22 = vsel %vm4089_vm3, %v4067_v5, %v3690_v50  ;;  %v7550_v50 = vld [vmem:[#allocation3 + $0x120] sm:$0xff] }
 0x355   : > { %3579 = vrot.lane.b32.xlu1 %v7451_v51, %s5484_s25 }
 0x356   : > { %3577 = vrot.lane.b32.xlu0 %v7458_v18, %s5484_s25 }
 0x357   : > { %v7466_v16 = vpop.permute.xlu1 %3309 }
 0x358   : > { %v7470_v31 = vpop.permute.xlu0 %3183 }
 0x359   : > { %3707 = vrot.lane.b32.xlu1 %v7472_v56, %s5485_s23 }
 0x35a   : > { %3705 = vrot.lane.b32.xlu0 %v7477_v27, %s5485_s23 }
 0x35b   : > { %v3818_v39 = vpop.permute.xlu1 %3817 }
 0x35c   : > { %v4133_v12 = vsel %vm4122_vm4, %v4100_v22, %v3818_v39  ;;  %v3692_v55 = vpop.permute.xlu0 %3691  ;;  %v3906_v39 = vsel %vm2491_vm13, %v7113_v1, %v7429_v14 }
 0x35d   : > { %2941 = vrot.lane.b32.xlu1 %v7388_v54, %s5480_s27  ;;  %5305 = vmatprep.mubr.msk.f32.mxu1 %vm4171_vm5, %v4133_v12  ;;  %v4035_v54 = vsel %vm4023_vm1, %v4002_v29, %v3436_v23  ;;  %v3905_v23 = vsel %vm2491_vm13, %v7086_v41, %v7412_v9  ;;  %v7562_v41 = vld [vmem:[#allocation3 + $0x129] sm:$0xff] }
 0x35e   : > { %3833 = vrot.lane.b32.xlu0 %v7489_v28, %s5486_s16  ;;  %v4068_v17 = vsel %vm4056_vm2, %v4035_v54, %v3564_v63  ;;  %v3938_v63 = vsel %vm3925_vm15, %v3905_v23, %v7427_v8  ;;  %v7567_v8 = vld [vmem:[#allocation3 + $0x121] sm:$0xff] }
 0x35f   : > { %v7498_v53 = vpop.permute.xlu1 %3311  ;;  %v4101_v6 = vsel %vm4089_vm3, %v4068_v17, %v3692_v55  ;;  %v3970_v3 = vsel %vm2089_vm11, %v3938_v63, %v7443_v59  ;;  %v7579_v12 = vld [vmem:[#allocation3 + $0x122] sm:$0xff]  ;;  %v3939_v55 = vsel %vm3925_vm15, %v3906_v39, %v7445_v35  ;;  %v7656_v63 = vld [vmem:[#allocation3 + $0x139] sm:$0xff] }
 0x360   : > { %v7502_v58 = vpop.permute.xlu0 %2929  ;;  %v4003_v57 = vsel %vm3990_vm0, %v3970_v3, %v7466_v16  ;;  %v3971_v45 = vsel %vm2089_vm11, %v3939_v55, %v7470_v31 }
 0x361   : > { %2943 = vrot.lane.b32.xlu1 %v7383_v34, %s5480_s27  ;;  %v4004_v1 = vsel %vm3990_vm0, %v3971_v45, %v7498_v53 }
 0x362   : > { %3835 = vrot.lane.b32.xlu0 %v7507_v49, %s5486_s16 }
 0x363   : > { %v3820_v33 = vpop.permute.xlu1 %3819 }
 0x364   : > { %v4134_v21 = vsel %vm4122_vm4, %v4101_v6, %v3820_v33  ;;  %v3438_v62 = vpop.permute.xlu0 %3437 }
 0x365   : > { %v5271_v43 = vpop.f32.mrb[30].mxu0  ;;  %3071 = vrot.lane.b32.xlu1 %v7416_v47, %s5481_s28  ;;  %5306 = vmatmul.mubr.msk.f32.gmra.mrb[10].mxu1 %vm4171_vm5, %v4134_v21  ;;  %v4036_v9 = vsel %vm4023_vm1, %v4003_v57, %v3438_v62 }
 0x366   : > { %v2456_v34 = vadd.f32 %v7034_v52, %v5271_v43  ;;  %3069 = vrot.lane.b32.xlu0 %v7399_v46, %s5481_s28  ;;  %v2450_v19 = vpop.f32.mrb[31].mxu0  ;;  %v7629_v43 = vld [vmem:[#allocation3 + $0x140] sm:$0xff] }
 0x367   : > { %v2451_v13 = vadd.f32 %v7034_v52, %v2450_v19  ;;  %v7521_v44 = vpop.permute.xlu1 %3057  ;;  %v7636_v19 = vld [vmem:[#allocation3 + $0x138] sm:$0xff] }
 0x368   : > { %v2490_v20 = vmax.f32 %v2456_v34, 0.0  ;;  %v7523_v42 = vpop.permute.xlu0 %2931  ;;  %v3907_v34 = vsel %vm2491_vm13, %v7157_v48, %v7502_v58 }
 0x369   : > { %v2489_v25 = vmax.f32 %v2451_v13, 0.0  ;;  %3199 = vrot.lane.b32.xlu1 %v7451_v51, %s5479_s15  ;;  %v3940_v13 = vsel %vm3925_vm15, %v3907_v34, %v7521_v44 }
 0x36a   : > { %2579 = vst.msk [vmem:[#allocation3 + $0x189] sm:$0xff] %vm2491_vm13, %v2490_v20  ;;  %3197 = vrot.lane.b32.xlu0 %v7458_v18, %s5479_s15  ;;  %v7645_v20 = vld [vmem:[%s8126_s4] ss:$0 sm:$0xff] }
 0x36b   : > { %2578 = vst.msk [vmem:[#allocation3 + $0x181] sm:$0xff] %vm2491_vm13, %v2489_v25  ;;  %v3566_v46 = vpop.permute.xlu1 %3565 }
 0x36c   : > { %v3440_v47 = vpop.permute.xlu0 %3439  ;;  %v4069_v2 = vsel %vm4056_vm2, %v4036_v9, %v3566_v46 }
 0x36d   : > { %3327 = vrot.lane.b32.xlu1 %v7472_v56, %s5482_s29 }
 0x36e   : > { %3325 = vrot.lane.b32.xlu0 %v7477_v27, %s5482_s29 }
 0x36f   : > { %v7535_v52 = vpop.permute.xlu1 %3185 }
 0x370   : > { %v7537_v30 = vpop.permute.xlu0 %3059  ;;  %v3972_v25 = vsel %vm2089_vm11, %v3940_v13, %v7535_v52 }
 0x371   : > { %3455 = vrot.lane.b32.xlu1 %v7507_v49, %s5483_s30 }
 0x372   : > { %3453 = vrot.lane.b32.xlu0 %v7489_v28, %s5483_s30 }
 0x373   : > { %v3694_v4 = vpop.permute.xlu1 %3693 }
 0x374   : > { %v3568_v11 = vpop.permute.xlu0 %3567  ;;  %v4102_v59 = vsel %vm4089_vm3, %v4069_v2, %v3694_v4  ;;  %v7650_v4 = vld [vmem:[#allocation3 + $0x141] sm:$0xff] }
 0x375   : > { %3583 = vrot.lane.b32.xlu1 %v7543_v32, %s5484_s25 }
 0x376   : > { %3581 = vrot.lane.b32.xlu0 %v7550_v50, %s5484_s25 }
 0x377   : > { %v3314_v61 = vpop.permute.xlu1 %3313 }
 0x378   : > { %v7560_v60 = vpop.permute.xlu0 %3187  ;;  %v4005_v58 = vsel %vm3990_vm0, %v3972_v25, %v3314_v61 }
 0x379   : > { %3711 = vrot.lane.b32.xlu1 %v7562_v41, %s5485_s23 }
 0x37a   : > { %3709 = vrot.lane.b32.xlu0 %v7567_v8, %s5485_s23 }
 0x37b   : > { %v3822_v5 = vpop.permute.xlu1 %3821 }
 0x37c   : > { %v4135_v16 = vsel %vm4122_vm4, %v4102_v59, %v3822_v5  ;;  %v3696_v22 = vpop.permute.xlu0 %3695 }
 0x37d   : > { %2945 = vrot.lane.b32.xlu1 %v7477_v27, %s5480_s27  ;;  %5308 = vmatprep.mubr.msk.f32.mxu1 %vm4171_vm5, %v4135_v16  ;;  %v4037_v27 = vsel %vm4023_vm1, %v4004_v1, %v3440_v47  ;;  %v7666_v16 = vld [vmem:[#allocation3 + $0x13a] sm:$0xff] }
 0x37e   : > { %3837 = vrot.lane.b32.xlu0 %v7579_v12, %s5486_s16  ;;  %v4070_v35 = vsel %vm4056_vm2, %v4037_v27, %v3568_v11 }
 0x37f   : > { %v7588_v26 = vpop.permute.xlu1 %3315  ;;  %v4103_v31 = vsel %vm4089_vm3, %v4070_v35, %v3696_v22  ;;  %v3908_v22 = vsel %vm2491_vm13, %v7185_v37, %v7523_v42  ;;  %v7684_v37 = vld [vmem:[#allocation3 + $0x142] sm:$0xff] }
 0x380   : > { %v7592_v14 = vpop.permute.xlu0 %2933  ;;  %v3941_v55 = vsel %vm3925_vm15, %v3908_v22, %v7537_v30 }
 0x381   : > { %2947 = vrot.lane.b32.xlu1 %v7472_v56, %s5480_s27 }
 0x382   : > { %3839 = vrot.lane.b32.xlu0 %v7597_v10, %s5486_s16 }
 0x383   : > { %v3824_v29 = vpop.permute.xlu1 %3823 }
 0x384   : > { %v4136_v54 = vsel %vm4122_vm4, %v4103_v31, %v3824_v29  ;;  %v3442_v53 = vpop.permute.xlu0 %3441 }
 0x385   : > { %3075 = vrot.lane.b32.xlu1 %v7507_v49, %s5481_s28  ;;  %5309 = vmatmul.mubr.msk.f32.gmra.mrb[12].mxu1 %vm4171_vm5, %v4136_v54  ;;  %v4038_v44 = vsel %vm4023_vm1, %v4005_v58, %v3442_v53  ;;  %v3909_v54 = vsel %vm2491_vm13, %v7229_v7, %v7592_v14 }
 0x386   : > { %3073 = vrot.lane.b32.xlu0 %v7489_v28, %s5481_s28 }
 0x387   : > { %v7609_v56 = vpop.permute.xlu1 %3061 }
 0x388   : > { %v7611_v17 = vpop.permute.xlu0 %2935 }
 0x389   : > { %3203 = vrot.lane.b32.xlu1 %v7543_v32, %s5479_s15  ;;  %v3910_v7 = vsel %vm2491_vm13, %v7257_v38, %v7611_v17 }
 0x38a   : > { %3201 = vrot.lane.b32.xlu0 %v7550_v50, %s5479_s15 }
 0x38b   : > { %v3570_v6 = vpop.permute.xlu1 %3569 }
 0x38c   : > { %v3444_v33 = vpop.permute.xlu0 %3443  ;;  %v4071_v3 = vsel %vm4056_vm2, %v4038_v44, %v3570_v6 }
 0x38d   : > { %3331 = vrot.lane.b32.xlu1 %v7562_v41, %s5482_s29 }
 0x38e   : > { %3329 = vrot.lane.b32.xlu0 %v7567_v8, %s5482_s29 }
 0x38f   : > { %v7621_v49 = vpop.permute.xlu1 %3189 }
 0x390   : > { %v7623_v28 = vpop.permute.xlu0 %3063 }
 0x391   : > { %3459 = vrot.lane.b32.xlu1 %v7597_v10, %s5483_s30 }
 0x392   : > { %3457 = vrot.lane.b32.xlu0 %v7579_v12, %s5483_s30 }
 0x393   : > { %v3698_v21 = vpop.permute.xlu1 %3697 }
 0x394   : > { %v3572_v62 = vpop.permute.xlu0 %3571  ;;  %v4104_v61 = vsel %vm4089_vm3, %v4071_v3, %v3698_v21 }
 0x395   : > { %3587 = vrot.lane.b32.xlu1 %v7629_v43, %s5484_s25 }
 0x396   : > { %3585 = vrot.lane.b32.xlu0 %v7636_v19, %s5484_s25 }
 0x397   : > { %v3318_v48 = vpop.permute.xlu1 %3317 }
 0x398   : > { %v3192_v46 = vpop.permute.xlu0 %3191  ;;  %v5292_v47 = vpop.f32.mrb[0].mxu1 }
 0x399   : > { %v4340_v11 = vadd.f32 %v5292_v47, %v7645_v20  ;;  %v4334_v23 = vpop.f32.mrb[1].mxu1  ;;  %3715 = vrot.lane.b32.xlu1 %v7650_v4, %s5485_s23  ;;  %v7732_v47 = vld [vmem:[#allocation3 + $0x158] sm:$0xff] }
 0x39a   : > { %v4335_v52 = vadd.f32 %v7645_v20, %v4334_v23  ;;  %3713 = vrot.lane.b32.xlu0 %v7656_v63, %s5485_s23 }
 0x39b   : > { %v4494_v57 = vmax.f32 %v4340_v11, 0.0  ;;  %v3826_v9 = vpop.permute.xlu1 %3825  ;;  %v7737_v11 = vld [vmem:[#allocation3 + $0x150] sm:$0xff] }
 0x39c   : > { %v4493_v2 = vmax.f32 %v4335_v52, 0.0  ;;  %v4137_v59 = vsel %vm4122_vm4, %v4104_v61, %v3826_v9  ;;  %v3700_v5 = vpop.permute.xlu0 %3699  ;;  %v7742_v61 = vld [vmem:[#allocation3 + $0x159] sm:$0xff] }
 0x39d   : > { %2949 = vrot.lane.b32.xlu1 %v7567_v8, %s5480_s27  ;;  %5311 = vmatprep.mubr.msk.f32.mxu1 %vm4171_vm5, %v4137_v59  ;;  %v3973_v8 = vsel %vm2089_vm11, %v3941_v55, %v7560_v60 }
 0x39e   : > { %v7672_v39 = vpack.c.bf16 %v4494_v57, %v4493_v2  ;;  %3841 = vrot.lane.b32.xlu0 %v7666_v16, %s5486_s16  ;;  %v4006_v27 = vsel %vm3990_vm0, %v3973_v8, %v7588_v26  ;;  %v7747_v2 = vld [vmem:[#allocation3 + $0x151] sm:$0xff] }
 0x39f   : > { %v3446_v45 = vpop.permute.xlu1 %3445  ;;  %v4039_v42 = vsel %vm4023_vm1, %v4006_v27, %v3444_v33  ;;  %v7754_v8 = vld [vmem:[#allocation3 + $0x152] sm:$0xff] }
 0x3a0   : > { %v3320_v1 = vpop.permute.xlu0 %3319  ;;  %v4072_v30 = vsel %vm4056_vm2, %v4039_v42, %v3572_v62 }
 0x3a1   : > { %2951 = vrot.lane.b32.xlu1 %v7562_v41, %s5480_s27  ;;  %v4105_v31 = vsel %vm4089_vm3, %v4072_v30, %v3700_v5  ;;  %v7762_v30 = vld [vmem:[#allocation3 + $0x15a] sm:$0xff] }
 0x3a2   : > { %3843 = vrot.lane.b32.xlu0 %v7684_v37, %s5486_s16 }
 0x3a3   : > { %v3448_v35 = vpop.permute.xlu1 %3447 }
 0x3a4   : > { %v3828_v60 = vpop.permute.xlu0 %3827 }
 0x3a5   : > { %v4138_v29 = vsel %vm4122_vm4, %v4105_v31, %v3828_v60  ;;  %3079 = vrot.lane.b32.xlu1 %v7597_v10, %s5481_s28  ;;  %v3942_v10 = vsel %vm3925_vm15, %v3909_v54, %v7609_v56  ;;  %v3943_v56 = vsel %vm3925_vm15, %v3910_v7, %v7623_v28 }
 0x3a6   : > { %3077 = vrot.lane.b32.xlu0 %v7579_v12, %s5481_s28  ;;  %5312 = vmatmul.mubr.msk.f32.gmra.mrb[14].mxu1 %vm4171_vm5, %v4138_v29  ;;  %v3974_v12 = vsel %vm2089_vm11, %v3942_v10, %v7621_v49  ;;  %v3975_v62 = vsel %vm2089_vm11, %v3943_v56, %v3192_v46 }
 0x3a7   : > { %v3576_v41 = vpop.permute.xlu1 %3575  ;;  %v4007_v33 = vsel %vm3990_vm0, %v3974_v12, %v3318_v48  ;;  %v4008_v25 = vsel %vm3990_vm0, %v3975_v62, %v3320_v1 }
 0x3a8   : > { %v3574_v26 = vpop.permute.xlu0 %3573  ;;  %v4040_v14 = vsel %vm4023_vm1, %v4007_v33, %v3446_v45  ;;  %v4041_v17 = vsel %vm4023_vm1, %v4008_v25, %v3448_v35 }
 0x3a9   : > { %3207 = vrot.lane.b32.xlu1 %v7629_v43, %s5479_s15  ;;  %v4073_v49 = vsel %vm4056_vm2, %v4040_v14, %v3574_v26  ;;  %v4074_v28 = vsel %vm4056_vm2, %v4041_v17, %v3576_v41 }
 0x3aa   : > { %3205 = vrot.lane.b32.xlu0 %v7636_v19, %s5479_s15 }
 0x3ab   : > { %v3704_v53 = vpop.permute.xlu1 %3703 }
 0x3ac   : > { %v3702_v6 = vpop.permute.xlu0 %3701  ;;  %v4107_v58 = vsel %vm4089_vm3, %v4074_v28, %v3704_v53 }
 0x3ad   : > { %3335 = vrot.lane.b32.xlu1 %v7650_v4, %s5482_s29  ;;  %v4106_v34 = vsel %vm4089_vm3, %v4073_v49, %v3702_v6 }
 0x3ae   : > { %3333 = vrot.lane.b32.xlu0 %v7656_v63, %s5482_s29 }
 0x3af   : > { %v2938_v21 = vpop.permute.xlu1 %2937 }
 0x3b0   : > { %v3830_v13 = vpop.permute.xlu0 %3829 }
 0x3b1   : > { %v4139_v38 = vsel %vm4122_vm4, %v4106_v34, %v3830_v13  ;;  %3463 = vrot.lane.b32.xlu1 %v7684_v37, %s5483_s30  ;;  %v7800_v13 = vld [vmem:[#allocation3 + $0x170] sm:$0xff] }
 0x3b2   : > { %3461 = vrot.lane.b32.xlu0 %v7666_v16, %s5483_s30  ;;  %5314 = vmatprep.mubr.msk.f32.mxu1 %vm4171_vm5, %v4139_v38  ;;  %v7805_v38 = vld [vmem:[#allocation3 + $0x168] sm:$0xff] }
 0x3b3   : > { %v2940_v48 = vpop.permute.xlu1 %2939 }
 0x3b4   : > { %v3832_v46 = vpop.permute.xlu0 %3831 }
 0x3b5   : > { %v4140_v44 = vsel %vm4122_vm4, %v4107_v58, %v3832_v46  ;;  %3591 = vrot.lane.b32.xlu1 %v7732_v47, %s5484_s25  ;;  %v7810_v58 = vld [vmem:[#allocation3 + $0x171] sm:$0xff] }
 0x3b6   : > { %3589 = vrot.lane.b32.xlu0 %v7737_v11, %s5484_s25  ;;  %5315 = vmatmul.mubr.msk.f32.gmra.mrb[16].mxu1 %vm4171_vm5, %v4140_v44  ;;  %v7815_v44 = vld [vmem:[#allocation3 + $0x169] sm:$0xff] }
 0x3b7   : > { %v3068_v23 = vpop.permute.xlu1 %3067 }
 0x3b8   : > { %v3066_v3 = vpop.permute.xlu0 %3065  ;;  %v5295_v52 = vpop.f32.mrb[2].mxu1 }
 0x3b9   : > { %v4350_v57 = vadd.f32 %v5295_v52, %v7645_v20  ;;  %3719 = vrot.lane.b32.xlu1 %v7742_v61, %s5485_s23  ;;  %v4344_v9 = vpop.f32.mrb[3].mxu1 }
 0x3ba   : > { %v4345_v59 = vadd.f32 %v7645_v20, %v4344_v9  ;;  %3717 = vrot.lane.b32.xlu0 %v7747_v2, %s5485_s23 }
 0x3bb   : > { %v4496_v5 = vmax.f32 %v4350_v57, 0.0  ;;  %v3196_v22 = vpop.permute.xlu1 %3195 }
 0x3bc   : > { %v4495_v55 = vmax.f32 %v4345_v59, 0.0  ;;  %v3194_v45 = vpop.permute.xlu0 %3193 }
 0x3bd   : > { %2953 = vrot.lane.b32.xlu1 %v7656_v63, %s5480_s27 }
 0x3be   : > { %v7756_v1 = vpack.c.bf16 %v4496_v5, %v4495_v55  ;;  %3845 = vrot.lane.b32.xlu0 %v7754_v8, %s5486_s16  ;;  %v7822_v5 = vld [vmem:[#allocation3 + $0x16a] sm:$0xff] }
 0x3bf   : > { %v3324_v27 = vpop.permute.xlu1 %3323 }
 0x3c0   : > { %v3322_v42 = vpop.permute.xlu0 %3321 }
 0x3c1   : > { %2955 = vrot.lane.b32.xlu1 %v7650_v4, %s5480_s27  ;;  %v3911_v4 = vsel %vm2491_vm13, %v7301_v40, %v2938_v21 }
 0x3c2   : > { %3847 = vrot.lane.b32.xlu0 %v7762_v30, %s5486_s16  ;;  %v3944_v29 = vsel %vm3925_vm15, %v3911_v4, %v3066_v3 }
 0x3c3   : > { %v3452_v35 = vpop.permute.xlu1 %3451  ;;  %v3976_v26 = vsel %vm2089_vm11, %v3944_v29, %v3194_v45 }
 0x3c4   : > { %v3450_v31 = vpop.permute.xlu0 %3449  ;;  %v4009_v54 = vsel %vm3990_vm0, %v3976_v26, %v3322_v42 }
 0x3c5   : > { %3083 = vrot.lane.b32.xlu1 %v7684_v37, %s5481_s28  ;;  %v4042_v10 = vsel %vm4023_vm1, %v4009_v54, %v3450_v31 }
 0x3c6   : > { %3081 = vrot.lane.b32.xlu0 %v7666_v16, %s5481_s28  ;;  %v3912_v16 = vsel %vm2491_vm13, %v7329_v24, %v2940_v48 }
 0x3c7   : > { %v3580_v63 = vpop.permute.xlu1 %3579  ;;  %v3945_v40 = vsel %vm3925_vm15, %v3912_v16, %v3068_v23 }
 0x3c8   : > { %v3578_v60 = vpop.permute.xlu0 %3577  ;;  %v3977_v6 = vsel %vm2089_vm11, %v3945_v40, %v3196_v22 }
 0x3c9   : > { %3211 = vrot.lane.b32.xlu1 %v7732_v47, %s5479_s15  ;;  %v4075_v53 = vsel %vm4056_vm2, %v4042_v10, %v3578_v60  ;;  %v4010_v14 = vsel %vm3990_vm0, %v3977_v6, %v3324_v27  ;;  %v7830_v27 = vld [vmem:[#allocation3 + $0x172] sm:$0xff] }
 0x3ca   : > { %3209 = vrot.lane.b32.xlu0 %v7737_v11, %s5479_s15  ;;  %v4043_v24 = vsel %vm4023_vm1, %v4010_v14, %v3452_v35  ;;  %v2802_v14 = vld [vmem:[#allocation3 + $0x188] sm:$0xff] }
 0x3cb   : > { %v3708_v41 = vpop.permute.xlu1 %3707  ;;  %v4076_v49 = vsel %vm4056_vm2, %v4043_v24, %v3580_v63  ;;  %v2801_v24 = vld [vmem:[#allocation3 + $0x180] sm:$0xff] }
 0x3cc   : > { %v3706_v37 = vpop.permute.xlu0 %3705  ;;  %v4109_v62 = vsel %vm4089_vm3, %v4076_v49, %v3708_v41 }
 0x3cd   : > { %3339 = vrot.lane.b32.xlu1 %v7742_v61, %s5482_s29  ;;  %v4108_v33 = vsel %vm4089_vm3, %v4075_v53, %v3706_v37 }
 0x3ce   : > { %3337 = vrot.lane.b32.xlu0 %v7747_v2, %s5482_s29 }
 0x3cf   : > { %v2942_v12 = vpop.permute.xlu1 %2941 }
 0x3d0   : > { %v3834_v7 = vpop.permute.xlu0 %3833 }
 0x3d1   : > { %v4141_v56 = vsel %vm4122_vm4, %v4108_v33, %v3834_v7  ;;  %3467 = vrot.lane.b32.xlu1 %v7762_v30, %s5483_s30 }
 0x3d2   : > { %3465 = vrot.lane.b32.xlu0 %v7754_v8, %s5483_s30  ;;  %5317 = vmatprep.mubr.msk.f32.mxu1 %vm4171_vm5, %v4141_v56 }
 0x3d3   : > { %v2944_v21 = vpop.permute.xlu1 %2943 }
 0x3d4   : > { %v3836_v34 = vpop.permute.xlu0 %3835 }
 0x3d5   : > { %v4142_v25 = vsel %vm4122_vm4, %v4109_v62, %v3836_v34  ;;  %3595 = vrot.lane.b32.xlu1 %v7800_v13, %s5484_s25  ;;  %v2834_v34 = vld [vmem:[#allocation3 + $0x189] sm:$0xff] }
 0x3d6   : > { %3593 = vrot.lane.b32.xlu0 %v7805_v38, %s5484_s25  ;;  %5318 = vmatmul.mubr.msk.f32.gmra.mrb[18].mxu1 %vm4171_vm5, %v4142_v25 }
 0x3d7   : > { %v3072_v17 = vpop.permute.xlu1 %3071 }
 0x3d8   : > { %v3070_v28 = vpop.permute.xlu0 %3069  ;;  %v5298_v48 = vpop.f32.mrb[4].mxu1 }
 0x3d9   : > { %v4360_v46 = vadd.f32 %v5298_v48, %v7645_v20  ;;  %3723 = vrot.lane.b32.xlu1 %v7810_v58, %s5485_s23  ;;  %v4354_v23 = vpop.f32.mrb[5].mxu1 }
 0x3da   : > { %3721 = vrot.lane.b32.xlu0 %v7815_v44, %s5485_s23  ;;  %v4355_v3 = vadd.f32 %v7645_v20, %v4354_v23 }
 0x3db   : > { %v4498_v52 = vmax.f32 %v4360_v46, 0.0  ;;  %v3200_v57 = vpop.permute.xlu1 %3199 }
 0x3dc   : > { %v4497_v9 = vmax.f32 %v4355_v3, 0.0  ;;  %v3198_v59 = vpop.permute.xlu0 %3197 }
 0x3dd   : > { %2957 = vrot.lane.b32.xlu1 %v7747_v2, %s5480_s27 }
 0x3de   : > { %v7824_v22 = vpack.c.bf16 %v4498_v52, %v4497_v9  ;;  %3849 = vrot.lane.b32.xlu0 %v7822_v5, %s5486_s16 }
 0x3df   : > { %v3328_v55 = vpop.permute.xlu1 %3327 }
 0x3e0   : > { %v3326_v45 = vpop.permute.xlu0 %3325 }
 0x3e1   : > { %2959 = vrot.lane.b32.xlu1 %v7742_v61, %s5480_s27  ;;  %v3913_v61 = vsel %vm2491_vm13, %v7369_v15, %v2942_v12 }
 0x3e2   : > { %3851 = vrot.lane.b32.xlu0 %v7830_v27, %s5486_s16  ;;  %v3946_v63 = vsel %vm3925_vm15, %v3913_v61, %v3070_v28 }
 0x3e3   : > { %v3456_v42 = vpop.permute.xlu1 %3455  ;;  %v3978_v4 = vsel %vm2089_vm11, %v3946_v63, %v3198_v59 }
 0x3e4   : > { %v3454_v35 = vpop.permute.xlu0 %3453  ;;  %v4011_v29 = vsel %vm3990_vm0, %v3978_v4, %v3326_v45  ;;  %v2866_v45 = vld [vmem:[#allocation3 + $0x18a] sm:$0xff] }
 0x3e5   : > { %3087 = vrot.lane.b32.xlu1 %v7762_v30, %s5481_s28  ;;  %v4044_v41 = vsel %vm4023_vm1, %v4011_v29, %v3454_v35 }
 0x3e6   : > { %3085 = vrot.lane.b32.xlu0 %v7754_v8, %s5481_s28  ;;  %v3914_v8 = vsel %vm2491_vm13, %v7362_v36, %v2944_v21 }
 0x3e7   : > { %v3584_v2 = vpop.permute.xlu1 %3583  ;;  %v3947_v15 = vsel %vm3925_vm15, %v3914_v8, %v3072_v17  ;;  %v2833_v17 = vld [vmem:[#allocation3 + $0x181] sm:$0xff] }
 0x3e8   : > { %v3582_v31 = vpop.permute.xlu0 %3581  ;;  %v3979_v54 = vsel %vm2089_vm11, %v3947_v15, %v3200_v57  ;;  %v2865_v57 = vld [vmem:[#allocation3 + $0x182] sm:$0xff] }
 0x3e9   : > { %3215 = vrot.lane.b32.xlu1 %v7800_v13, %s5479_s15  ;;  %v4077_v26 = vsel %vm4056_vm2, %v4044_v41, %v3582_v31  ;;  %v4012_v40 = vsel %vm3990_vm0, %v3979_v54, %v3328_v55  ;;  %v2804_v54 = vld [vmem:[#allocation3 + $0x1a0] sm:$0xff] }
 0x3ea   : > { %3213 = vrot.lane.b32.xlu0 %v7805_v38, %s5479_s15  ;;  %v4045_v36 = vsel %vm4023_vm1, %v4012_v40, %v3456_v42  ;;  %v2803_v40 = vld [vmem:[#allocation3 + $0x198] sm:$0xff] }
 0x3eb   : > { %v3712_v60 = vpop.permute.xlu1 %3711  ;;  %v4078_v12 = vsel %vm4056_vm2, %v4045_v36, %v3584_v2 }
 0x3ec   : > { %v3710_v30 = vpop.permute.xlu0 %3709  ;;  %v4111_v33 = vsel %vm4089_vm3, %v4078_v12, %v3712_v60 }
 0x3ed   : > { %3343 = vrot.lane.b32.xlu1 %v7810_v58, %s5482_s29  ;;  %v4110_v16 = vsel %vm4089_vm3, %v4077_v26, %v3710_v30 }
 0x3ee   : > { %3341 = vrot.lane.b32.xlu0 %v7815_v44, %s5482_s29 }
 0x3ef   : > { %v2946_v37 = vpop.permute.xlu1 %2945 }
 0x3f0   : > { %v3838_v10 = vpop.permute.xlu0 %3837  ;;  %v3915_v31 = vsel %vm2491_vm13, %v7458_v18, %v2946_v37 }
 0x3f1   : > { %v4143_v53 = vsel %vm4122_vm4, %v4110_v16, %v3838_v10  ;;  %3471 = vrot.lane.b32.xlu1 %v7830_v27, %s5483_s30 }
 0x3f2   : > { %3469 = vrot.lane.b32.xlu0 %v7822_v5, %s5483_s30  ;;  %5320 = vmatprep.mubr.msk.f32.mxu1 %vm4171_vm5, %v4143_v53 }
 0x3f3   : > { %v2948_v6 = vpop.permute.xlu1 %2947 }
 0x3f4   : > { %v3840_v7 = vpop.permute.xlu0 %3839 }
 0x3f5   : > { %v4144_v56 = vsel %vm4122_vm4, %v4111_v33, %v3840_v7  ;;  %3599 = vrot.lane.b32.xlu1 %v2802_v14, %s5484_s25  ;;  %v2835_v7 = vld [vmem:[#allocation3 + $0x199] sm:$0xff] }
 0x3f6   : > { %3597 = vrot.lane.b32.xlu0 %v2801_v24, %s5484_s25  ;;  %5321 = vmatmul.mubr.msk.f32.gmra.mrb[20].mxu1 %vm4171_vm5, %v4144_v56 }
 0x3f7   : > { %v3076_v49 = vpop.permute.xlu1 %3075 }
 0x3f8   : > { %v3074_v21 = vpop.permute.xlu0 %3073  ;;  %v5301_v62 = vpop.f32.mrb[6].mxu1 }
 0x3f9   : > { %v4370_v25 = vadd.f32 %v5301_v62, %v7645_v20  ;;  %3727 = vrot.lane.b32.xlu1 %v2834_v34, %s5485_s23  ;;  %v4364_v28 = vpop.f32.mrb[7].mxu1  ;;  %v2868_v62 = vld [vmem:[#allocation3 + $0x1a2] sm:$0xff] }
 0x3fa   : > { %3725 = vrot.lane.b32.xlu0 %v2833_v17, %s5485_s23  ;;  %v4365_v48 = vadd.f32 %v7645_v20, %v4364_v28 }
 0x3fb   : > { %v4500_v46 = vmax.f32 %v4370_v25, 0.0  ;;  %v3204_v23 = vpop.permute.xlu1 %3203 }
 0x3fc   : > { %v4499_v3 = vmax.f32 %v4365_v48, 0.0  ;;  %v3202_v52 = vpop.permute.xlu0 %3201 }
 0x3fd   : > { %2961 = vrot.lane.b32.xlu1 %v7815_v44, %s5480_s27 }
 0x3fe   : > { %v7878_v9 = vpack.c.bf16 %v4500_v46, %v4499_v3  ;;  %3853 = vrot.lane.b32.xlu0 %v2865_v57, %s5486_s16 }
 0x3ff   : > { %v3332_v59 = vpop.permute.xlu1 %3331 }
 0x400   : > { %v3330_v55 = vpop.permute.xlu0 %3329 }
 0x401   : > { %2963 = vrot.lane.b32.xlu1 %v7810_v58, %s5480_s27  ;;  %v3948_v58 = vsel %vm3925_vm15, %v3915_v31, %v3074_v21 }
 0x402   : > { %3855 = vrot.lane.b32.xlu0 %v2866_v45, %s5486_s16  ;;  %v3980_v63 = vsel %vm2089_vm11, %v3948_v58, %v3202_v52 }
 0x403   : > { %v3460_v42 = vpop.permute.xlu1 %3459 }
 0x404   : > { %v3458_v35 = vpop.permute.xlu0 %3457 }
 0x405   : > { %3091 = vrot.lane.b32.xlu1 %v7830_v27, %s5481_s28  ;;  %v4013_v27 = vsel %vm3990_vm0, %v3980_v63, %v3330_v55 }
 0x406   : > { %3089 = vrot.lane.b32.xlu0 %v7822_v5, %s5481_s28  ;;  %v3916_v5 = vsel %vm2491_vm13, %v7451_v51, %v2948_v6  ;;  %v4046_v4 = vsel %vm4023_vm1, %v4013_v27, %v3458_v35  ;;  %v2836_v6 = vld [vmem:[#allocation3 + $0x1a1] sm:$0xff] }
 0x407   : > { %v3588_v44 = vpop.permute.xlu1 %3587  ;;  %v3949_v18 = vsel %vm3925_vm15, %v3916_v5, %v3076_v49 }
 0x408   : > { %v3586_v2 = vpop.permute.xlu0 %3585  ;;  %v3981_v8 = vsel %vm2089_vm11, %v3949_v18, %v3204_v23 }
 0x409   : > { %3219 = vrot.lane.b32.xlu1 %v2802_v14, %s5479_s15  ;;  %v4079_v30 = vsel %vm4056_vm2, %v4046_v4, %v3586_v2  ;;  %v4014_v26 = vsel %vm3990_vm0, %v3981_v8, %v3332_v59 }
 0x40a   : > { %3217 = vrot.lane.b32.xlu0 %v2801_v24, %s5479_s15  ;;  %v4047_v51 = vsel %vm4023_vm1, %v4014_v26, %v3460_v42  ;;  %s5099_s15 = sshll.u32 %s8138_s22, 4 }
 0x40b   : > { %v3716_v61 = vpop.permute.xlu1 %3715  ;;  %v4080_v16 = vsel %vm4056_vm2, %v4047_v51, %v3588_v44 }
 0x40c   : > { %v3714_v60 = vpop.permute.xlu0 %3713  ;;  %v4113_v53 = vsel %vm4089_vm3, %v4080_v16, %v3716_v61 }
 0x40d   : > { %3347 = vrot.lane.b32.xlu1 %v2834_v34, %s5482_s29  ;;  %v4112_v41 = vsel %vm4089_vm3, %v4079_v30, %v3714_v60 }
 0x40e   : > { %3345 = vrot.lane.b32.xlu0 %v2833_v17, %s5482_s29  ;;  %v2867_v17 = vld [vmem:[#allocation3 + $0x19a] sm:$0xff]  ;;  %s420_s29 = scalar_lea.vmem %s8133_s11, %s5099_s15 }
 0x40f   : > { %v2950_v29 = vpop.permute.xlu1 %2949 }
 0x410   : > { %v3842_v15 = vpop.permute.xlu0 %3841 }
 0x411   : > { %v4145_v37 = vsel %vm4122_vm4, %v4112_v41, %v3842_v15  ;;  %3475 = vrot.lane.b32.xlu1 %v2866_v45, %s5483_s30  ;;  %v3917_v45 = vsel %vm2491_vm13, %v7550_v50, %v2950_v29 }
 0x412   : > { %3473 = vrot.lane.b32.xlu0 %v2865_v57, %s5483_s30  ;;  %5323 = vmatprep.mubr.msk.f32.mxu1 %vm4171_vm5, %v4145_v37 }
 0x413   : > { %v2952_v10 = vpop.permute.xlu1 %2951 }
 0x414   : > { %v3844_v36 = vpop.permute.xlu0 %3843  ;;  %v3918_v58 = vsel %vm2491_vm13, %v7543_v32, %v2952_v10 }
 0x415   : > { %v4146_v12 = vsel %vm4122_vm4, %v4113_v53, %v3844_v36  ;;  %3603 = vrot.lane.b32.xlu1 %v2804_v54, %s5484_s25 }
 0x416   : > { %3601 = vrot.lane.b32.xlu0 %v2803_v40, %s5484_s25  ;;  %5324 = vmatmul.mubr.msk.f32.gmra.mrb[22].mxu1 %vm4171_vm5, %v4146_v12 }
 0x417   : > { %v3080_v33 = vpop.permute.xlu1 %3079 }
 0x418   : > { %v3078_v14 = vpop.permute.xlu0 %3077  ;;  %v5304_v56 = vpop.f32.mrb[8].mxu1  ;;  %v3951_v63 = vsel %vm3925_vm15, %v3918_v58, %v3080_v33 }
 0x419   : > { %v4380_v24 = vadd.f32 %v5304_v56, %v7645_v20  ;;  %3731 = vrot.lane.b32.xlu1 %v2836_v6, %s5485_s23  ;;  %v4374_v49 = vpop.f32.mrb[9].mxu1  ;;  %v3950_v42 = vsel %vm3925_vm15, %v3917_v45, %v3078_v14 }
 0x41a   : > { %3729 = vrot.lane.b32.xlu0 %v2835_v7, %s5485_s23  ;;  %v4375_v21 = vadd.f32 %v7645_v20, %v4374_v49 }
 0x41b   : > { %v4502_v34 = vmax.f32 %v4380_v24, 0.0  ;;  %v3208_v25 = vpop.permute.xlu1 %3207 }
 0x41c   : > { %v4501_v28 = vmax.f32 %v4375_v21, 0.0  ;;  %v3206_v48 = vpop.permute.xlu0 %3205  ;;  %v3983_v50 = vsel %vm2089_vm11, %v3951_v63, %v3208_v25 }
 0x41d   : > { %3859 = vrot.lane.b32.xlu1 %v2868_v62, %s5486_s16  ;;  %v3982_v44 = vsel %vm2089_vm11, %v3950_v42, %v3206_v48 }
 0x41e   : > { %v7921_v46 = vpack.c.bf16 %v4502_v34, %v4501_v28  ;;  %3857 = vrot.lane.b32.xlu0 %v2867_v17, %s5486_s16 }
 0x41f   : > { %v3336_v23 = vpop.permute.xlu1 %3335 }
 0x420   : > { %v3334_v3 = vpop.permute.xlu0 %3333  ;;  %v4016_v18 = vsel %vm3990_vm0, %v3983_v50, %v3336_v23 }
 0x421   : > { %v4015_v31 = vsel %vm3990_vm0, %v3982_v44, %v3334_v3 }
 0x423   : > { %v3464_v52 = vpop.permute.xlu1 %3463 }
 0x424   : > { %v3462_v57 = vpop.permute.xlu0 %3461  ;;  %v4049_v29 = vsel %vm4023_vm1, %v4016_v18, %v3464_v52 }
 0x425   : > { %v4048_v61 = vsel %vm4023_vm1, %v4015_v31, %v3462_v57 }
 0x427   : > { %v3592_v59 = vpop.permute.xlu1 %3591 }
 0x428   : > { %v3590_v55 = vpop.permute.xlu0 %3589  ;;  %v4082_v32 = vsel %vm4056_vm2, %v4049_v29, %v3592_v59 }
 0x429   : > { %v4081_v60 = vsel %vm4056_vm2, %v4048_v61, %v3590_v55 }
 0x42b   : > { %v3720_v35 = vpop.permute.xlu1 %3719 }
 0x42c   : > { %v3718_v2 = vpop.permute.xlu0 %3717  ;;  %v4115_v41 = vsel %vm4089_vm3, %v4082_v32, %v3720_v35 }
 0x42d   : > { %v4114_v5 = vsel %vm4089_vm3, %v4081_v60, %v3718_v2 }
 0x42f   : > { %v2954_v27 = vpop.permute.xlu1 %2953 }
 0x430   : > { %v3846_v4 = vpop.permute.xlu0 %3845  ;;  %v3919_v62 = vsel %vm2491_vm13, %v7636_v19, %v2954_v27 }
 0x431   : > { %v4147_v30 = vsel %vm4122_vm4, %v4114_v5, %v3846_v4 }
 0x432   : > { %5326 = vmatprep.mubr.msk.f32.mxu1 %vm4171_vm5, %v4147_v30 }
 0x433   : > { %v2956_v8 = vpop.permute.xlu1 %2955 }
 0x434   : > { %v3848_v15 = vpop.permute.xlu0 %3847  ;;  %v3920_v23 = vsel %vm2491_vm13, %v7629_v43, %v2956_v8 }
 0x435   : > { %v4148_v26 = vsel %vm4122_vm4, %v4115_v41, %v3848_v15 }
 0x436   : > { %5327 = vmatmul.mubr.msk.f32.gmra.mrb[24].mxu1 %vm4171_vm5, %v4148_v26 }
 0x437   : > { %v3084_v37 = vpop.permute.xlu1 %3083 }
 0x438   : > { %v3082_v51 = vpop.permute.xlu0 %3081  ;;  %v5307_v54 = vpop.f32.mrb[10].mxu1  ;;  %v3953_v52 = vsel %vm3925_vm15, %v3920_v23, %v3084_v37 }
 0x439   : > { %v4390_v16 = vadd.f32 %v5307_v54, %v7645_v20  ;;  %v4384_v10 = vpop.f32.mrb[11].mxu1  ;;  %v3952_v34 = vsel %vm3925_vm15, %v3919_v62, %v3082_v51 }
 0x43a   : > { %v4385_v40 = vadd.f32 %v7645_v20, %v4384_v10 }
 0x43b   : > { %v4504_v53 = vmax.f32 %v4390_v16, 0.0  ;;  %v3212_v36 = vpop.permute.xlu1 %3211 }
 0x43c   : > { %v4503_v12 = vmax.f32 %v4385_v40, 0.0  ;;  %v3210_v6 = vpop.permute.xlu0 %3209  ;;  %v3985_v19 = vsel %vm2089_vm11, %v3953_v52, %v3212_v36 }
 0x43d   : > { %v3984_v17 = vsel %vm2089_vm11, %v3952_v34, %v3210_v6 }
 0x43e   : > { %v7946_v33 = vpack.c.bf16 %v4504_v53, %v4503_v12 }
 0x43f   : > { %v3340_v7 = vpop.permute.xlu1 %3339 }
 0x440   : > { %v3338_v14 = vpop.permute.xlu0 %3337  ;;  %v4018_v42 = vsel %vm3990_vm0, %v3985_v19, %v3340_v7 }
 0x441   : > { %v4017_v48 = vsel %vm3990_vm0, %v3984_v17, %v3338_v14 }
 0x443   : > { %v3468_v56 = vpop.permute.xlu1 %3467 }
 0x444   : > { %v3466_v24 = vpop.permute.xlu0 %3465  ;;  %v4051_v44 = vsel %vm4023_vm1, %v4018_v42, %v3468_v56 }
 0x445   : > { %v4050_v3 = vsel %vm4023_vm1, %v4017_v48, %v3466_v24 }
 0x447   : > { %v3596_v49 = vpop.permute.xlu1 %3595 }
 0x448   : > { %v3594_v21 = vpop.permute.xlu0 %3593  ;;  %v4084_v43 = vsel %vm4056_vm2, %v4051_v44, %v3596_v49 }
 0x449   : > { %v4083_v57 = vsel %vm4056_vm2, %v4050_v3, %v3594_v21 }
 0x44b   : > { %v3724_v25 = vpop.permute.xlu1 %3723 }
 0x44c   : > { %v3722_v28 = vpop.permute.xlu0 %3721  ;;  %v4117_v31 = vsel %vm4089_vm3, %v4084_v43, %v3724_v25 }
 0x44d   : > { %v4116_v55 = vsel %vm4089_vm3, %v4083_v57, %v3722_v28 }
 0x44f   : > { %v2958_v59 = vpop.permute.xlu1 %2957 }
 0x450   : > { %v3850_v45 = vpop.permute.xlu0 %3849  ;;  %v3921_v16 = vsel %vm2491_vm13, %v7737_v11, %v2958_v59 }
 0x451   : > { %v4149_v35 = vsel %vm4122_vm4, %v4116_v55, %v3850_v45 }
 0x452   : > { %5329 = vmatprep.mubr.msk.f32.mxu1 %vm4171_vm5, %v4149_v35 }
 0x453   : > { %v2960_v2 = vpop.permute.xlu1 %2959 }
 0x454   : > { %v3852_v58 = vpop.permute.xlu0 %3851  ;;  %v3922_v6 = vsel %vm2491_vm13, %v7732_v47, %v2960_v2 }
 0x455   : > { %v4150_v61 = vsel %vm4122_vm4, %v4117_v31, %v3852_v58 }
 0x456   : > { %5330 = vmatmul.mubr.msk.f32.gmra.mrb[26].mxu1 %vm4171_vm5, %v4150_v61 }
 0x457   : > { %v3088_v63 = vpop.permute.xlu1 %3087 }
 0x458   : > { %v3086_v60 = vpop.permute.xlu0 %3085  ;;  %v5310_v27 = vpop.f32.mrb[12].mxu1  ;;  %v3955_v14 = vsel %vm3925_vm15, %v3922_v6, %v3088_v63 }
 0x459   : > { %v4400_v50 = vadd.f32 %v5310_v27, %v7645_v20  ;;  %v4394_v5 = vpop.f32.mrb[13].mxu1  ;;  %v3954_v10 = vsel %vm3925_vm15, %v3921_v16, %v3086_v60 }
 0x45a   : > { %v4395_v4 = vadd.f32 %v7645_v20, %v4394_v5 }
 0x45b   : > { %v4506_v18 = vmax.f32 %v4400_v50, 0.0  ;;  %v3216_v30 = vpop.permute.xlu1 %3215 }
 0x45c   : > { %v4505_v29 = vmax.f32 %v4395_v4, 0.0  ;;  %v3214_v32 = vpop.permute.xlu0 %3213  ;;  %v3987_v11 = vsel %vm2089_vm11, %v3955_v14, %v3216_v30 }
 0x45d   : > { %v3986_v53 = vsel %vm2089_vm11, %v3954_v10, %v3214_v32 }
 0x45e   : > { %v7970_v8 = vpack.c.bf16 %v4506_v18, %v4505_v29 }
 0x45f   : > { %v3344_v41 = vpop.permute.xlu1 %3343 }
 0x460   : > { %v3342_v15 = vpop.permute.xlu0 %3341  ;;  %v4020_v62 = vsel %vm3990_vm0, %v3987_v11, %v3344_v41 }
 0x461   : > { %v4019_v12 = vsel %vm3990_vm0, %v3986_v53, %v3342_v15 }
 0x463   : > { %v3472_v26 = vpop.permute.xlu1 %3471 }
 0x464   : > { %v3470_v37 = vpop.permute.xlu0 %3469  ;;  %v4053_v25 = vsel %vm4023_vm1, %v4020_v62, %v3472_v26 }
 0x465   : > { %v4052_v7 = vsel %vm4023_vm1, %v4019_v12, %v3470_v37 }
 0x467   : > { %v3600_v51 = vpop.permute.xlu1 %3599 }
 0x468   : > { %v3598_v54 = vpop.permute.xlu0 %3597  ;;  %v4086_v47 = vsel %vm4056_vm2, %v4053_v25, %v3600_v51 }
 0x469   : > { %v4085_v56 = vsel %vm4056_vm2, %v4052_v7, %v3598_v54 }
 0x46b   : > { %v3728_v40 = vpop.permute.xlu1 %3727 }
 0x46c   : > { %v3726_v36 = vpop.permute.xlu0 %3725  ;;  %v4119_v28 = vsel %vm4089_vm3, %v4086_v47, %v3728_v40 }
 0x46d   : > { %v4118_v49 = vsel %vm4089_vm3, %v4085_v56, %v3726_v36 }
 0x46f   : > { %v2962_v24 = vpop.permute.xlu1 %2961 }
 0x470   : > { %v3854_v21 = vpop.permute.xlu0 %3853  ;;  %v3923_v5 = vsel %vm2491_vm13, %v7805_v38, %v2962_v24 }
 0x471   : > { %v4151_v34 = vsel %vm4122_vm4, %v4118_v49, %v3854_v21 }
 0x472   : > { %5332 = vmatprep.mubr.msk.f32.mxu1 %vm4171_vm5, %v4151_v34 }
 0x473   : > { %v2964_v17 = vpop.permute.xlu1 %2963 }
 0x474   : > { %v3856_v48 = vpop.permute.xlu0 %3855  ;;  %v3924_v27 = vsel %vm2491_vm13, %v7800_v13, %v2964_v17 }
 0x475   : > { %v4152_v23 = vsel %vm4122_vm4, %v4119_v28, %v3856_v48 }
 0x476   : > { %5333 = vmatmul.mubr.msk.f32.gmra.mrb[28].mxu1 %vm4171_vm5, %v4152_v23 }
 0x477   : > { %v3092_v3 = vpop.permute.xlu1 %3091 }
 0x478   : > { %v3090_v52 = vpop.permute.xlu0 %3089  ;;  %v3957_v4 = vsel %vm3925_vm15, %v3924_v27, %v3092_v3 }
 0x479   : > { %v5313_v57 = vpop.f32.mrb[14].mxu1  ;;  %v3956_v29 = vsel %vm3925_vm15, %v3923_v5, %v3090_v52 }
 0x47a   : > { %v4410_v59 = vadd.f32 %v5313_v57, %v7645_v20  ;;  %v4404_v19 = vpop.f32.mrb[15].mxu1 }
 0x47b   : > { %v4405_v55 = vadd.f32 %v7645_v20, %v4404_v19  ;;  %v3220_v45 = vpop.permute.xlu1 %3219 }
 0x47c   : > { %v4508_v42 = vmax.f32 %v4410_v59, 0.0  ;;  %v3218_v35 = vpop.permute.xlu0 %3217  ;;  %v3989_v32 = vsel %vm2089_vm11, %v3957_v4, %v3220_v45 }
 0x47d   : > { %v4507_v44 = vmax.f32 %v4405_v55, 0.0  ;;  %v3988_v26 = vsel %vm2089_vm11, %v3956_v29, %v3218_v35 }
 0x47f   : > { %v7994_v43 = vpack.c.bf16 %v4508_v42, %v4507_v44  ;;  %v3348_v2 = vpop.permute.xlu1 %3347  ;;  %v4525_v44 = vld [vmem:[%s8127_s5] sm:$0xff] }
 0x480   : > { %v3346_v31 = vpop.permute.xlu0 %3345  ;;  %v4022_v13 = vsel %vm3990_vm0, %v3989_v32, %v3348_v2  ;;  %5209 = vmatprep.mubr.msk.f32.mxu0 %vm3925_vm15, %v4525_v44  ;;  %v4528_v2 = vld [vmem:[%s8128_s6 + $0x8] sm:$0xff] }
 0x481   : > { %v4021_v38 = vsel %vm3990_vm0, %v3988_v26, %v3346_v31  ;;  %v5487_v31 = vmov 0  }
 0x482   : > { %5454 = vset.pattern.permute.xlu0 %v5487_v31  ;;  %5455 = vset.pattern.permute.xlu1 %v5487_v31 }
 0x483   : > { %v3476_v58 = vpop.permute.xlu1 %3475  ;;  %4536 = vperm.xlu1 %5455, %v4528_v2   ;;  %v4814_v2 = vld [vmem:[%s8132_s10] sm:$0xf] }
 0x484   : > { %v3474_v61 = vpop.permute.xlu0 %3473  ;;  %v4055_v54 = vsel %vm4023_vm1, %v4022_v13, %v3476_v58 }
 0x485   : > { %v4054_v10 = vsel %vm4023_vm1, %v4021_v38, %v3474_v61 }
 0x487   : > { %v3604_v63 = vpop.permute.xlu1 %3603 }
 0x488   : > { %v3602_v60 = vpop.permute.xlu0 %3601  ;;  %v4088_v40 = vsel %vm4056_vm2, %v4055_v54, %v3604_v63 }
 0x489   : > { %v5316_v50 = vpop.f32.mrb[16].mxu1  ;;  %v4087_v36 = vsel %vm4056_vm2, %v4054_v10, %v3602_v60 }
 0x48a   : > { %v4420_v18 = vadd.f32 %v5316_v50, %v7645_v20  ;;  %v4414_v30 = vpop.f32.mrb[17].mxu1 }
 0x48b   : > { %v4415_v41 = vadd.f32 %v7645_v20, %v4414_v30  ;;  %v3732_v15 = vpop.permute.xlu1 %3731 }
 0x48c   : > { %v4510_v37 = vmax.f32 %v4420_v18, 0.0  ;;  %v3730_v51 = vpop.permute.xlu0 %3729  ;;  %v4121_v6 = vsel %vm4089_vm3, %v4088_v40, %v3732_v15 }
 0x48d   : > { %v4509_v16 = vmax.f32 %v4415_v41, 0.0  ;;  %v4120_v14 = vsel %vm4089_vm3, %v4087_v36, %v3730_v51 }
 0x48f   : > { %v5371_v12 = vpack.c.bf16 %v4510_v37, %v4509_v16  ;;  %v3860_v7 = vpop.permute.xlu1 %3859 }
 0x490   : > { %v4154_v56 = vsel %vm4122_vm4, %v4121_v6, %v3860_v7  ;;  %v3858_v24 = vpop.permute.xlu0 %3857 }
 0x491   : > { %v4153_v11 = vsel %vm4122_vm4, %v4120_v14, %v3858_v24  ;;  %5373 = vmatprep.subr.msk.bf16.mxu0 %vm8013_vm6, %v5371_v12 }
 0x492   : > { %5335 = vmatprep.mubr.msk.f32.mxu1 %vm4171_vm5, %v4153_v11  ;;  %5376 = vmatpush3.bf16.xpose.msk.msra.mxu0 %vm8013_vm6, %v7672_v39 }
 0x493   : > { %5336 = vmatmul.mubr.msk.f32.gmra.mrb[30].mxu1 %vm4171_vm5, %v4154_v56 }
 0x494   : > { %5342 = vmatprep.mubr.msk.f32.mxu1 %vm5489_vm7, %v5470_v0 }
 0x4a9   : > { %v5319_v49 = vpop.f32.mrb[18].mxu1 }
 0x4aa   : > { %v4430_v21 = vadd.f32 %v5319_v49, %v7645_v20  ;;  %v4424_v62 = vpop.f32.mrb[19].mxu1 }
 0x4ab   : > { %v4425_v34 = vadd.f32 %v7645_v20, %v4424_v62 }
 0x4ac   : > { %v4512_v25 = vmax.f32 %v4430_v21, 0.0 }
 0x4ad   : > { %v4511_v47 = vmax.f32 %v4425_v34, 0.0 }
 0x4af   : > { %v5377_v17 = vpack.c.bf16 %v4512_v25, %v4511_v47 }
 0x4b1   : > { %5379 = vmatprep.subr.msk.bf16.mxu0 %vm8013_vm6, %v5377_v17 }
 0x4b2   : > { %5382 = vmatpush3.bf16.xpose.msk.msra.mxu0 %vm8013_vm6, %v7756_v1 }
 0x4c9   : > { %v5322_v28 = vpop.f32.mrb[20].mxu1 }
 0x4ca   : > { %v4440_v39 = vadd.f32 %v5322_v28, %v7645_v20  ;;  %v4434_v48 = vpop.f32.mrb[21].mxu1 }
 0x4cb   : > { %v4435_v23 = vadd.f32 %v7645_v20, %v4434_v48 }
 0x4cc   : > { %v4514_v3 = vmax.f32 %v4440_v39, 0.0 }
 0x4cd   : > { %v4513_v52 = vmax.f32 %v4435_v23, 0.0  ;;  %v4722_v23 = vld [vmem:[%s8129_s7] sm:$0x1f] }
 0x4cf   : > { %v5383_v57 = vpack.c.bf16 %v4514_v3, %v4513_v52  ;;  %v5488_v3 = vmov 0.0|0.0   ;;  %v4723_v52 = vld [vmem:[%s8130_s8] sm:$0x1f] }
 0x4d0   : > { %5423 = vmatprep.subr.bf16.mxu1 %v5488_v3 }
 0x4d1   : > { %5385 = vmatprep.subr.msk.bf16.mxu0 %vm8013_vm6, %v5383_v57 }
 0x4d2   : > { %5388 = vmatpush3.bf16.xpose.msk.msra.mxu0 %vm8013_vm6, %v7824_v22  ;;  %v4527_v22 = vld [vmem:[%s8128_s6] sm:$0xff] }
 0x4d3   : > { %4531 = vperm.xlu0 %5454, %v4527_v22  }
 0x4e9   : > { %v5325_v59 = vpop.f32.mrb[22].mxu1 }
 0x4ea   : > { %v4450_v19 = vadd.f32 %v5325_v59, %v7645_v20  ;;  %v4444_v1 = vpop.f32.mrb[23].mxu1 }
 0x4eb   : > { %v4445_v55 = vadd.f32 %v7645_v20, %v4444_v1 }
 0x4ec   : > { %v4516_v45 = vmax.f32 %v4450_v19, 0.0 }
 0x4ed   : > { %v4515_v42 = vmax.f32 %v4445_v55, 0.0 }
 0x4ef   : > { %v5389_v35 = vpack.c.bf16 %v4516_v45, %v4515_v42  ;;  %v4813_v45 = vld [vmem:[%s8131_s9] sm:$0xf] }
 0x4f1   : > { %5391 = vmatprep.subr.msk.bf16.mxu0 %vm8013_vm6, %v5389_v35 }
 0x4f2   : > { %5394 = vmatpush3.bf16.xpose.msk.msra.mxu0 %vm8013_vm6, %v7878_v9 }
 0x502   : > { %v4537_v11 = vpop.permute.xlu1 %4536 }
 0x509   : > { %v5328_v58 = vpop.f32.mrb[24].mxu1 }
 0x50a   : > { %v4460_v61 = vadd.f32 %v5328_v58, %v7645_v20  ;;  %v4454_v63 = vpop.f32.mrb[25].mxu1 }
 0x50b   : > { %v4455_v60 = vadd.f32 %v7645_v20, %v4454_v63 }
 0x50c   : > { %v4518_v9 = vmax.f32 %v4460_v61, 0.0 }
 0x50d   : > { %v4517_v27 = vmax.f32 %v4455_v60, 0.0 }
 0x50f   : > { %v5395_v50 = vpack.c.bf16 %v4518_v9, %v4517_v27 }
 0x511   : > { %5397 = vmatprep.subr.msk.bf16.mxu0 %vm8013_vm6, %v5395_v50 }
 0x512   : > { %5400 = vmatpush3.bf16.xpose.msk.msra.mxu0 %vm8013_vm6, %v7921_v46 }
 0x529   : > { %v5331_v5 = vpop.f32.mrb[26].mxu1 }
 0x52a   : > { %v4470_v4 = vadd.f32 %v5331_v5, %v7645_v20  ;;  %v4464_v18 = vpop.f32.mrb[27].mxu1 }
 0x52b   : > { %v4465_v30 = vadd.f32 %v7645_v20, %v4464_v18 }
 0x52c   : > { %v4520_v29 = vmax.f32 %v4470_v4, 0.0 }
 0x52d   : > { %v4519_v32 = vmax.f32 %v4465_v30, 0.0 }
 0x52f   : > { %v5401_v41 = vpack.c.bf16 %v4520_v29, %v4519_v32 }
 0x531   : > { %5403 = vmatprep.subr.msk.bf16.mxu0 %vm8013_vm6, %v5401_v41 }
 0x532   : > { %5406 = vmatpush3.bf16.xpose.msk.msra.mxu0 %vm8013_vm6, %v7946_v33  ;;  %v5461_v33 = vld [vmem:[%s8126_s4] ss:$0 sm:$0xff] }
 0x549   : > { %v5334_v15 = vpop.f32.mrb[28].mxu1 }
 0x54a   : > { %v4480_v26 = vadd.f32 %v5334_v15, %v7645_v20  ;;  %v4474_v46 = vpop.f32.mrb[29].mxu1 }
 0x54b   : > { %v4475_v13 = vadd.f32 %v7645_v20, %v4474_v46 }
 0x54c   : > { %v4522_v37 = vmax.f32 %v4480_v26, 0.0 }
 0x54d   : > { %v4521_v51 = vmax.f32 %v4475_v13, 0.0 }
 0x54f   : > { %v5407_v38 = vpack.c.bf16 %v4522_v37, %v4521_v51 }
 0x551   : > { %5409 = vmatprep.subr.msk.bf16.mxu0 %vm8013_vm6, %v5407_v38 }
 0x552   : > { %5412 = vmatpush3.bf16.xpose.msk.msra.mxu0 %vm8013_vm6, %v7970_v8  ;;  %v4526_v8 = vld [vmem:[%s8127_s5 + $0x8] sm:$0xff]  ;;  %v4532_v6 = vpop.permute.xlu0 %4531 }
 0x566   : > { %v5337_v54 = vpop.f32.mrb[30].mxu1 }
 0x567   : > { %v4490_v16 = vadd.f32 %v5461_v33, %v5337_v54  ;;  %v4484_v10 = vpop.f32.mrb[31].mxu1 }
 0x568   : > { %v4485_v40 = vadd.f32 %v5461_v33, %v4484_v10 }
 0x569   : > { %v4524_v36 = vmax.f32 %v4490_v16, 0.0 }
 0x56a   : > { %v4523_v20 = vmax.f32 %v4485_v40, 0.0 }
 0x56c   : > { %v5413_v12 = vpack.c.bf16 %v4524_v36, %v4523_v20 }
 0x56e   : > { %5415 = vmatprep.subr.msk.bf16.mxu0 %vm8013_vm6, %v5413_v12 }
 0x56f   : > { %5418 = vmatpush3.bf16.xpose.msk.msra.mxu0 %vm8013_vm6, %v7994_v43 }
 0x576   : > { %5210 = vmatmul.mubr.msk.f32.vlgmr.msra.gmra.mrb[32].mxu0 %vm3925_vm15, %v4525_v44 }
 0x577   : > { %5211 = vmatprep.mubr.msk.f32.mxu0 %vm3925_vm15, %v4526_v8 }
 0x57a   : > { %5212 = vmatmul.mubr.msk.f32.gmra.mrb[34].mxu0 %vm3925_vm15, %v4526_v8 }
 0x57b   : > { %4796 = vmatprep.mubr.f32.mxu0 %v5470_v0 }
 0x649   : > { %v4707_v7 = vpop.f32.mrb[32].mxu0 }
 0x64a   : > { %v4708_v14 = vadd.f32 %v4707_v7, %v4532_v6  ;;  %v4709_v56 = vpop.f32.mrb[33].mxu0 }
 0x64b   : > { %v4710_v24 = vadd.f32 %v4709_v56, %v4532_v6 }
 0x64c   : > { %v4718_v53 = vmax.f32 %v4708_v14, 0.0 }
 0x64d   : > { %v4719_v43 = vmax.f32 %v4710_v24, 0.0  ;;  %v4713_v49 = vpop.f32.mrb[34].mxu0 }
 0x64e   : > { %v4714_v21 = vadd.f32 %v4713_v49, %v4537_v11  ;;  %v4715_v62 = vpop.f32.mrb[35].mxu0 }
 0x64f   : > { %v4805_v34 = vadd.f32 %v4719_v43, %v4718_v53  ;;  %v4716_v25 = vadd.f32 %v4715_v62, %v4537_v11 }
 0x650   : > { %v4720_v47 = vmax.f32 %v4714_v21, 0.0 }
 0x651   : > { %v4721_v17 = vmax.f32 %v4716_v25, 0.0  ;;  %4806 = vadd.xlane.f32.xlu1 %v4805_v34 }
 0x652   : > { %v5421_v28 = vpack.c.bf16 %v4720_v47, %v4718_v53 }
 0x653   : > { %v5419_v39 = vpack.c.bf16 %v4721_v17, %v4719_v43  ;;  %v4808_v48 = vadd.f32 %v4721_v17, %v4720_v47 }
 0x655   : > { %4809 = vadd.xlane.f32.xlu0 %v4808_v48  ;;  %5420 = vmatprep.subr.bf16.mxu0 %v5419_v39 }
 0x656   : > { %5422 = vmatpush1.bf16.msra.mxu0 %v5421_v28 }
 0x659   : > { %5093 = vmatmul.mubr.msk.f32.vlgmr.msra.gmra.mrb[36].mxu0 %vm3925_vm15, %v4722_v23 }
 0x66b   : > { %4726 = vperm.xlu0 %5454, %v4723_v52  }
 0x6de   : > { %v4807_v57 = vpop.xlane.xlu1 %4806 }
 0x6df   : > { %v4811_v19 = vmul.f32 0.00390625, %v4807_v57 }
 0x6e2   : > { %v4810_v59 = vpop.xlane.xlu0 %4809 }
 0x6e3   : > { %v4812_v1 = vmul.f32 0.00390625, %v4810_v59 }
 0x6e5   : > { %v5424_v55 = vpack.c.bf16 %v4812_v1, %v4811_v19 }
 0x6e7   : > { %5425 = vmatpush3.bf16.msra.mxu1 %v5424_v55 }
 0x6ea   : > { %5343 = vmatmul.mubr.msk.f32.vlgmr.msra.gmra.mrb[32].mxu1 %vm3925_vm15, %v4813_v45  ;;  %v4727_v42 = vpop.permute.xlu0 %4726 }
 0x72c   : > { %v4798_v0 = vpop.f32.mrb[36].mxu0 }
 0x72d   : > { %v4799_v35 = vadd.f32 %v4798_v0, %v4727_v42  ;;  %v4800_v44 = vpop.f32.mrb[37].mxu0 }
 0x72e   : > { %v4801_v22 = vadd.f32 %v4800_v44, %v4727_v42 }
 0x72f   : > { %4803 = vst [vmem:[%s420_s29] sm:$0x1f] %v4799_v35 }
 0x730   : > { %4804 = vst [vmem:[%s420_s29 + $0x8] sm:$0x1f] %v4801_v22 }
 0x7bd   : > { %v4884_v31 = vpop.f32.mrb[32].mxu1 }
 0x7be   : > { %v4885_v58 = vadd.f32 %v4884_v31, %v4814_v2  ;;  %v5344_v61 = vpop.f32.mrb[33].mxu1 }
 0x7c0   : > { %v5095_v63 = vmul.f32 -1.442695, %v4885_v58 }
 0x7c2   : > { %5456 = vpow2.f32 %v5095_v63 }
 0x7cc   : > { %v5457_v60 = vpop.eup %5456 }
 0x7cd   : > { %v4891_v9 = vadd.f32 1.0, %v5457_v60 }
 0x7cf   : > { %5458 = vrcp.f32 %v4891_v9 }
 0x7d9   : > { %v5459_v27 = vpop.eup %5458 }
 0x7da   : > { %4895 = vst.msk [vmem:[%s424_s24] sm:$0xf] %vm4894_vm8, %v5459_v27 }
 0x7db PF: > { %s23_s21 = sadd.s32 1, %s5468_s21  }
 0x7dc   : > { %p20_p4 = scmp.ge.s32.totalorder %s23_s21, 4  }
 0x7de   :  { %22 = sbr.rel (!%p20_p4) target bundleno = 1 (0x1), region = 110 }

</bundles_post_ra>
